<compile_context>
chip_gen: v7x
topology: tpu7x:2x2x1
jax: 0.10.0
libtpu: 0.0.40
codegen_flags: <defaults>
</compile_context>

<pallas_src>
import functools

import jax
import jax.numpy as jnp
from jax import lax
from jax.experimental import pallas as pl
from jax.experimental.pallas import tpu as pltpu


def _mhsa_kernel(x_ref, gamma_ref, beta_ref, wq_ref, wk_ref, wv_ref,
                 wout_ref, bout_ref, o_ref, *, num_heads, head_dim, n_valid, eps):
    x = x_ref[0]                                     # (Np, D), Np padded to 128*k
    n_pad, d_model = x.shape
    hd = head_dim
    scale = hd ** -0.5
    mxu_dtype = wq_ref.dtype                         # bf16 (repacked in wrapper)

    # ---- LayerNorm (f32 stats; biased variance, eps inside rsqrt == PyTorch).
    xf = x.astype(jnp.float32)
    mean = jnp.mean(xf, axis=-1, keepdims=True)
    xc = xf - mean
    var = jnp.mean(xc * xc, axis=-1, keepdims=True)
    xn = xc * lax.rsqrt(var + eps)
    xn = xn * gamma_ref[...].astype(jnp.float32) + beta_ref[...].astype(jnp.float32)
    xn = xn.astype(mxu_dtype)                        # feed the MXU in bf16

    # ---- Lane-dense Q/K/V projections: (Np, D) @ (D, inner); inner on the lane axis.
    # 1/sqrt(hd) folded into q (N x inner work, not N x N).
    q = (jnp.dot(xn, wq_ref[...], preferred_element_type=jnp.float32)
         * scale).astype(mxu_dtype)
    k = jnp.dot(xn, wk_ref[...], preferred_element_type=jnp.float32).astype(mxu_dtype)
    v = jnp.dot(xn, wv_ref[...], preferred_element_type=jnp.float32).astype(mxu_dtype)

    # Mask for padded key columns (hoisted out of the head loop).
    if n_valid < n_pad:
        col = lax.broadcasted_iota(jnp.int32, (n_pad, n_pad), 1)
        key_mask = col < n_valid
    else:
        key_mask = None

    # ---- Per-head attention. Static Python loop -> static lane slices of q/k/v and a
    # static leading-axis index of w_out; live state bounded by the (Np, D) accumulator.
    # TODO(synk): for large H switch to fori_loop over VMEM scratch refs to cap code size.
    acc = jnp.zeros((n_pad, d_model), jnp.float32)
    for h in range(num_heads):
        qh = q[:, h * hd:(h + 1) * hd]               # (Np, hd) bf16
        kh = k[:, h * hd:(h + 1) * hd]
        vh = v[:, h * hd:(h + 1) * hd]

        # scores = q_h @ k_h.T (contraction on head_dim; bf16 in, f32 out, no transpose).
        s = lax.dot_general(qh, kh, (((1,), (1,)), ((), ())),
                            preferred_element_type=jnp.float32)   # (Np, Np)
        if key_mask is not None:
            s = jnp.where(key_mask, s, -1e30)

        # Softmax in f32 (EUP exp); normalization deferred to after the PV matmul.
        # TODO(synk): on v6e/v7x (bf16 EUP) p can be computed/kept in bf16 directly.
        m = jnp.max(s, axis=-1, keepdims=True)
        p = jnp.exp(s - m)                                        # unnormalized probs
        denom = jnp.sum(p, axis=-1, keepdims=True)                # (Np, 1)
        # TODO(synk): if the XLU row-sum is the binding slot, fold denom into the PV
        # matmul via an appended ones column instead.

        pv = jnp.dot(p.astype(mxu_dtype), vh,
                     preferred_element_type=jnp.float32)          # (Np, hd)
        pv = pv * pl.reciprocal(denom, approx=True)               # normalize post-PV

        # out += attn_h @ w_out[h] -> (Np, D) lane-dense; replaces '(h d)' concat + proj.
        acc = acc + jnp.dot(pv.astype(mxu_dtype), wout_ref[h],
                            preferred_element_type=jnp.float32)

    o_ref[0] = (acc + bout_ref[...].astype(jnp.float32)).astype(o_ref.dtype)


def mhsa_pallas(x, gamma, beta, w_qkv, w_out, b_out, *,
                num_heads, head_dim, eps=1e-5, param_dtype=jnp.bfloat16):
    B, N, D = x.shape
    H, hd = num_heads, head_dim
    inner = H * hd
    assert w_qkv.shape == (D, 3 * inner)
    assert w_out.shape == (inner, D)

    # Pad tokens to a lane-dense multiple of 128 (e.g. ViT's 197 -> 256); padded key
    # columns are masked inside the kernel, padded query rows stripped below.
    n_pad = ((N + 127) // 128) * 128
    x_p = jnp.pad(x, ((0, 0), (0, n_pad - N), (0, 0))) if n_pad != N else x

    # One-time repack: bf16 weights, lane-dense (D, inner) Q/K/V weights, per-head
    # (hd, D) output projection (lane dim D), 2-D LN/bias params.
    w_q = w_qkv[:, 0 * inner:1 * inner].astype(param_dtype)
    w_k = w_qkv[:, 1 * inner:2 * inner].astype(param_dtype)
    w_v = w_qkv[:, 2 * inner:3 * inner].astype(param_dtype)
    w_o = w_out.reshape(H, hd, D).astype(param_dtype)
    gamma2 = gamma.reshape(1, D)
    beta2 = beta.reshape(1, D)
    b_out2 = b_out.reshape(1, D)

    kernel = functools.partial(_mhsa_kernel, num_heads=H, head_dim=hd,
                               n_valid=N, eps=eps)

    def build(single_buffer_params):
        def const_spec(shape):
            nd = len(shape)
            imap = lambda b: (0,) * nd
            if single_buffer_params:
                # Constant index_map across the grid: the 2nd pipeline buffer is never
                # used after step 0; a single buffer halves resident weight VMEM.
                return pl.BlockSpec(shape, imap, pipeline_mode=pl.Buffered(1))
            return pl.BlockSpec(shape, imap)

        return pl.pallas_call(
            kernel,
            out_shape=jax.ShapeDtypeStruct((B, n_pad, D), x.dtype),
            grid_spec=pltpu.PrefetchScalarGridSpec(
                num_scalar_prefetch=0,
                grid=(B,),
                in_specs=[
                    pl.BlockSpec((1, n_pad, D), lambda b: (b, 0, 0)),  # x
                    const_spec((1, D)),            # LN gamma
                    const_spec((1, D)),            # LN beta
                    const_spec((D, inner)),        # w_q (lane-dense)
                    const_spec((D, inner)),        # w_k (lane-dense)
                    const_spec((D, inner)),        # w_v (lane-dense)
                    const_spec((H, hd, D)),        # w_out (per head, lane dim D)
                    const_spec((1, D)),            # b_out
                ],
                out_specs=pl.BlockSpec((1, n_pad, D), lambda b: (b, 0, 0)),
            ),
            compiler_params=pltpu.CompilerParams(
                dimension_semantics=("parallel",),   # batch across TCs (v7x megacore)
                vmem_limit_bytes=64 * 1024 * 1024,
            ),
        )

    args = (x_p, gamma2, beta2, w_q, w_k, w_v, w_o, b_out2)
    try:
        out = jax.block_until_ready(build(True)(*args))
    except Exception:
        # pipeline_mode / Buffered(1) unsupported on this jax build: retry with the
        # default double-buffered specs (identical semantics, slightly more VMEM).
        out = build(False)(*args)

    return out[:, :N, :] if n_pad != N else out


def mhsa_reference(x, gamma, beta, w_qkv, w_out, b_out, *, num_heads, head_dim, eps=1e-5):
    # Pure-JAX (f32) reference of the PyTorch forward pass.
    x = x.astype(jnp.float32)
    mean = jnp.mean(x, axis=-1, keepdims=True)
    var = jnp.mean((x - mean) ** 2, axis=-1, keepdims=True)
    xn = (x - mean) * lax.rsqrt(var + eps) * gamma + beta
    qkv = xn @ w_qkv
    inner = num_heads * head_dim
    q, k, v = qkv[..., :inner], qkv[..., inner:2 * inner], qkv[..., 2 * inner:]
    B, N, _ = x.shape

    def split_heads(t):
        return t.reshape(B, N, num_heads, head_dim).transpose(0, 2, 1, 3)
    q, k, v = map(split_heads, (q, k, v))
    scores = jnp.einsum("bhnd,bhmd->bhnm", q, k) * (head_dim ** -0.5)
    probs = jax.nn.softmax(scores, axis=-1)
    out = jnp.einsum("bhnm,bhmd->bhnd", probs, v)
    out = out.transpose(0, 2, 1, 3).reshape(B, N, inner)
    return out @ w_out + b_out


if __name__ == "__main__":
    # Small shapes consistent with the module.
    B, N, D = 2, 8, 32           # batch, seq (tokens), embedding_dim
    num_heads, head_dim = 2, 16  # inner_dim = 32
    inner = num_heads * head_dim

    key = jax.random.PRNGKey(0)
    kx, kqkv, kout, kb, kg = jax.random.split(key, 5)

    x = jax.random.normal(kx, (B, N, D), dtype=jnp.float32)

    # Deterministic parameter init (synthetic, not a checkpoint).
    gamma = jnp.ones((D,), jnp.float32)
    beta = jnp.zeros((D,), jnp.float32)
    w_qkv = jax.random.normal(kqkv, (D, 3 * inner), jnp.float32) * 0.05
    w_out = jax.random.normal(kout, (inner, D), jnp.float32) * 0.05
    b_out = jax.random.normal(kb, (D,), jnp.float32) * 0.01

    y = mhsa_pallas(x, gamma, beta, w_qkv, w_out, b_out,
                    num_heads=num_heads, head_dim=head_dim)
    y = jax.block_until_ready(y)

    y_ref = mhsa_reference(x, gamma, beta, w_qkv, w_out, b_out,
                           num_heads=num_heads, head_dim=head_dim)
    # Tolerance accounts for bf16 MXU operands + pl.reciprocal(approx=True) vs f32 ref.
    max_err = float(jnp.max(jnp.abs(y - y_ref)))
    assert jnp.allclose(y, y_ref, atol=3e-2, rtol=5e-2), max_err

    print("KERNEL_OK")
</pallas_src>

<mosaic_0001>
module attributes {stable_mosaic.version = 11 : i64} {
  func.func @_mhsa_kernel(%arg0: i32, %arg1: memref<1x128x32xf32, #tpu.memory_space<vmem>>, %arg2: memref<1x32xf32, #tpu.memory_space<vmem>>, %arg3: memref<1x32xf32, #tpu.memory_space<vmem>>, %arg4: memref<32x32xbf16, #tpu.memory_space<vmem>>, %arg5: memref<32x32xbf16, #tpu.memory_space<vmem>>, %arg6: memref<32x32xbf16, #tpu.memory_space<vmem>>, %arg7: memref<2x16x32xbf16, #tpu.memory_space<vmem>>, %arg8: memref<1x32xf32, #tpu.memory_space<vmem>>, %arg9: memref<1x128x32xf32, #tpu.memory_space<vmem>>) attributes {dimension_semantics = [#tpu.dimension_semantics<parallel>], iteration_bounds = array<i64: 2>, scalar_prefetch = 0 : i64, scratch_operands = 0 : i64, tpu.core_type = #tpu.core_type<tc>, window_params = [{transform_indices = @transform_0, window_bounds = array<i64: 1, 128, 32>}, {pipeline_mode = #tpu.pipeline_mode<synchronous>, transform_indices = @transform_1, window_bounds = array<i64: 1, 32>}, {pipeline_mode = #tpu.pipeline_mode<synchronous>, transform_indices = @transform_2, window_bounds = array<i64: 1, 32>}, {pipeline_mode = #tpu.pipeline_mode<synchronous>, transform_indices = @transform_3, window_bounds = array<i64: 32, 32>}, {pipeline_mode = #tpu.pipeline_mode<synchronous>, transform_indices = @transform_4, window_bounds = array<i64: 32, 32>}, {pipeline_mode = #tpu.pipeline_mode<synchronous>, transform_indices = @transform_5, window_bounds = array<i64: 32, 32>}, {pipeline_mode = #tpu.pipeline_mode<synchronous>, transform_indices = @transform_6, window_bounds = array<i64: 2, 16, 32>}, {pipeline_mode = #tpu.pipeline_mode<synchronous>, transform_indices = @transform_7, window_bounds = array<i64: 1, 32>}, {transform_indices = @transform_8, window_bounds = array<i64: 1, 128, 32>}]} {
    %c0 = arith.constant 0 : index
    %c0_0 = arith.constant 0 : index
    %c0_1 = arith.constant 0 : index
    %0 = vector.load %arg1[%c0, %c0_0, %c0_1] : memref<1x128x32xf32, #tpu.memory_space<vmem>>, vector<1x128x32xf32>
    %1 = vector.shape_cast %0 : vector<1x128x32xf32> to vector<128x32xf32>
    %cst = arith.constant dense<0.000000e+00> : vector<128xf32>
    %2 = vector.multi_reduction <add>, %1, %cst [1] : vector<128x32xf32> to vector<128xf32>
    %3 = vector.shape_cast %2 : vector<128xf32> to vector<128x1xf32>
    %cst_2 = arith.constant 3.200000e+01 : f32
    %4 = vector.broadcast %cst_2 : f32 to vector<128x1xf32>
    %5 = arith.divf %3, %4 : vector<128x1xf32>
    %6 = vector.broadcast %5 : vector<128x1xf32> to vector<128x32xf32>
    %7 = arith.subf %1, %6 : vector<128x32xf32>
    %8 = arith.mulf %7, %7 : vector<128x32xf32>
    %cst_3 = arith.constant dense<0.000000e+00> : vector<128xf32>
    %9 = vector.multi_reduction <add>, %8, %cst_3 [1] : vector<128x32xf32> to vector<128xf32>
    %10 = vector.shape_cast %9 : vector<128xf32> to vector<128x1xf32>
    %cst_4 = arith.constant 3.200000e+01 : f32
    %11 = vector.broadcast %cst_4 : f32 to vector<128x1xf32>
    %12 = arith.divf %10, %11 : vector<128x1xf32>
    %cst_5 = arith.constant 9.99999974E-6 : f32
    %13 = vector.broadcast %cst_5 : f32 to vector<128x1xf32>
    %14 = arith.addf %12, %13 : vector<128x1xf32>
    %15 = math.rsqrt %14 : vector<128x1xf32>
    %16 = vector.broadcast %15 : vector<128x1xf32> to vector<128x32xf32>
    %17 = arith.mulf %7, %16 : vector<128x32xf32>
    %c0_6 = arith.constant 0 : index
    %c0_7 = arith.constant 0 : index
    %18 = vector.load %arg2[%c0_6, %c0_7] : memref<1x32xf32, #tpu.memory_space<vmem>>, vector<1x32xf32>
    %19 = vector.broadcast %18 : vector<1x32xf32> to vector<128x32xf32>
    %20 = arith.mulf %17, %19 : vector<128x32xf32>
    %c0_8 = arith.constant 0 : index
    %c0_9 = arith.constant 0 : index
    %21 = vector.load %arg3[%c0_8, %c0_9] : memref<1x32xf32, #tpu.memory_space<vmem>>, vector<1x32xf32>
    %22 = vector.broadcast %21 : vector<1x32xf32> to vector<128x32xf32>
    %23 = arith.addf %20, %22 : vector<128x32xf32>
    %24 = arith.truncf %23 : vector<128x32xf32> to vector<128x32xbf16>
    %c0_10 = arith.constant 0 : index
    %c0_11 = arith.constant 0 : index
    %25 = vector.load %arg4[%c0_10, %c0_11] : memref<32x32xbf16, #tpu.memory_space<vmem>>, vector<32x32xbf16>
    %cst_12 = arith.constant dense<0.000000e+00> : vector<128x32xf32>
    %26 = tpu.matmul %24, %25, %cst_12 {dimension_numbers = #tpu.dot_dimension_numbers<[1], [0], [0], [1], [0, 0, 1, 1], [], []>} : vector<128x32xbf16>, vector<32x32xbf16>, vector<128x32xf32> -> vector<128x32xf32>
    %cst_13 = arith.constant 2.500000e-01 : f32
    %27 = vector.broadcast %cst_13 : f32 to vector<128x32xf32>
    %28 = arith.mulf %26, %27 : vector<128x32xf32>
    %29 = arith.truncf %28 : vector<128x32xf32> to vector<128x32xbf16>
    %c0_14 = arith.constant 0 : index
    %c0_15 = arith.constant 0 : index
    %30 = vector.load %arg5[%c0_14, %c0_15] : memref<32x32xbf16, #tpu.memory_space<vmem>>, vector<32x32xbf16>
    %cst_16 = arith.constant dense<0.000000e+00> : vector<128x32xf32>
    %31 = tpu.matmul %24, %30, %cst_16 {dimension_numbers = #tpu.dot_dimension_numbers<[1], [0], [0], [1], [0, 0, 1, 1], [], []>} : vector<128x32xbf16>, vector<32x32xbf16>, vector<128x32xf32> -> vector<128x32xf32>
    %32 = arith.truncf %31 : vector<128x32xf32> to vector<128x32xbf16>
    %c0_17 = arith.constant 0 : index
    %c0_18 = arith.constant 0 : index
    %33 = vector.load %arg6[%c0_17, %c0_18] : memref<32x32xbf16, #tpu.memory_space<vmem>>, vector<32x32xbf16>
    %cst_19 = arith.constant dense<0.000000e+00> : vector<128x32xf32>
    %34 = tpu.matmul %24, %33, %cst_19 {dimension_numbers = #tpu.dot_dimension_numbers<[1], [0], [0], [1], [0, 0, 1, 1], [], []>} : vector<128x32xbf16>, vector<32x32xbf16>, vector<128x32xf32> -> vector<128x32xf32>
    %35 = arith.truncf %34 : vector<128x32xf32> to vector<128x32xbf16>
    %36 = tpu.iota {dimensions = array<i32: 1>} : vector<128x128xi32>
    %c8_i32 = arith.constant 8 : i32
    %37 = vector.broadcast %c8_i32 : i32 to vector<128x128xi32>
    %38 = arith.cmpi slt, %36, %37 : vector<128x128xi32>
    %cst_20 = arith.constant 0.000000e+00 : f32
    %39 = vector.broadcast %cst_20 : f32 to vector<128x32xf32>
    %40 = vector.extract_strided_slice %29 {offsets = [0, 0], sizes = [128, 16], strides = [1, 1]} : vector<128x32xbf16> to vector<128x16xbf16>
    %41 = vector.extract_strided_slice %32 {offsets = [0, 0], sizes = [128, 16], strides = [1, 1]} : vector<128x32xbf16> to vector<128x16xbf16>
    %42 = vector.extract_strided_slice %35 {offsets = [0, 0], sizes = [128, 16], strides = [1, 1]} : vector<128x32xbf16> to vector<128x16xbf16>
    %cst_21 = arith.constant dense<0.000000e+00> : vector<128x128xf32>
    %43 = tpu.matmul %40, %41, %cst_21 {dimension_numbers = #tpu.dot_dimension_numbers<[1], [1], [0], [0], [0, 0, 1, 0], [], []>} : vector<128x16xbf16>, vector<128x16xbf16>, vector<128x128xf32> -> vector<128x128xf32>
    %cst_22 = arith.constant -1.000000e+30 : f32
    %44 = vector.broadcast %cst_22 : f32 to vector<128x128xf32>
    %45 = arith.select %38, %43, %44 : vector<128x128xi1>, vector<128x128xf32>
    %cst_23 = arith.constant dense<0xFF800000> : vector<128xf32>
    %46 = vector.multi_reduction <maximumf>, %45, %cst_23 [1] : vector<128x128xf32> to vector<128xf32>
    %47 = vector.shape_cast %46 : vector<128xf32> to vector<128x1xf32>
    %48 = vector.broadcast %47 : vector<128x1xf32> to vector<128x128xf32>
    %49 = arith.subf %45, %48 : vector<128x128xf32>
    %50 = math.exp %49 : vector<128x128xf32>
    %cst_24 = arith.constant dense<0.000000e+00> : vector<128xf32>
    %51 = vector.multi_reduction <add>, %50, %cst_24 [1] : vector<128x128xf32> to vector<128xf32>
    %52 = vector.shape_cast %51 : vector<128xf32> to vector<128x1xf32>
    %53 = arith.truncf %50 : vector<128x128xf32> to vector<128x128xbf16>
    %cst_25 = arith.constant dense<0.000000e+00> : vector<128x16xf32>
    %54 = tpu.matmul %53, %42, %cst_25 {dimension_numbers = #tpu.dot_dimension_numbers<[1], [0], [0], [1], [0, 0, 1, 1], [], []>} : vector<128x128xbf16>, vector<128x16xbf16>, vector<128x16xf32> -> vector<128x16xf32>
    %55 = tpu.reciprocal %52 {approx = true} : vector<128x1xf32> -> vector<128x1xf32>
    %56 = vector.broadcast %55 : vector<128x1xf32> to vector<128x16xf32>
    %57 = arith.mulf %54, %56 : vector<128x16xf32>
    %58 = arith.truncf %57 : vector<128x16xf32> to vector<128x16xbf16>
    %c0_26 = arith.constant 0 : index
    %c0_27 = arith.constant 0 : index
    %c0_28 = arith.constant 0 : index
    %59 = vector.load %arg7[%c0_26, %c0_27, %c0_28] : memref<2x16x32xbf16, #tpu.memory_space<vmem>>, vector<1x16x32xbf16>
    %60 = vector.shape_cast %59 : vector<1x16x32xbf16> to vector<16x32xbf16>
    %cst_29 = arith.constant dense<0.000000e+00> : vector<128x32xf32>
    %61 = tpu.matmul %58, %60, %cst_29 {dimension_numbers = #tpu.dot_dimension_numbers<[1], [0], [0], [1], [0, 0, 1, 1], [], []>} : vector<128x16xbf16>, vector<16x32xbf16>, vector<128x32xf32> -> vector<128x32xf32>
    %62 = arith.addf %39, %61 : vector<128x32xf32>
    %63 = vector.extract_strided_slice %29 {offsets = [0, 16], sizes = [128, 16], strides = [1, 1]} : vector<128x32xbf16> to vector<128x16xbf16>
    %64 = vector.extract_strided_slice %32 {offsets = [0, 16], sizes = [128, 16], strides = [1, 1]} : vector<128x32xbf16> to vector<128x16xbf16>
    %65 = vector.extract_strided_slice %35 {offsets = [0, 16], sizes = [128, 16], strides = [1, 1]} : vector<128x32xbf16> to vector<128x16xbf16>
    %cst_30 = arith.constant dense<0.000000e+00> : vector<128x128xf32>
    %66 = tpu.matmul %63, %64, %cst_30 {dimension_numbers = #tpu.dot_dimension_numbers<[1], [1], [0], [0], [0, 0, 1, 0], [], []>} : vector<128x16xbf16>, vector<128x16xbf16>, vector<128x128xf32> -> vector<128x128xf32>
    %cst_31 = arith.constant -1.000000e+30 : f32
    %67 = vector.broadcast %cst_31 : f32 to vector<128x128xf32>
    %68 = arith.select %38, %66, %67 : vector<128x128xi1>, vector<128x128xf32>
    %cst_32 = arith.constant dense<0xFF800000> : vector<128xf32>
    %69 = vector.multi_reduction <maximumf>, %68, %cst_32 [1] : vector<128x128xf32> to vector<128xf32>
    %70 = vector.shape_cast %69 : vector<128xf32> to vector<128x1xf32>
    %71 = vector.broadcast %70 : vector<128x1xf32> to vector<128x128xf32>
    %72 = arith.subf %68, %71 : vector<128x128xf32>
    %73 = math.exp %72 : vector<128x128xf32>
    %cst_33 = arith.constant dense<0.000000e+00> : vector<128xf32>
    %74 = vector.multi_reduction <add>, %73, %cst_33 [1] : vector<128x128xf32> to vector<128xf32>
    %75 = vector.shape_cast %74 : vector<128xf32> to vector<128x1xf32>
    %76 = arith.truncf %73 : vector<128x128xf32> to vector<128x128xbf16>
    %cst_34 = arith.constant dense<0.000000e+00> : vector<128x16xf32>
    %77 = tpu.matmul %76, %65, %cst_34 {dimension_numbers = #tpu.dot_dimension_numbers<[1], [0], [0], [1], [0, 0, 1, 1], [], []>} : vector<128x128xbf16>, vector<128x16xbf16>, vector<128x16xf32> -> vector<128x16xf32>
    %78 = tpu.reciprocal %75 {approx = true} : vector<128x1xf32> -> vector<128x1xf32>
    %79 = vector.broadcast %78 : vector<128x1xf32> to vector<128x16xf32>
    %80 = arith.mulf %77, %79 : vector<128x16xf32>
    %81 = arith.truncf %80 : vector<128x16xf32> to vector<128x16xbf16>
    %c1 = arith.constant 1 : index
    %c0_35 = arith.constant 0 : index
    %c0_36 = arith.constant 0 : index
    %82 = vector.load %arg7[%c1, %c0_35, %c0_36] : memref<2x16x32xbf16, #tpu.memory_space<vmem>>, vector<1x16x32xbf16>
    %83 = vector.shape_cast %82 : vector<1x16x32xbf16> to vector<16x32xbf16>
    %cst_37 = arith.constant dense<0.000000e+00> : vector<128x32xf32>
    %84 = tpu.matmul %81, %83, %cst_37 {dimension_numbers = #tpu.dot_dimension_numbers<[1], [0], [0], [1], [0, 0, 1, 1], [], []>} : vector<128x16xbf16>, vector<16x32xbf16>, vector<128x32xf32> -> vector<128x32xf32>
    %85 = arith.addf %62, %84 : vector<128x32xf32>
    %c0_38 = arith.constant 0 : index
    %c0_39 = arith.constant 0 : index
    %86 = vector.load %arg8[%c0_38, %c0_39] : memref<1x32xf32, #tpu.memory_space<vmem>>, vector<1x32xf32>
    %87 = vector.broadcast %86 : vector<1x32xf32> to vector<128x32xf32>
    %88 = arith.addf %85, %87 : vector<128x32xf32>
    %c0_40 = arith.constant 0 : index
    %c0_41 = arith.constant 0 : index
    %c0_42 = arith.constant 0 : index
    %89 = vector.load %arg9[%c0_40, %c0_41, %c0_42] : memref<1x128x32xf32, #tpu.memory_space<vmem>>, vector<1x128x32xf32>
    %90 = vector.shape_cast %89 : vector<1x128x32xf32> to vector<128x32xf32>
    %91 = vector.shape_cast %88 : vector<128x32xf32> to vector<1x128x32xf32>
    tpu.vector_store %arg9[%c0_40, %c0_41, %c0_42], %91 {strides = array<i32>} : memref<1x128x32xf32, #tpu.memory_space<vmem>>, vector<1x128x32xf32>,
    return
  }
  func.func @transform_0(%arg0: i32) -> (i32, i32, i32) {
    %c0_i32 = arith.constant 0 : i32
    %c0_i32_0 = arith.constant 0 : i32
    %c0_i32_1 = arith.constant 0 : i32
    return %arg0, %c0_i32, %c0_i32_0 : i32, i32, i32
  }
  func.func @transform_1(%arg0: i32) -> (i32, i32) {
    %c0_i32 = arith.constant 0 : i32
    %c0_i32_0 = arith.constant 0 : i32
    %c0_i32_1 = arith.constant 0 : i32
    return %c0_i32, %c0_i32_0 : i32, i32
  }
  func.func @transform_2(%arg0: i32) -> (i32, i32) {
    %c0_i32 = arith.constant 0 : i32
    %c0_i32_0 = arith.constant 0 : i32
    %c0_i32_1 = arith.constant 0 : i32
    return %c0_i32, %c0_i32_0 : i32, i32
  }
  func.func @transform_3(%arg0: i32) -> (i32, i32) {
    %c0_i32 = arith.constant 0 : i32
    %c0_i32_0 = arith.constant 0 : i32
    %c0_i32_1 = arith.constant 0 : i32
    return %c0_i32, %c0_i32_0 : i32, i32
  }
  func.func @transform_4(%arg0: i32) -> (i32, i32) {
    %c0_i32 = arith.constant 0 : i32
    %c0_i32_0 = arith.constant 0 : i32
    %c0_i32_1 = arith.constant 0 : i32
    return %c0_i32, %c0_i32_0 : i32, i32
  }
  func.func @transform_5(%arg0: i32) -> (i32, i32) {
    %c0_i32 = arith.constant 0 : i32
    %c0_i32_0 = arith.constant 0 : i32
    %c0_i32_1 = arith.constant 0 : i32
    return %c0_i32, %c0_i32_0 : i32, i32
  }
  func.func @transform_6(%arg0: i32) -> (i32, i32, i32) {
    %c0_i32 = arith.constant 0 : i32
    %c0_i32_0 = arith.constant 0 : i32
    %c0_i32_1 = arith.constant 0 : i32
    %c0_i32_2 = arith.constant 0 : i32
    return %c0_i32, %c0_i32_0, %c0_i32_1 : i32, i32, i32
  }
  func.func @transform_7(%arg0: i32) -> (i32, i32) {
    %c0_i32 = arith.constant 0 : i32
    %c0_i32_0 = arith.constant 0 : i32
    %c0_i32_1 = arith.constant 0 : i32
    return %c0_i32, %c0_i32_0 : i32, i32
  }
  func.func @transform_8(%arg0: i32) -> (i32, i32, i32) {
    %c0_i32 = arith.constant 0 : i32
    %c0_i32_0 = arith.constant 0 : i32
    %c0_i32_1 = arith.constant 0 : i32
    return %arg0, %c0_i32, %c0_i32_0 : i32, i32, i32
  }
}

module attributes {stable_mosaic.version = 11 : i64} {
  func.func @_mhsa_kernel(%arg0: i32, %arg1: memref<1x128x32xf32, #tpu.memory_space<vmem>>, %arg2: memref<1x32xf32, #tpu.memory_space<vmem>>, %arg3: memref<1x32xf32, #tpu.memory_space<vmem>>, %arg4: memref<32x32xbf16, #tpu.memory_space<vmem>>, %arg5: memref<32x32xbf16, #tpu.memory_space<vmem>>, %arg6: memref<32x32xbf16, #tpu.memory_space<vmem>>, %arg7: memref<2x16x32xbf16, #tpu.memory_space<vmem>>, %arg8: memref<1x32xf32, #tpu.memory_space<vmem>>, %arg9: memref<1x128x32xf32, #tpu.memory_space<vmem>>) attributes {dimension_semantics = [#tpu.dimension_semantics<parallel>], iteration_bounds = array<i64: 2>, scalar_prefetch = 0 : i64, scratch_operands = 0 : i64, tpu.core_type = #tpu.core_type<tc>, window_params = [{transform_indices = @transform_0, window_bounds = array<i64: 1, 128, 32>}, {pipeline_mode = #tpu.pipeline_mode<synchronous>, transform_indices = @transform_1, window_bounds = array<i64: 1, 32>}, {pipeline_mode = #tpu.pipeline_mode<synchronous>, transform_indices = @transform_2, window_bounds = array<i64: 1, 32>}, {pipeline_mode = #tpu.pipeline_mode<synchronous>, transform_indices = @transform_3, window_bounds = array<i64: 32, 32>}, {pipeline_mode = #tpu.pipeline_mode<synchronous>, transform_indices = @transform_4, window_bounds = array<i64: 32, 32>}, {pipeline_mode = #tpu.pipeline_mode<synchronous>, transform_indices = @transform_5, window_bounds = array<i64: 32, 32>}, {pipeline_mode = #tpu.pipeline_mode<synchronous>, transform_indices = @transform_6, window_bounds = array<i64: 2, 16, 32>}, {pipeline_mode = #tpu.pipeline_mode<synchronous>, transform_indices = @transform_7, window_bounds = array<i64: 1, 32>}, {transform_indices = @transform_8, window_bounds = array<i64: 1, 128, 32>}]} {
    %c0 = arith.constant 0 : index
    %c0_0 = arith.constant 0 : index
    %c0_1 = arith.constant 0 : index
    %0 = vector.load %arg1[%c0, %c0_0, %c0_1] : memref<1x128x32xf32, #tpu.memory_space<vmem>>, vector<1x128x32xf32>
    %1 = vector.shape_cast %0 : vector<1x128x32xf32> to vector<128x32xf32>
    %cst = arith.constant dense<0.000000e+00> : vector<128xf32>
    %2 = vector.multi_reduction <add>, %1, %cst [1] : vector<128x32xf32> to vector<128xf32>
    %3 = vector.shape_cast %2 : vector<128xf32> to vector<128x1xf32>
    %cst_2 = arith.constant 3.200000e+01 : f32
    %4 = vector.broadcast %cst_2 : f32 to vector<128x1xf32>
    %5 = arith.divf %3, %4 : vector<128x1xf32>
    %6 = vector.broadcast %5 : vector<128x1xf32> to vector<128x32xf32>
    %7 = arith.subf %1, %6 : vector<128x32xf32>
    %8 = arith.mulf %7, %7 : vector<128x32xf32>
    %cst_3 = arith.constant dense<0.000000e+00> : vector<128xf32>
    %9 = vector.multi_reduction <add>, %8, %cst_3 [1] : vector<128x32xf32> to vector<128xf32>
    %10 = vector.shape_cast %9 : vector<128xf32> to vector<128x1xf32>
    %cst_4 = arith.constant 3.200000e+01 : f32
    %11 = vector.broadcast %cst_4 : f32 to vector<128x1xf32>
    %12 = arith.divf %10, %11 : vector<128x1xf32>
    %cst_5 = arith.constant 9.99999974E-6 : f32
    %13 = vector.broadcast %cst_5 : f32 to vector<128x1xf32>
    %14 = arith.addf %12, %13 : vector<128x1xf32>
    %15 = math.rsqrt %14 : vector<128x1xf32>
    %16 = vector.broadcast %15 : vector<128x1xf32> to vector<128x32xf32>
    %17 = arith.mulf %7, %16 : vector<128x32xf32>
    %c0_6 = arith.constant 0 : index
    %c0_7 = arith.constant 0 : index
    %18 = vector.load %arg2[%c0_6, %c0_7] : memref<1x32xf32, #tpu.memory_space<vmem>>, vector<1x32xf32>
    %19 = vector.broadcast %18 : vector<1x32xf32> to vector<128x32xf32>
    %20 = arith.mulf %17, %19 : vector<128x32xf32>
    %c0_8 = arith.constant 0 : index
    %c0_9 = arith.constant 0 : index
    %21 = vector.load %arg3[%c0_8, %c0_9] : memref<1x32xf32, #tpu.memory_space<vmem>>, vector<1x32xf32>
    %22 = vector.broadcast %21 : vector<1x32xf32> to vector<128x32xf32>
    %23 = arith.addf %20, %22 : vector<128x32xf32>
    %24 = arith.truncf %23 : vector<128x32xf32> to vector<128x32xbf16>
    %c0_10 = arith.constant 0 : index
    %c0_11 = arith.constant 0 : index
    %25 = vector.load %arg4[%c0_10, %c0_11] : memref<32x32xbf16, #tpu.memory_space<vmem>>, vector<32x32xbf16>
    %cst_12 = arith.constant dense<0.000000e+00> : vector<128x32xf32>
    %26 = tpu.matmul %24, %25, %cst_12 {dimension_numbers = #tpu.dot_dimension_numbers<[1], [0], [0], [1], [0, 0, 1, 1], [], []>} : vector<128x32xbf16>, vector<32x32xbf16>, vector<128x32xf32> -> vector<128x32xf32>
    %cst_13 = arith.constant 2.500000e-01 : f32
    %27 = vector.broadcast %cst_13 : f32 to vector<128x32xf32>
    %28 = arith.mulf %26, %27 : vector<128x32xf32>
    %29 = arith.truncf %28 : vector<128x32xf32> to vector<128x32xbf16>
    %c0_14 = arith.constant 0 : index
    %c0_15 = arith.constant 0 : index
    %30 = vector.load %arg5[%c0_14, %c0_15] : memref<32x32xbf16, #tpu.memory_space<vmem>>, vector<32x32xbf16>
    %cst_16 = arith.constant dense<0.000000e+00> : vector<128x32xf32>
    %31 = tpu.matmul %24, %30, %cst_16 {dimension_numbers = #tpu.dot_dimension_numbers<[1], [0], [0], [1], [0, 0, 1, 1], [], []>} : vector<128x32xbf16>, vector<32x32xbf16>, vector<128x32xf32> -> vector<128x32xf32>
    %32 = arith.truncf %31 : vector<128x32xf32> to vector<128x32xbf16>
    %c0_17 = arith.constant 0 : index
    %c0_18 = arith.constant 0 : index
    %33 = vector.load %arg6[%c0_17, %c0_18] : memref<32x32xbf16, #tpu.memory_space<vmem>>, vector<32x32xbf16>
    %cst_19 = arith.constant dense<0.000000e+00> : vector<128x32xf32>
    %34 = tpu.matmul %24, %33, %cst_19 {dimension_numbers = #tpu.dot_dimension_numbers<[1], [0], [0], [1], [0, 0, 1, 1], [], []>} : vector<128x32xbf16>, vector<32x32xbf16>, vector<128x32xf32> -> vector<128x32xf32>
    %35 = arith.truncf %34 : vector<128x32xf32> to vector<128x32xbf16>
    %36 = tpu.iota {dimensions = array<i32: 1>} : vector<128x128xi32>
    %c8_i32 = arith.constant 8 : i32
    %37 = vector.broadcast %c8_i32 : i32 to vector<128x128xi32>
    %38 = arith.cmpi slt, %36, %37 : vector<128x128xi32>
    %cst_20 = arith.constant 0.000000e+00 : f32
    %39 = vector.broadcast %cst_20 : f32 to vector<128x32xf32>
    %40 = vector.extract_strided_slice %29 {offsets = [0, 0], sizes = [128, 16], strides = [1, 1]} : vector<128x32xbf16> to vector<128x16xbf16>
    %41 = vector.extract_strided_slice %32 {offsets = [0, 0], sizes = [128, 16], strides = [1, 1]} : vector<128x32xbf16> to vector<128x16xbf16>
    %42 = vector.extract_strided_slice %35 {offsets = [0, 0], sizes = [128, 16], strides = [1, 1]} : vector<128x32xbf16> to vector<128x16xbf16>
    %cst_21 = arith.constant dense<0.000000e+00> : vector<128x128xf32>
    %43 = tpu.matmul %40, %41, %cst_21 {dimension_numbers = #tpu.dot_dimension_numbers<[1], [1], [0], [0], [0, 0, 1, 0], [], []>} : vector<128x16xbf16>, vector<128x16xbf16>, vector<128x128xf32> -> vector<128x128xf32>
    %cst_22 = arith.constant -1.000000e+30 : f32
    %44 = vector.broadcast %cst_22 : f32 to vector<128x128xf32>
    %45 = arith.select %38, %43, %44 : vector<128x128xi1>, vector<128x128xf32>
    %cst_23 = arith.constant dense<0xFF800000> : vector<128xf32>
    %46 = vector.multi_reduction <maximumf>, %45, %cst_23 [1] : vector<128x128xf32> to vector<128xf32>
    %47 = vector.shape_cast %46 : vector<128xf32> to vector<128x1xf32>
    %48 = vector.broadcast %47 : vector<128x1xf32> to vector<128x128xf32>
    %49 = arith.subf %45, %48 : vector<128x128xf32>
    %50 = math.exp %49 : vector<128x128xf32>
    %cst_24 = arith.constant dense<0.000000e+00> : vector<128xf32>
    %51 = vector.multi_reduction <add>, %50, %cst_24 [1] : vector<128x128xf32> to vector<128xf32>
    %52 = vector.shape_cast %51 : vector<128xf32> to vector<128x1xf32>
    %53 = arith.truncf %50 : vector<128x128xf32> to vector<128x128xbf16>
    %cst_25 = arith.constant dense<0.000000e+00> : vector<128x16xf32>
    %54 = tpu.matmul %53, %42, %cst_25 {dimension_numbers = #tpu.dot_dimension_numbers<[1], [0], [0], [1], [0, 0, 1, 1], [], []>} : vector<128x128xbf16>, vector<128x16xbf16>, vector<128x16xf32> -> vector<128x16xf32>
    %55 = tpu.reciprocal %52 {approx = true} : vector<128x1xf32> -> vector<128x1xf32>
    %56 = vector.broadcast %55 : vector<128x1xf32> to vector<128x16xf32>
    %57 = arith.mulf %54, %56 : vector<128x16xf32>
    %58 = arith.truncf %57 : vector<128x16xf32> to vector<128x16xbf16>
    %c0_26 = arith.constant 0 : index
    %c0_27 = arith.constant 0 : index
    %c0_28 = arith.constant 0 : index
    %59 = vector.load %arg7[%c0_26, %c0_27, %c0_28] : memref<2x16x32xbf16, #tpu.memory_space<vmem>>, vector<1x16x32xbf16>
    %60 = vector.shape_cast %59 : vector<1x16x32xbf16> to vector<16x32xbf16>
    %cst_29 = arith.constant dense<0.000000e+00> : vector<128x32xf32>
    %61 = tpu.matmul %58, %60, %cst_29 {dimension_numbers = #tpu.dot_dimension_numbers<[1], [0], [0], [1], [0, 0, 1, 1], [], []>} : vector<128x16xbf16>, vector<16x32xbf16>, vector<128x32xf32> -> vector<128x32xf32>
    %62 = arith.addf %39, %61 : vector<128x32xf32>
    %63 = vector.extract_strided_slice %29 {offsets = [0, 16], sizes = [128, 16], strides = [1, 1]} : vector<128x32xbf16> to vector<128x16xbf16>
    %64 = vector.extract_strided_slice %32 {offsets = [0, 16], sizes = [128, 16], strides = [1, 1]} : vector<128x32xbf16> to vector<128x16xbf16>
    %65 = vector.extract_strided_slice %35 {offsets = [0, 16], sizes = [128, 16], strides = [1, 1]} : vector<128x32xbf16> to vector<128x16xbf16>
    %cst_30 = arith.constant dense<0.000000e+00> : vector<128x128xf32>
    %66 = tpu.matmul %63, %64, %cst_30 {dimension_numbers = #tpu.dot_dimension_numbers<[1], [1], [0], [0], [0, 0, 1, 0], [], []>} : vector<128x16xbf16>, vector<128x16xbf16>, vector<128x128xf32> -> vector<128x128xf32>
    %cst_31 = arith.constant -1.000000e+30 : f32
    %67 = vector.broadcast %cst_31 : f32 to vector<128x128xf32>
    %68 = arith.select %38, %66, %67 : vector<128x128xi1>, vector<128x128xf32>
    %cst_32 = arith.constant dense<0xFF800000> : vector<128xf32>
    %69 = vector.multi_reduction <maximumf>, %68, %cst_32 [1] : vector<128x128xf32> to vector<128xf32>
    %70 = vector.shape_cast %69 : vector<128xf32> to vector<128x1xf32>
    %71 = vector.broadcast %70 : vector<128x1xf32> to vector<128x128xf32>
    %72 = arith.subf %68, %71 : vector<128x128xf32>
    %73 = math.exp %72 : vector<128x128xf32>
    %cst_33 = arith.constant dense<0.000000e+00> : vector<128xf32>
    %74 = vector.multi_reduction <add>, %73, %cst_33 [1] : vector<128x128xf32> to vector<128xf32>
    %75 = vector.shape_cast %74 : vector<128xf32> to vector<128x1xf32>
    %76 = arith.truncf %73 : vector<128x128xf32> to vector<128x128xbf16>
    %cst_34 = arith.constant dense<0.000000e+00> : vector<128x16xf32>
    %77 = tpu.matmul %76, %65, %cst_34 {dimension_numbers = #tpu.dot_dimension_numbers<[1], [0], [0], [1], [0, 0, 1, 1], [], []>} : vector<128x128xbf16>, vector<128x16xbf16>, vector<128x16xf32> -> vector<128x16xf32>
    %78 = tpu.reciprocal %75 {approx = true} : vector<128x1xf32> -> vector<128x1xf32>
    %79 = vector.broadcast %78 : vector<128x1xf32> to vector<128x16xf32>
    %80 = arith.mulf %77, %79 : vector<128x16xf32>
    %81 = arith.truncf %80 : vector<128x16xf32> to vector<128x16xbf16>
    %c1 = arith.constant 1 : index
    %c0_35 = arith.constant 0 : index
    %c0_36 = arith.constant 0 : index
    %82 = vector.load %arg7[%c1, %c0_35, %c0_36] : memref<2x16x32xbf16, #tpu.memory_space<vmem>>, vector<1x16x32xbf16>
    %83 = vector.shape_cast %82 : vector<1x16x32xbf16> to vector<16x32xbf16>
    %cst_37 = arith.constant dense<0.000000e+00> : vector<128x32xf32>
    %84 = tpu.matmul %81, %83, %cst_37 {dimension_numbers = #tpu.dot_dimension_numbers<[1], [0], [0], [1], [0, 0, 1, 1], [], []>} : vector<128x16xbf16>, vector<16x32xbf16>, vector<128x32xf32> -> vector<128x32xf32>
    %85 = arith.addf %62, %84 : vector<128x32xf32>
    %c0_38 = arith.constant 0 : index
    %c0_39 = arith.constant 0 : index
    %86 = vector.load %arg8[%c0_38, %c0_39] : memref<1x32xf32, #tpu.memory_space<vmem>>, vector<1x32xf32>
    %87 = vector.broadcast %86 : vector<1x32xf32> to vector<128x32xf32>
    %88 = arith.addf %85, %87 : vector<128x32xf32>
    %c0_40 = arith.constant 0 : index
    %c0_41 = arith.constant 0 : index
    %c0_42 = arith.constant 0 : index
    %89 = vector.load %arg9[%c0_40, %c0_41, %c0_42] : memref<1x128x32xf32, #tpu.memory_space<vmem>>, vector<1x128x32xf32>
    %90 = vector.shape_cast %89 : vector<1x128x32xf32> to vector<128x32xf32>
    %91 = vector.shape_cast %88 : vector<128x32xf32> to vector<1x128x32xf32>
    tpu.vector_store %arg9[%c0_40, %c0_41, %c0_42], %91 {strides = array<i32>} : memref<1x128x32xf32, #tpu.memory_space<vmem>>, vector<1x128x32xf32>,
    return
  }
  func.func @transform_0(%arg0: i32) -> (i32, i32, i32) {
    %c0_i32 = arith.constant 0 : i32
    %c0_i32_0 = arith.constant 0 : i32
    %c0_i32_1 = arith.constant 0 : i32
    return %arg0, %c0_i32, %c0_i32_0 : i32, i32, i32
  }
  func.func @transform_1(%arg0: i32) -> (i32, i32) {
    %c0_i32 = arith.constant 0 : i32
    %c0_i32_0 = arith.constant 0 : i32
    %c0_i32_1 = arith.constant 0 : i32
    return %c0_i32, %c0_i32_0 : i32, i32
  }
  func.func @transform_2(%arg0: i32) -> (i32, i32) {
    %c0_i32 = arith.constant 0 : i32
    %c0_i32_0 = arith.constant 0 : i32
    %c0_i32_1 = arith.constant 0 : i32
    return %c0_i32, %c0_i32_0 : i32, i32
  }
  func.func @transform_3(%arg0: i32) -> (i32, i32) {
    %c0_i32 = arith.constant 0 : i32
    %c0_i32_0 = arith.constant 0 : i32
    %c0_i32_1 = arith.constant 0 : i32
    return %c0_i32, %c0_i32_0 : i32, i32
  }
  func.func @transform_4(%arg0: i32) -> (i32, i32) {
    %c0_i32 = arith.constant 0 : i32
    %c0_i32_0 = arith.constant 0 : i32
    %c0_i32_1 = arith.constant 0 : i32
    return %c0_i32, %c0_i32_0 : i32, i32
  }
  func.func @transform_5(%arg0: i32) -> (i32, i32) {
    %c0_i32 = arith.constant 0 : i32
    %c0_i32_0 = arith.constant 0 : i32
    %c0_i32_1 = arith.constant 0 : i32
    return %c0_i32, %c0_i32_0 : i32, i32
  }
  func.func @transform_6(%arg0: i32) -> (i32, i32, i32) {
    %c0_i32 = arith.constant 0 : i32
    %c0_i32_0 = arith.constant 0 : i32
    %c0_i32_1 = arith.constant 0 : i32
    %c0_i32_2 = arith.constant 0 : i32
    return %c0_i32, %c0_i32_0, %c0_i32_1 : i32, i32, i32
  }
  func.func @transform_7(%arg0: i32) -> (i32, i32) {
    %c0_i32 = arith.constant 0 : i32
    %c0_i32_0 = arith.constant 0 : i32
    %c0_i32_1 = arith.constant 0 : i32
    return %c0_i32, %c0_i32_0 : i32, i32
  }
  func.func @transform_8(%arg0: i32) -> (i32, i32, i32) {
    %c0_i32 = arith.constant 0 : i32
    %c0_i32_0 = arith.constant 0 : i32
    %c0_i32_1 = arith.constant 0 : i32
    return %arg0, %c0_i32, %c0_i32_0 : i32, i32, i32
  }
}

</mosaic_0001>

<bundles_post_ra>
// kernel: tpu_custom_call.1
= control target key start
LH: loop header
LB: loop body
LE: loop exit
PB: predicated region body
PF: predicated region fallthrough
CT: control target
= control target key end

     0   :  { %s4766_s0 = inlined_call_operand.hbm [shape: f32[2,128,32], index: 0, kind: input, shape index: {}]   ;;  %s4767_s1 = inlined_call_operand.hbm [shape: f32[1,32], index: 1, kind: input, shape index: {}]   ;;  %s4768_s2 = inlined_call_operand.hbm [shape: f32[1,32], index: 2, kind: input, shape index: {}]   ;;  %s4769_s3 = inlined_call_operand.hbm [shape: bf16[32,32], index: 3, kind: input, shape index: {}]   ;;  %s4770_s4 = inlined_call_operand.hbm [shape: bf16[32,32], index: 4, kind: input, shape index: {}]   ;;  %s4771_s5 = inlined_call_operand.hbm [shape: bf16[32,32], index: 5, kind: input, shape index: {}]   ;;  %s4772_s6 = inlined_call_operand.hbm [shape: bf16[2,16,32], index: 6, kind: input, shape index: {}]   ;;  %s4773_s7 = inlined_call_operand.hbm [shape: f32[1,32], index: 7, kind: input, shape index: {}]   ;;  %s4774_s8 = inlined_call_operand.hbm [shape: f32[2,128,32], index: 8, kind: output, shape index: {}]  }
   0x1   :  { %4778 = sst [smem:[#allocation25_spill]] %s4767_s1 }
   0x2   :  { %13 = vsyncpa [#allocation3], 0 }
   0x3   :  { %15 = vsyncpa [#allocation3 + $0x1], 0 }
   0x4   :  { %16 = vsyncpa [#allocation6], 0 }
   0x5   :  { %17 = vsyncpa [#allocation9], 0 }
   0x6   :  { %18 = vsyncpa [#allocation12], 0 }
   0x7   :  { %19 = vsyncpa [#allocation15], 0 }
   0x8   :  { %20 = vsyncpa [#allocation4], 0 }
   0x9   :  { %22 = vsyncpa [#allocation4 + $0x1], 0  ;;  %s3620_s27 = smov 0   ;;  %s3622_s28 = smov 0  }
   0xa   :  { %s3624_s29 = smov 0   ;;  %s3626_s30 = smov 0  }
   0xb LB: > { %s3559_s9 = smov [#allocation5]   ;;  %s3641_s11 = sadd.s32 4294967295, %s3557_s30   ;;  %s3557_s30 = sphi %s3626_s30, %s4807_s30   ;;  %s3553_s29 = sphi %s3624_s29, %s4806_s29   ;;  %s3549_s28 = sphi %s3622_s28, %s4805_s28   ;;  %s3545_s27 = sphi %s3620_s27, %s4804_s27  }
   0xc   : > { %s245_s10 = sshll.u32 %s3559_s9, 4  ;;  %p2477_p0 = scmp.ge.s32.totalorder %s3557_s30, 1  ;;  %s3646_s10 = int_to_ptr.vmem [resolvable:$true] %s245_s10 }
   0xd   : > { %p4775_p1 = scmp.eq.s32.totalorder %s3641_s11, 0  ;;  %p232_p2 = scmp.lt.s32.totalorder %s3557_s30, 3 }
   0xe   : > { %s3560_s13 = smov [#allocation8]   ;;  %s3561_s16 = smov [#allocation11]  }
   0xf   : > { %p3648_p3 = pnand %p2477_p0, %p232_p2  ;;  %s266_s14 = sshll.u32 %s3560_s13, 4  ;;  %s3655_s14 = int_to_ptr.vmem [resolvable:$true] %s266_s14 }
  0x10   : > { %s292_s17 = sshll.u32 %s3561_s16, 4  ;;  %s4781_s1 = sld [smem:[#allocation25_spill]]  ;;  %s3663_s17 = int_to_ptr.vmem [resolvable:$true] %s292_s17 }
  0x11   : > { %s4779_s12 = scalar_select %p3648_p3, 1, 0 }
  0x12   : > { %p2989_p5 = pneg %p3648_p3 }
  0x14   : > { %p3659_p6 = pnand %p2989_p5, %p4775_p1 }
  0x16   : > { %s3249_s20 = scalar_lea.hbm %s4781_s1, 16  ;;  %p3673_p8 = pneg %p3659_p6 }
  0x17   : > { %p3250_p7 = scmp.ne.s32.totalorder %s4781_s1, %s3249_s20  ;;  %p3256_p11 = scmp.lt.u32.totalorder %s3249_s20, %s4781_s1 }
  0x19   : > { %p3252_p9 = pnand %p3673_p8, %p3250_p7 }
  0x1b   : > { %p3253_p10 = pneg %p3252_p9 }
  0x1d   : > { %p3258_p12 = pnand %p3256_p11, %p3253_p10 }
  0x1f   : > { %3261 = shalt.err (!%p3258_p12)
}
  0x20   : > { %s3262_s26 = scalar_lea.vmem %s3646_s10, 16  ;;  %s3269_s9 = scalar_lea.vmem %s3646_s10, 32 }
  0x21   : > { %p3263_p13 = scmp.ne.s32.totalorder %s3646_s10, %s3262_s26  ;;  %p3270_p5 = scmp.lt.s32.totalorder %s3646_s10, %s3646_s10 }
  0x22   : > { %p3271_p7 = scmp.lt.s32.totalorder %s3269_s9, %s3262_s26 }
  0x23   : > { %p3265_p0 = pnand %p3263_p13, %p3673_p8 }
  0x24   : > { %p3272_p9 = por %p3271_p7, %p3270_p5 }
  0x25   : > { %p3266_p2 = pneg %p3265_p0 }
  0x27   : > { %p3273_p4 = pnand %p3272_p9, %p3266_p2 }
  0x29   : > { %3276 = shalt.err (!%p3273_p4)
}
  0x2a   : > { %2992 = dma.hbm_to_vmem [thread:$0]  (!%p3659_p6), %s4781_s1, 16, %s3646_s10, [#allocation6]  }
  0x2b   : > { %s3277_s20 = scalar_lea.hbm %s4769_s3, 256 }
  0x2c   : > { %p3278_p10 = scmp.ne.s32.totalorder %s4769_s3, %s3277_s20  ;;  %p3284_p4 = scmp.lt.u32.totalorder %s3277_s20, %s4769_s3 }
  0x2e   : > { %p3280_p11 = pnand %p3278_p10, %p3673_p8 }
  0x30   : > { %p3281_p12 = pneg %p3280_p11 }
  0x32   : > { %p3286_p13 = pnand %p3284_p4, %p3281_p12 }
  0x34   : > { %3289 = shalt.err (!%p3286_p13)
}
  0x35   : > { %s3290_s10 = scalar_lea.vmem %s3655_s14, 256  ;;  %p3298_p7 = scmp.lt.s32.totalorder %s3655_s14, %s3655_s14 }
  0x36   : > { %p3291_p0 = scmp.ne.s32.totalorder %s3655_s14, %s3290_s10  ;;  %p3299_p9 = scmp.lt.s32.totalorder %s3290_s10, %s3290_s10 }
  0x38   : > { %p3293_p2 = pnand %p3291_p0, %p3673_p8  ;;  %p3300_p10 = por %p3299_p9, %p3298_p7 }
  0x3a   : > { %p3294_p5 = pneg %p3293_p2 }
  0x3c   : > { %p3301_p11 = pnand %p3300_p10, %p3294_p5 }
  0x3e   : > { %3304 = shalt.err (!%p3301_p11)
}
  0x3f   : > { %s3562_s26 = smov 64   ;;  %s3563_s9 = smov 4  }
  0x40   : > { %2998 = dma.hbm_to_vmem [thread:$0]  (!%p3659_p6), %s4769_s3, 256, %s3655_s14, [#allocation9], %s3562_s26, %s3562_s26, %s3563_s9  }
  0x41   : > { %s3305_s20 = scalar_lea.hbm %s4771_s5, 256 }
  0x42   : > { %p3306_p12 = scmp.ne.s32.totalorder %s4771_s5, %s3305_s20  ;;  %p3312_p0 = scmp.lt.u32.totalorder %s3305_s20, %s4771_s5 }
  0x44   : > { %p3308_p4 = pnand %p3306_p12, %p3673_p8 }
  0x46   : > { %p3309_p13 = pneg %p3308_p4 }
  0x48   : > { %p3314_p2 = pnand %p3312_p0, %p3309_p13 }
  0x4a   : > { %3317 = shalt.err (!%p3314_p2)
}
  0x4b   : > { %s3318_s14 = scalar_lea.vmem %s3663_s17, 256  ;;  %p3326_p10 = scmp.lt.s32.totalorder %s3663_s17, %s3663_s17 }
  0x4c   : > { %p3319_p5 = scmp.ne.s32.totalorder %s3663_s17, %s3318_s14  ;;  %p3327_p11 = scmp.lt.s32.totalorder %s3318_s14, %s3318_s14 }
  0x4e   : > { %p3321_p7 = pnand %p3319_p5, %p3673_p8  ;;  %p3328_p12 = por %p3327_p11, %p3326_p10 }
  0x50   : > { %p3322_p9 = pneg %p3321_p7 }
  0x52   : > { %p3329_p4 = pnand %p3328_p12, %p3322_p9 }
  0x54   : > { %3332 = shalt.err (!%p3329_p4)
}
  0x55   : > { %3004 = dma.hbm_to_vmem [thread:$0]  (!%p3659_p6), %s4771_s5, 256, %s3663_s17, [#allocation12], %s3562_s26, %s3562_s26, %s3563_s9  }
  0x56   : > { %s3564_s16 = smov [#allocation7]   ;;  %s3565_s19 = smov [#allocation10]  }
  0x57   : > { %s256_s18 = sshll.u32 %s3564_s16, 4  ;;  %s279_s20 = sshll.u32 %s3565_s19, 4  ;;  %s257_s18 = int_to_ptr.vmem [resolvable:$true] %s256_s18  ;;  %s280_s20 = int_to_ptr.vmem [resolvable:$true] %s279_s20 }
  0x58   : > { %s3333_s24 = scalar_lea.hbm %s4768_s2, 16 }
  0x59   : > { %p3334_p13 = scmp.ne.s32.totalorder %s4768_s2, %s3333_s24  ;;  %p3340_p5 = scmp.lt.u32.totalorder %s3333_s24, %s4768_s2 }
  0x5b   : > { %p3336_p0 = pnand %p3334_p13, %p3673_p8 }
  0x5d   : > { %p3337_p2 = pneg %p3336_p0 }
  0x5f   : > { %p3342_p7 = pnand %p3340_p5, %p3337_p2 }
  0x61   : > { %3345 = shalt.err (!%p3342_p7)
}
  0x62   : > { %s3346_s17 = scalar_lea.vmem %s257_s18, 16  ;;  %s3353_s13 = scalar_lea.vmem %s257_s18, 32 }
  0x63   : > { %p3347_p9 = scmp.ne.s32.totalorder %s257_s18, %s3346_s17  ;;  %p3354_p12 = scmp.lt.s32.totalorder %s257_s18, %s257_s18 }
  0x64   : > { %p3355_p4 = scmp.lt.s32.totalorder %s3353_s13, %s3346_s17 }
  0x65   : > { %p3349_p10 = pnand %p3347_p9, %p3673_p8 }
  0x66   : > { %p3356_p1 = por %p3355_p4, %p3354_p12 }
  0x67   : > { %p3350_p11 = pneg %p3349_p10 }
  0x69   : > { %p3357_p3 = pnand %p3356_p1, %p3350_p11 }
  0x6b   : > { %3360 = shalt.err (!%p3357_p3)
}
  0x6c   : > { %2995 = dma.hbm_to_vmem [thread:$0]  (!%p3659_p6), %s4768_s2, 16, %s257_s18, [#allocation6]  }
  0x6d   : > { %s3361_s22 = scalar_lea.hbm %s4770_s4, 256 }
  0x6e   : > { %p3362_p13 = scmp.ne.s32.totalorder %s4770_s4, %s3361_s22  ;;  %p3368_p3 = scmp.lt.u32.totalorder %s3361_s22, %s4770_s4 }
  0x70   : > { %p3364_p0 = pnand %p3362_p13, %p3673_p8 }
  0x72   : > { %p3365_p1 = pneg %p3364_p0 }
  0x74   : > { %p3370_p2 = pnand %p3368_p3, %p3365_p1 }
  0x76   : > { %3373 = shalt.err (!%p3370_p2)
}
  0x77   : > { %s3374_s17 = scalar_lea.vmem %s280_s20, 256  ;;  %p3382_p10 = scmp.lt.s32.totalorder %s280_s20, %s280_s20 }
  0x78   : > { %p3375_p5 = scmp.ne.s32.totalorder %s280_s20, %s3374_s17  ;;  %p3383_p11 = scmp.lt.s32.totalorder %s3374_s17, %s3374_s17 }
  0x7a   : > { %p3377_p7 = pnand %p3375_p5, %p3673_p8  ;;  %p3384_p12 = por %p3383_p11, %p3382_p10 }
  0x7c   : > { %p3378_p9 = pneg %p3377_p7 }
  0x7e   : > { %p3385_p4 = pnand %p3384_p12, %p3378_p9 }
  0x80   : > { %3388 = shalt.err (!%p3385_p4)
}
  0x81   : > { %3001 = dma.hbm_to_vmem [thread:$0]  (!%p3659_p6), %s4770_s4, 256, %s280_s20, [#allocation9], %s3562_s26, %s3562_s26, %s3563_s9  }
  0x82   : > { %s3566_s16 = smov [#allocation13]   ;;  %s3567_s1 = smov [#allocation14]  }
  0x83   : > { %s305_s19 = sshll.u32 %s3566_s16, 4  ;;  %s319_s21 = sshll.u32 %s3567_s1, 4  ;;  %s306_s19 = int_to_ptr.vmem [resolvable:$true] %s305_s19  ;;  %s320_s21 = int_to_ptr.vmem [resolvable:$true] %s319_s21 }
  0x84   : > { %s3389_s25 = scalar_lea.hbm %s4772_s6, 256 }
  0x85   : > { %p3390_p13 = scmp.ne.s32.totalorder %s4772_s6, %s3389_s25  ;;  %p3396_p3 = scmp.lt.u32.totalorder %s3389_s25, %s4772_s6 }
  0x87   : > { %p3392_p0 = pnand %p3390_p13, %p3673_p8 }
  0x89   : > { %p3393_p1 = pneg %p3392_p0 }
  0x8b   : > { %p3398_p2 = pnand %p3396_p3, %p3393_p1 }
  0x8d   : > { %3401 = shalt.err (!%p3398_p2)
}
  0x8e   : > { %s3402_s20 = scalar_lea.vmem %s306_s19, 256  ;;  %p3410_p10 = scmp.lt.s32.totalorder %s306_s19, %s306_s19 }
  0x8f   : > { %p3403_p5 = scmp.ne.s32.totalorder %s306_s19, %s3402_s20  ;;  %p3411_p11 = scmp.lt.s32.totalorder %s3402_s20, %s3402_s20 }
  0x91   : > { %p3405_p7 = pnand %p3403_p5, %p3673_p8  ;;  %p3412_p12 = por %p3411_p11, %p3410_p10 }
  0x93   : > { %p3406_p9 = pneg %p3405_p7 }
  0x95   : > { %p3413_p4 = pnand %p3412_p12, %p3406_p9 }
  0x97   : > { %3416 = shalt.err (!%p3413_p4)
}
  0x98   : > { %3007 = dma.hbm_to_vmem [thread:$0]  (!%p3659_p6), %s4772_s6, 256, %s306_s19, [#allocation12], %s3562_s26, %s3562_s26, %s3563_s9  }
  0x99   : > { %s3417_s24 = scalar_lea.hbm %s4773_s7, 16 }
  0x9a   : > { %p3418_p13 = scmp.ne.s32.totalorder %s4773_s7, %s3417_s24  ;;  %p3424_p3 = scmp.lt.u32.totalorder %s3417_s24, %s4773_s7 }
  0x9c   : > { %p3420_p0 = pnand %p3418_p13, %p3673_p8 }
  0x9e   : > { %p3421_p1 = pneg %p3420_p0 }
  0xa0   : > { %p3426_p2 = pnand %p3424_p3, %p3421_p1 }
  0xa2   : > { %3429 = shalt.err (!%p3426_p2)
}
  0xa3   : > { %s3430_s18 = scalar_lea.vmem %s320_s21, 16  ;;  %s3437_s26 = scalar_lea.vmem %s320_s21, 32 }
  0xa4   : > { %p3431_p5 = scmp.ne.s32.totalorder %s320_s21, %s3430_s18  ;;  %p3438_p10 = scmp.lt.s32.totalorder %s320_s21, %s320_s21 }
  0xa5   : > { %p3439_p11 = scmp.lt.s32.totalorder %s3437_s26, %s3430_s18 }
  0xa6   : > { %p3433_p7 = pnand %p3431_p5, %p3673_p8 }
  0xa7   : > { %p3440_p12 = por %p3439_p11, %p3438_p10 }
  0xa8   : > { %p3434_p9 = pneg %p3433_p7 }
  0xaa   : > { %p3441_p4 = pnand %p3440_p12, %p3434_p9 }
  0xac   : > { %3444 = shalt.err (!%p3441_p4)
}
  0xad   : > { %3010 = dma.hbm_to_vmem [thread:$0]  (!%p3659_p6), %s4773_s7, 16, %s320_s21, [#allocation15]  }
  0xae   : > { %s2476_s23 = sadd.s32 4294967294, %s3557_s30   ;;  %s3827_s15 = sadd.s32 1, %s3557_s30  }
  0xaf   : > { %s35_s20 = sadd.s32 1, %s3553_s29  ;;  %s32_s13 = ssub.s32 %s3557_s30, %s3827_s15 }
  0xb0   : > { %p42_p8 = scmp.ne.s32.totalorder %s3553_s29, %s3549_s28  ;;  %p33_p13 = scmp.eq.s32.totalorder %s32_s13, 0 }
  0xb1   : > { %p43_p0 = scmp.eq.s32.totalorder %s3557_s30, 0  ;;  %p48_p1 = scmp.ne.s32.totalorder %s3549_s28, %s3545_s27 }
  0xb2   : > { %p219_p3 = scmp.eq.s32.totalorder %s3641_s11, 1  ;;  %p4783_p5 = scmp.eq.s32.totalorder %s3641_s11, 0 }
  0xb3   : > { %s3839_s16 = scalar_select %p33_p13, %s3553_s29, %s35_s20  }
  0xb4   : > { %p44_p2 = por %p43_p0, %p42_p8  ;;  %p3843_p7 = por %p4783_p5, %p48_p1 }
  0xb5   : > { %p3847_p6 = por %p219_p3, %p42_p8  ;;  %p225_p9 = scmp.eq.s32.totalorder %s2476_s23, 1 }
  0xb6   : > { %p3026_p10 = scmp.lt.s32.totalorder %s3557_s30, 2  ;;  %s330_s22 = sand.u32 1, %s3553_s29  }
  0xb7   : > { %s4785_s21 = scalar_select %p3847_p6, 1, 0 }
  0xb8   : > { %p3853_p11 = por %p225_p9, %p48_p1  ;;  %s2486_s25 = sshll.u32 %s330_s22, 7 }
  0xb9   : > { %s2571_s14 = sshll.u32 %s3557_s30, 11  ;;  %s334_s26 = scalar_lea.vmem [#allocation2], %s2486_s25 }
  0xba   : > { %s4786_s24 = scalar_select %p3853_p11, 1, 0 }
  0xbb   : > { %s3861_s18 = scalar_lea.hbm %s4766_s0, %s2571_s14  ;;  %s341_s9 = sshll.u32 %s334_s26, 4  ;;  %s3867_s9 = int_to_ptr.vmem [resolvable:$true] %s341_s9 }
  0xbc   : > { %p3863_p12 = pnand %p3026_p10, %p44_p2  ;;  %s3869_s23 = scalar_lea.sflag [#allocation3], %s330_s22 }
  0xbd   : > { %s3445_s20 = scalar_lea.hbm %s3861_s18, 2048  ;;  %s3450_s14 = scalar_lea.hbm %s4766_s0, 4096 }
  0xbe   : > { %p3446_p4 = scmp.ne.s32.totalorder %s3861_s18, %s3445_s20  ;;  %p3447_p8 = pneg %p3863_p12 }
  0xbf   : > { %p3451_p1 = scmp.lt.u32.totalorder %s3861_s18, %s4766_s0  ;;  %p3452_p3 = scmp.lt.u32.totalorder %s3450_s14, %s3445_s20 }
  0xc0   : > { %p3448_p13 = pnand %p3447_p8, %p3446_p4  ;;  %p3454_p5 = scmp.lt.u32.totalorder %s3445_s20, %s3861_s18 }
  0xc1   : > { %p3453_p2 = por %p3452_p3, %p3451_p1 }
  0xc2   : > { %p3449_p0 = pneg %p3448_p13 }
  0xc3   : > { %p3455_p9 = por %p3454_p5, %p3453_p2 }
  0xc5   : > { %p3456_p10 = pnand %p3455_p9, %p3449_p0 }
  0xc7   : > { %3459 = shalt.err (!%p3456_p10)
}
  0xc8   : > { %s3460_s22 = scalar_lea.vmem %s3867_s9, 2048  ;;  %s3568_s26 = smov [#allocation2]  }
  0xc9   : > { %p3461_p4 = scmp.ne.s32.totalorder %s3867_s9, %s3460_s22  ;;  %s3465_s13 = sshll.u32 %s3568_s26, 4  ;;  %s3466_s13 = int_to_ptr.vmem [resolvable:$false] %s3465_s13 }
  0xca   : > { %s3467_s25 = scalar_lea.vmem %s3466_s13, 4096  ;;  %p3468_p6 = scmp.lt.s32.totalorder %s3867_s9, %s3466_s13 }
  0xcb   : > { %p3463_p13 = pnand %p3461_p4, %p3447_p8  ;;  %p3469_p1 = scmp.lt.s32.totalorder %s3467_s25, %s3460_s22 }
  0xcd   : > { %p3464_p11 = pneg %p3463_p13  ;;  %p3470_p3 = por %p3469_p1, %p3468_p6 }
  0xcf   : > { %p3471_p2 = pnand %p3470_p3, %p3464_p11 }
  0xd1   : > { %3474 = shalt.err (!%p3471_p2)
}
  0xd2   : > { %s3569_s20 = smov 128   ;;  %s3570_s14 = smov 8  }
  0xd3   : > { %3014 = dma.hbm_to_vmem [thread:$0]  (!%p3863_p12), %s3861_s18, 2048, %s3867_s9, %s3869_s23, %s3569_s20, %s3569_s20, %s3570_s14  }
  0xd4   : > { %p4788_p8 = scmp.ne.s32.totalorder %s4779_s12, 0 }
  0xd6   : > { %353 = sbr.rel (%p4788_p8) target bundleno = 2254 (0x8ce), region = 52 }
  0xdd   : > { %s3900_s10 = sand.u32 1, %s3549_s28  }
  0xde   : > { %s2490_s17 = sshll.u32 %s3900_s10, 7  ;;  %s356_s22 = scalar_lea.sflag [#allocation3], %s3900_s10 }
  0xdf   : > { %s3906_s26 = scalar_lea.vmem [#allocation2], %s2490_s17 }
  0xe0   : > { %3520 = dma.done.wait (%p3843_p7), %s356_s22, 2048  }
  0xe1   : > { %3522 = vsyncadd (%p3843_p7), %s356_s22, 4294965248  ;;  %p4789_p6 = scmp.eq.s32.totalorder %s3641_s11, 0 }
  0xe3   : > { %3524 = dma.done.wait (%p4789_p6), [#allocation6], 32   ;;  %p4790_p11 = pmov %p4789_p6 }
  0xe4   : > { %p4791_p12 = pmov %p4789_p6 }
  0xe5   : > { %3526 = vsyncadd (%p4790_p11), [#allocation6], 4294967264 }
  0xe6   : > { %3528 = dma.done.wait (%p4791_p12), [#allocation9], 512   ;;  %p4792_p0 = pmov %p4789_p6 }
  0xe8   : > { %3530 = vsyncadd (%p4792_p0), [#allocation9], 4294966784  ;;  %p4793_p5 = pmov %p4792_p0 }
  0xe9   : > { %p4794_p9 = pmov %p4792_p0 }
  0xea   : > { %3532 = dma.done.wait (%p4793_p5), [#allocation12], 512  }
  0xeb   : > { %3534 = vsyncadd (%p4794_p9), [#allocation12], 4294966784  ;;  %p4795_p7 = pmov %p4792_p0 }
  0xec   : > { %p4796_p10 = pmov %p4792_p0 }
  0xed   : > { %3536 = dma.done.wait (%p4795_p7), [#allocation15], 16  }
  0xee   : > { %3538 = vsyncadd (%p4796_p10), [#allocation15], 4294967280  ;;  %vm437_vm0 = vcmask 261120   ;;  %v421_v0 = vld [vmem:[%s3906_s26] sm:$0xff]  ;;  %v423_v1 = vld [vmem:[%s3906_s26 + $0x10] sm:$0xff]  ;;  %vm1107_vm1 = vcmask 130048  }
  0xef   : > { %v422_v2 = vld [vmem:[%s3906_s26 + $0x8] sm:$0xff]  ;;  %v438_v3 = vsel %vm437_vm0, %v421_v0, 0.0  ;;  %v444_v4 = vsel %vm437_vm0, %v423_v1, 0.0  ;;  %v424_v5 = vld [vmem:[%s3906_s26 + $0x18] sm:$0xff]  ;;  %v3935_v6 = vld [vmem:[%s3906_s26 + $0x20] sm:$0xff]  ;;  %s3571_s12 = smov 112  }
  0xf0   : > { %439 = vadd.xlane.f32.xlu0 %v438_v3  ;;  %445 = vadd.xlane.f32.xlu1 %v444_v4  ;;  %v441_v7 = vsel %vm437_vm0, %v422_v2, 0.0  ;;  %v447_v8 = vsel %vm437_vm0, %v424_v5, 0.0  ;;  %v426_v9 = vld [vmem:[%s3906_s26 + $0x28] sm:$0xff]  ;;  %v450_v10 = vsel %vm437_vm0, %v3935_v6, 0.0  ;;  %v3944_v12 = vld [vmem:[%s3906_s26 + $0x30] sm:$0xff]  ;;  %v3947_v13 = vld [vmem:[%s3906_s26 + $0x38] sm:$0xff] }
  0xf1   : > { %v453_v11 = vsel %vm437_vm0, %v426_v9, 0.0  ;;  %v456_v14 = vsel %vm437_vm0, %v3944_v12, 0.0  ;;  %v459_v15 = vsel %vm437_vm0, %v3947_v13, 0.0  ;;  %v3954_v16 = vld [vmem:[%s3906_s26 + $0x40] sm:$0xff]  ;;  %v3957_v17 = vld [vmem:[%s3906_s26 + $0x48] sm:$0xff]  ;;  %v3964_v20 = vld [vmem:[%s3906_s26 + $0x50] sm:$0xff] }
  0xf2   : > { %v462_v18 = vsel %vm437_vm0, %v3954_v16, 0.0  ;;  %v465_v19 = vsel %vm437_vm0, %v3957_v17, 0.0  ;;  %v3967_v21 = vld [vmem:[%s3906_s26 + $0x58] sm:$0xff]  ;;  %v468_v22 = vsel %vm437_vm0, %v3964_v20, 0.0  ;;  %v3974_v24 = vld [vmem:[%s3906_s26 + $0x60] sm:$0xff]  ;;  %v3977_v25 = vld [vmem:[%s3906_s26 + $0x68] sm:$0xff] }
  0xf3   : > { %v471_v23 = vsel %vm437_vm0, %v3967_v21, 0.0  ;;  %v474_v26 = vsel %vm437_vm0, %v3974_v24, 0.0  ;;  %v477_v27 = vsel %vm437_vm0, %v3977_v25, 0.0  ;;  %v3984_v28 = vld [vmem:[%s3906_s26 + $0x70] sm:$0xff]  ;;  %v3987_v29 = vld [vmem:[%s3906_s26 + $0x78] sm:$0xff]  ;;  %s4681_s1 = scalar_lea.vmem [#allocation16], %s2490_s17 }
  0xf4   : > { %442 = vadd.xlane.f32.xlu0 %v441_v7  ;;  %448 = vadd.xlane.f32.xlu1 %v447_v8  ;;  %v480_v30 = vsel %vm437_vm0, %v3984_v28, 0.0  ;;  %v483_v31 = vsel %vm437_vm0, %v3987_v29, 0.0  ;;  %s2572_s18 = sshll.u32 %s3641_s11, 11  ;;  %s2336_s9 = sshll.u32 %s4681_s1, 4  ;;  %s4716_s9 = int_to_ptr.vmem [resolvable:$true] %s2336_s9 }
  0xf5   : > { %s4714_s13 = scalar_lea.hbm %s4774_s8, %s2572_s18  ;;  %s2323_s11 = scalar_lea.sflag [#allocation4], %s3900_s10 }
  0xf6   : > { %s3475_s25 = scalar_lea.vmem %s4716_s9, 2048  ;;  %p4801_p13 = scmp.ne.s32.totalorder %s4785_s21, 0 }
  0xf7   : > { %p3476_p4 = scmp.ne.s32.totalorder %s4716_s9, %s3475_s25  ;;  %s3572_s20 = smov [#allocation16]  }
  0xf8   : > { %451 = vadd.xlane.f32.xlu0 %v450_v10  ;;  %454 = vadd.xlane.f32.xlu1 %v453_v11  ;;  %s3479_s14 = sshll.u32 %s3572_s20, 4  ;;  %s3480_s14 = int_to_ptr.vmem [resolvable:$false] %s3479_s14 }
  0xf9   : > { %p3477_p1 = pnand %p3476_p4, %p4801_p13  ;;  %s3481_s17 = scalar_lea.vmem %s3480_s14, 4096 }
  0xfa   : > { %p3482_p2 = scmp.lt.s32.totalorder %s4716_s9, %s3480_s14  ;;  %p3483_p8 = scmp.lt.s32.totalorder %s3481_s17, %s3475_s25 }
  0xfb   : > { %p3478_p3 = pneg %p3477_p1 }
  0xfc   : > { %457 = vadd.xlane.f32.xlu0 %v456_v14  ;;  %460 = vadd.xlane.f32.xlu1 %v459_v15  ;;  %p3484_p6 = por %p3483_p8, %p3482_p2 }
  0xfe   : > { %p3485_p11 = pnand %p3484_p6, %p3478_p3 }
 0x100   : > { %463 = vadd.xlane.f32.xlu0 %v462_v18  ;;  %466 = vadd.xlane.f32.xlu1 %v465_v19 }
 0x104   : > { %469 = vadd.xlane.f32.xlu0 %v468_v22  ;;  %472 = vadd.xlane.f32.xlu1 %v471_v23 }
 0x108   : > { %475 = vadd.xlane.f32.xlu0 %v474_v26  ;;  %478 = vadd.xlane.f32.xlu1 %v477_v27 }
 0x10c   : > { %481 = vadd.xlane.f32.xlu0 %v480_v30  ;;  %484 = vadd.xlane.f32.xlu1 %v483_v31 }
 0x17d   : > { %v440_v32 = vpop.xlane.xlu0 %439  ;;  %v446_v33 = vpop.xlane.xlu1 %445 }
 0x17e   : > { %v487_v34 = vmul.f32 0.03125, %v440_v32  ;;  %v489_v35 = vmul.f32 0.03125, %v446_v33 }
 0x180   : > { %v3993_v36 = vsub.f32 %v421_v0, %v487_v34  ;;  %v3995_v37 = vsub.f32 %v423_v1, %v489_v35 }
 0x181   : > { %v443_v38 = vpop.xlane.xlu0 %442  ;;  %v449_v39 = vpop.xlane.xlu1 %448 }
 0x182   : > { %v488_v40 = vmul.f32 0.03125, %v443_v38  ;;  %v490_v41 = vmul.f32 0.03125, %v449_v39  ;;  %v519_v42 = vmul.f32 %v3993_v36, %v3993_v36  ;;  %v521_v43 = vmul.f32 %v3995_v37, %v3995_v37 }
 0x184   : > { %v4001_v44 = vsub.f32 %v422_v2, %v488_v40  ;;  %v4003_v45 = vsub.f32 %v424_v5, %v490_v41  ;;  %v535_v46 = vsel %vm437_vm0, %v519_v42, 0.0  ;;  %v541_v49 = vsel %vm437_vm0, %v521_v43, 0.0 }
 0x185   : > { %536 = vadd.xlane.f32.xlu0 %v535_v46  ;;  %v452_v47 = vpop.xlane.xlu0 %451  ;;  %v455_v48 = vpop.xlane.xlu1 %454 }
 0x186   : > { %v491_v50 = vmul.f32 0.03125, %v452_v47  ;;  %v492_v51 = vmul.f32 0.03125, %v455_v48  ;;  %v520_v52 = vmul.f32 %v4001_v44, %v4001_v44  ;;  %v522_v53 = vmul.f32 %v4003_v45, %v4003_v45 }
 0x188   : > { %v4012_v54 = vsub.f32 %v3935_v6, %v491_v50  ;;  %v4014_v55 = vsub.f32 %v426_v9, %v492_v51  ;;  %v538_v56 = vsel %vm437_vm0, %v520_v52, 0.0  ;;  %v544_v59 = vsel %vm437_vm0, %v522_v53, 0.0  ;;  %v3082_v53 = vld [vmem:[#allocation10] sm:$0xff]  }
 0x189   : > { %542 = vadd.xlane.f32.xlu0 %v541_v49  ;;  %539 = vadd.xlane.f32.xlu1 %v538_v56  ;;  %v458_v57 = vpop.xlane.xlu0 %457  ;;  %v461_v58 = vpop.xlane.xlu1 %460  ;;  %v3083_v56 = vld [vmem:[#allocation8 + $0x8] sm:$0xff]  }
 0x18a   : > { %v493_v60 = vmul.f32 0.03125, %v458_v57  ;;  %v494_v61 = vmul.f32 0.03125, %v461_v58  ;;  %v523_v62 = vmul.f32 %v4012_v54, %v4012_v54  ;;  %v524_v63 = vmul.f32 %v4014_v55, %v4014_v55  ;;  %2705 = vmatprep.subr.bf16.mxu1 %v3082_v53  ;;  %v3084_v57 = vld [vmem:[#allocation10 + $0x8] sm:$0xff]   ;;  %v4084_v58 = vld [vmem:[#allocation11] sm:$0xff]  }
 0x18b   : > { %2706 = vmatpush3.bf16.msra.mxu1 %v3082_v53 }
 0x18c   : > { %v4023_v0 = vsub.f32 %v3944_v12, %v493_v60  ;;  %v4026_v1 = vsub.f32 %v3947_v13, %v494_v61  ;;  %v547_v2 = vsel %vm437_vm0, %v523_v62, 0.0  ;;  %v550_v5 = vsel %vm437_vm0, %v524_v63, 0.0  ;;  %2707 = vmatprep.subr.bf16.mxu1 %v3084_v57 }
 0x18d   : > { %545 = vadd.xlane.f32.xlu1 %v544_v59  ;;  %548 = vadd.xlane.f32.xlu0 %v547_v2  ;;  %v464_v3 = vpop.xlane.xlu0 %463  ;;  %v467_v4 = vpop.xlane.xlu1 %466 }
 0x18e   : > { %v495_v6 = vmul.f32 0.03125, %v464_v3  ;;  %v496_v7 = vmul.f32 0.03125, %v467_v4  ;;  %v525_v8 = vmul.f32 %v4023_v0, %v4023_v0  ;;  %v526_v9 = vmul.f32 %v4026_v1, %v4026_v1 }
 0x18f   : > { %2708 = vmatpush3.bf16.msra.mxu1 %v3084_v57 }
 0x190   : > { %v4035_v10 = vsub.f32 %v3954_v16, %v495_v6  ;;  %v4038_v11 = vsub.f32 %v3957_v17, %v496_v7  ;;  %v553_v12 = vsel %vm437_vm0, %v525_v8, 0.0  ;;  %v556_v15 = vsel %vm437_vm0, %v526_v9, 0.0 }
 0x191   : > { %551 = vadd.xlane.f32.xlu1 %v550_v5  ;;  %554 = vadd.xlane.f32.xlu0 %v553_v12  ;;  %v470_v13 = vpop.xlane.xlu0 %469  ;;  %v473_v14 = vpop.xlane.xlu1 %472 }
 0x192   : > { %v497_v18 = vmul.f32 0.03125, %v470_v13  ;;  %v498_v19 = vmul.f32 0.03125, %v473_v14  ;;  %v527_v22 = vmul.f32 %v4035_v10, %v4035_v10  ;;  %v528_v16 = vmul.f32 %v4038_v11, %v4038_v11 }
 0x194   : > { %v4047_v23 = vsub.f32 %v3964_v20, %v497_v18  ;;  %v4050_v17 = vsub.f32 %v3967_v21, %v498_v19  ;;  %v559_v26 = vsel %vm437_vm0, %v527_v22, 0.0  ;;  %v562_v31 = vsel %vm437_vm0, %v528_v16, 0.0 }
 0x195   : > { %557 = vadd.xlane.f32.xlu1 %v556_v15  ;;  %560 = vadd.xlane.f32.xlu0 %v559_v26  ;;  %v476_v27 = vpop.xlane.xlu0 %475  ;;  %v479_v30 = vpop.xlane.xlu1 %478 }
 0x196   : > { %v499_v32 = vmul.f32 0.03125, %v476_v27  ;;  %v500_v33 = vmul.f32 0.03125, %v479_v30  ;;  %v529_v34 = vmul.f32 %v4047_v23, %v4047_v23  ;;  %v530_v20 = vmul.f32 %v4050_v17, %v4050_v17 }
 0x198   : > { %v4059_v35 = vsub.f32 %v3974_v24, %v499_v32  ;;  %v4062_v21 = vsub.f32 %v3977_v25, %v500_v33  ;;  %v565_v38 = vsel %vm437_vm0, %v529_v34, 0.0  ;;  %v568_v41 = vsel %vm437_vm0, %v530_v20, 0.0  ;;  %v4088_v34 = vld [vmem:[#allocation5] ss:$0 sm:$0xff] }
 0x199   : > { %563 = vadd.xlane.f32.xlu1 %v562_v31  ;;  %566 = vadd.xlane.f32.xlu0 %v565_v38  ;;  %v482_v39 = vpop.xlane.xlu0 %481  ;;  %v485_v40 = vpop.xlane.xlu1 %484 }
 0x19a   : > { %v501_v42 = vmul.f32 0.03125, %v482_v39  ;;  %v502_v43 = vmul.f32 0.03125, %v485_v40  ;;  %v531_v46 = vmul.f32 %v4059_v35, %v4059_v35  ;;  %v532_v24 = vmul.f32 %v4062_v21, %v4062_v21 }
 0x19c   : > { %v4071_v47 = vsub.f32 %v3984_v28, %v501_v42  ;;  %v4074_v25 = vsub.f32 %v3987_v29, %v502_v43  ;;  %v571_v48 = vsel %vm437_vm0, %v531_v46, 0.0  ;;  %v574_v49 = vsel %vm437_vm0, %v532_v24, 0.0  ;;  %v3081_v29 = vld [vmem:[#allocation8] sm:$0xff]  }
 0x19d   : > { %569 = vadd.xlane.f32.xlu1 %v568_v41  ;;  %572 = vadd.xlane.f32.xlu0 %v571_v48 }
 0x19e   : > { %v533_v50 = vmul.f32 %v4071_v47, %v4071_v47  ;;  %v534_v51 = vmul.f32 %v4074_v25, %v4074_v25  ;;  %2685 = vmatprep.subr.bf16.mxu0 %v3081_v29 }
 0x19f   : > { %2686 = vmatpush3.bf16.msra.mxu0 %v3081_v29 }
 0x1a0   : > { %v577_v52 = vsel %vm437_vm0, %v533_v50, 0.0  ;;  %v580_v28 = vsel %vm437_vm0, %v534_v51, 0.0  ;;  %2687 = vmatprep.subr.bf16.mxu0 %v3083_v56 }
 0x1a1   : > { %575 = vadd.xlane.f32.xlu1 %v574_v49  ;;  %578 = vadd.xlane.f32.xlu0 %v577_v52  ;;  %v4093_v49 = vld [vmem:[#allocation7] ss:$0 sm:$0xff] }
 0x1a3   : > { %2688 = vmatpush3.bf16.msra.mxu0 %v3083_v56 }
 0x1a4   : > { %2725 = vmatprep.subr.bf16.mxu0 %v4084_v58 }
 0x1a5   : > { %581 = vadd.xlane.f32.xlu1 %v580_v28 }
 0x212   : > { %v537_v59 = vpop.xlane.xlu0 %536 }
 0x213   : > { %v583_v60 = vmul.f32 0.03125, %v537_v59 }
 0x215   : > { %v599_v61 = vadd.f32 1e-05, %v583_v60 }
 0x216   : > { %v540_v62 = vpop.xlane.xlu1 %539  ;;  %v543_v63 = vpop.xlane.xlu0 %542 }
 0x217   : > { %3089 = vrsqrt.f32 %v599_v61  ;;  %v584_v2 = vmul.f32 0.03125, %v540_v62  ;;  %v585_v3 = vmul.f32 0.03125, %v543_v63 }
 0x219   : > { %v600_v4 = vadd.f32 1e-05, %v584_v2  ;;  %v601_v5 = vadd.f32 1e-05, %v585_v3 }
 0x21a   : > { %v546_v6 = vpop.xlane.xlu1 %545  ;;  %v549_v7 = vpop.xlane.xlu0 %548 }
 0x21b   : > { %3091 = vrsqrt.f32 %v600_v4  ;;  %v586_v8 = vmul.f32 0.03125, %v546_v6  ;;  %v587_v9 = vmul.f32 0.03125, %v549_v7 }
 0x21c   : > { %3093 = vrsqrt.f32 %v601_v5 }
 0x21d   : > { %v602_v12 = vadd.f32 1e-05, %v586_v8  ;;  %v603_v13 = vadd.f32 1e-05, %v587_v9 }
 0x21e   : > { %v552_v14 = vpop.xlane.xlu1 %551  ;;  %v555_v15 = vpop.xlane.xlu0 %554 }
 0x21f   : > { %3095 = vrsqrt.f32 %v602_v12  ;;  %v588_v18 = vmul.f32 0.03125, %v552_v14  ;;  %v589_v19 = vmul.f32 0.03125, %v555_v15 }
 0x220   : > { %3097 = vrsqrt.f32 %v603_v13 }
 0x221   : > { %v3090_v22 = vpop.eup %3089  ;;  %v604_v16 = vadd.f32 1e-05, %v588_v18  ;;  %v605_v26 = vadd.f32 1e-05, %v589_v19 }
 0x222   : > { %v558_v27 = vpop.xlane.xlu1 %557  ;;  %v561_v30 = vpop.xlane.xlu0 %560  ;;  %v631_v31 = vmul.f32 %v3090_v22, %v3993_v36  ;;  %v3086_v22 = vld [vmem:[#allocation11 + $0x8] sm:$0xff]  }
 0x223   : > { %3099 = vrsqrt.f32 %v604_v16  ;;  %v590_v32 = vmul.f32 0.03125, %v558_v27  ;;  %v591_v33 = vmul.f32 0.03125, %v561_v30 }
 0x224   : > { %3101 = vrsqrt.f32 %v605_v26  ;;  %v654_v46 = vmul.f32 %v4088_v34, %v631_v31 }
 0x225   : > { %v3092_v20 = vpop.eup %3091  ;;  %v606_v38 = vadd.f32 1e-05, %v590_v32  ;;  %v607_v39 = vadd.f32 1e-05, %v591_v33 }
 0x226   : > { %v3094_v40 = vpop.eup %3093  ;;  %v564_v41 = vpop.xlane.xlu1 %563  ;;  %v632_v43 = vmul.f32 %v3092_v20, %v4001_v44  ;;  %v677_v44 = vadd.f32 %v4093_v49, %v654_v46 }
 0x227   : > { %v567_v42 = vpop.xlane.xlu0 %566  ;;  %v633_v24 = vmul.f32 %v3094_v40, %v3995_v37  ;;  %3103 = vrsqrt.f32 %v606_v38  ;;  %v592_v36 = vmul.f32 0.03125, %v564_v41 }
 0x228   : > { %v593_v48 = vmul.f32 0.03125, %v567_v42  ;;  %3105 = vrsqrt.f32 %v607_v39  ;;  %v655_v50 = vmul.f32 %v4088_v34, %v632_v43 }
 0x229   : > { %v3096_v51 = vpop.eup %3095  ;;  %v608_v52 = vadd.f32 1e-05, %v592_v36  ;;  %v656_v59 = vmul.f32 %v4088_v34, %v633_v24 }
 0x22a   : > { %v609_v28 = vadd.f32 1e-05, %v593_v48  ;;  %v3098_v29 = vpop.eup %3097  ;;  %v570_v53 = vpop.xlane.xlu1 %569  ;;  %v678_v57 = vadd.f32 %v4093_v49, %v655_v50  ;;  %v634_v37 = vmul.f32 %v3096_v51, %v4003_v45 }
 0x22b   : > { %v573_v56 = vpop.xlane.xlu0 %572  ;;  %v635_v60 = vmul.f32 %v3098_v29, %v4012_v54  ;;  %3107 = vrsqrt.f32 %v608_v52  ;;  %v594_v61 = vmul.f32 0.03125, %v570_v53  ;;  %v679_v54 = vadd.f32 %v4093_v49, %v656_v59 }
 0x22c   : > { %v595_v62 = vmul.f32 0.03125, %v573_v56  ;;  %3109 = vrsqrt.f32 %v609_v28  ;;  %v4101_v63 = vpack.c.bf16 %v678_v57, %v677_v44  ;;  %v657_v2 = vmul.f32 %v4088_v34, %v634_v37 }
 0x22d   : > { %v3100_v3 = vpop.eup %3099  ;;  %v610_v4 = vadd.f32 1e-05, %v594_v61  ;;  %v658_v6 = vmul.f32 %v4088_v34, %v635_v60 }
 0x22e   : > { %v611_v5 = vadd.f32 1e-05, %v595_v62  ;;  %v3102_v7 = vpop.eup %3101  ;;  %v576_v8 = vpop.xlane.xlu1 %575  ;;  %2689 = vmatprep.mubr.msk.bf16.mxu0 %vm437_vm0, %v4101_v63  ;;  %2709 = vmatprep.mubr.msk.bf16.mxu1 %vm437_vm0, %v4101_v63  ;;  %v680_v9 = vadd.f32 %v4093_v49, %v657_v2  ;;  %v636_v12 = vmul.f32 %v3100_v3, %v4014_v55 }
 0x22f   : > { %v579_v45 = vpop.xlane.xlu0 %578  ;;  %v637_v13 = vmul.f32 %v3102_v7, %v4023_v0  ;;  %3111 = vrsqrt.f32 %v610_v4  ;;  %v596_v14 = vmul.f32 0.03125, %v576_v8  ;;  %v681_v30 = vadd.f32 %v4093_v49, %v658_v6 }
 0x230   : > { %v597_v15 = vmul.f32 0.03125, %v579_v45  ;;  %3113 = vrsqrt.f32 %v611_v5  ;;  %v4113_v18 = vpack.c.bf16 %v680_v9, %v679_v54  ;;  %v659_v19 = vmul.f32 %v4088_v34, %v636_v12 }
 0x231   : > { %v3104_v16 = vpop.eup %3103  ;;  %v612_v26 = vadd.f32 1e-05, %v596_v14  ;;  %v660_v33 = vmul.f32 %v4088_v34, %v637_v13 }
 0x232   : > { %v613_v27 = vadd.f32 1e-05, %v597_v15  ;;  %v3106_v31 = vpop.eup %3105  ;;  %v582_v32 = vpop.xlane.xlu1 %581  ;;  %2690 = vmatmul.mubr.msk.bf16.vlgmr.msra.gmra.mrb[0].mxu0 %vm437_vm0, %v4113_v18  ;;  %2710 = vmatmul.mubr.msk.bf16.vlgmr.msra.gmra.mrb[0].mxu1 %vm437_vm0, %v4113_v18  ;;  %v682_v55 = vadd.f32 %v4093_v49, %v659_v19  ;;  %v638_v0 = vmul.f32 %v3104_v16, %v4026_v1 }
 0x233   : > { %v639_v20 = vmul.f32 %v3106_v31, %v4035_v10  ;;  %3115 = vrsqrt.f32 %v612_v26  ;;  %v598_v38 = vmul.f32 0.03125, %v582_v32  ;;  %2726 = vmatpush3.bf16.msra.mxu0 %v4084_v58  ;;  %v683_v1 = vadd.f32 %v4093_v49, %v660_v33 }
 0x234   : > { %3117 = vrsqrt.f32 %v613_v27  ;;  %v695_v39 = vpack.c.bf16 %v682_v55, %v681_v30  ;;  %v661_v40 = vmul.f32 %v4088_v34, %v638_v0  ;;  %2727 = vmatprep.subr.bf16.mxu0 %v3086_v22 }
 0x235   : > { %v3108_v41 = vpop.eup %3107  ;;  %v614_v42 = vadd.f32 1e-05, %v598_v38  ;;  %v662_v43 = vmul.f32 %v4088_v34, %v639_v20 }
 0x236   : > { %v3110_v46 = vpop.eup %3109  ;;  %2693 = vmatprep.mubr.msk.bf16.mxu0 %vm437_vm0, %v695_v39  ;;  %2713 = vmatprep.mubr.msk.bf16.mxu1 %vm437_vm0, %v695_v39  ;;  %v684_v10 = vadd.f32 %v4093_v49, %v661_v40  ;;  %v640_v58 = vmul.f32 %v3108_v41, %v4038_v11 }
 0x237   : > { %v641_v24 = vmul.f32 %v3110_v46, %v4047_v23  ;;  %3119 = vrsqrt.f32 %v614_v42  ;;  %2728 = vmatpush3.bf16.msra.mxu0 %v3086_v22  ;;  %v685_v51 = vadd.f32 %v4093_v49, %v662_v43 }
 0x238   : > { %v696_v36 = vpack.c.bf16 %v684_v10, %v683_v1  ;;  %v663_v48 = vmul.f32 %v4088_v34, %v640_v58 }
 0x239   : > { %v3112_v50 = vpop.eup %3111  ;;  %v664_v11 = vmul.f32 %v4088_v34, %v641_v24 }
 0x23a   : > { %v3114_v52 = vpop.eup %3113  ;;  %2694 = vmatmul.mubr.msk.bf16.gmra.mrb[4].mxu0 %vm437_vm0, %v696_v36  ;;  %2714 = vmatmul.mubr.msk.bf16.gmra.mrb[4].mxu1 %vm437_vm0, %v696_v36  ;;  %v686_v28 = vadd.f32 %v4093_v49, %v663_v48  ;;  %v642_v29 = vmul.f32 %v3112_v50, %v4050_v17 }
 0x23b   : > { %v643_v23 = vmul.f32 %v3114_v52, %v4059_v35  ;;  %v687_v59 = vadd.f32 %v4093_v49, %v664_v11 }
 0x23c   : > { %v697_v53 = vpack.c.bf16 %v686_v28, %v685_v51  ;;  %v665_v56 = vmul.f32 %v4088_v34, %v642_v29 }
 0x23d   : > { %v3116_v44 = vpop.eup %3115  ;;  %v666_v57 = vmul.f32 %v4088_v34, %v643_v23 }
 0x23e   : > { %v3118_v37 = vpop.eup %3117  ;;  %2697 = vmatprep.mubr.msk.bf16.mxu0 %vm437_vm0, %v697_v53  ;;  %2717 = vmatprep.mubr.msk.bf16.mxu1 %vm437_vm0, %v697_v53  ;;  %v688_v60 = vadd.f32 %v4093_v49, %v665_v56  ;;  %v644_v17 = vmul.f32 %v3116_v44, %v4062_v21 }
 0x23f   : > { %v645_v61 = vmul.f32 %v3118_v37, %v4071_v47  ;;  %v689_v3 = vadd.f32 %v4093_v49, %v666_v57 }
 0x240   : > { %v698_v35 = vpack.c.bf16 %v688_v60, %v687_v59  ;;  %v667_v62 = vmul.f32 %v4088_v34, %v644_v17 }
 0x241   : > { %v3120_v2 = vpop.eup %3119  ;;  %v668_v6 = vmul.f32 %v4088_v34, %v645_v61 }
 0x242   : > { %2698 = vmatmul.mubr.msk.bf16.gmra.mrb[8].mxu0 %vm437_vm0, %v698_v35  ;;  %2718 = vmatmul.mubr.msk.bf16.gmra.mrb[8].mxu1 %vm437_vm0, %v698_v35  ;;  %v690_v4 = vadd.f32 %v4093_v49, %v667_v62  ;;  %v646_v5 = vmul.f32 %v3120_v2, %v4074_v25 }
 0x243   : > { %v691_v47 = vadd.f32 %v4093_v49, %v668_v6 }
 0x244   : > { %v699_v7 = vpack.c.bf16 %v690_v4, %v689_v3  ;;  %v669_v21 = vmul.f32 %v4088_v34, %v646_v5 }
 0x246   : > { %2701 = vmatprep.mubr.msk.bf16.mxu0 %vm437_vm0, %v699_v7  ;;  %2721 = vmatprep.mubr.msk.bf16.mxu1 %vm437_vm0, %v699_v7  ;;  %v692_v8 = vadd.f32 %v4093_v49, %v669_v21 }
 0x248   : > { %v700_v45 = vpack.c.bf16 %v692_v8, %v691_v47 }
 0x24a   : > { %2702 = vmatmul.mubr.msk.bf16.gmra.mrb[12].mxu0 %vm437_vm0, %v700_v45  ;;  %2722 = vmatmul.mubr.msk.bf16.gmra.mrb[12].mxu1 %vm437_vm0, %v700_v45 }
 0x24b   : > { %2729 = vmatprep.mubr.msk.bf16.mxu0 %vm437_vm0, %v4101_v63 }
 0x252   : > { %2730 = vmatmul.mubr.msk.bf16.vlgmr.msra.gmra.mrb[16].mxu0 %vm437_vm0, %v4113_v18 }
 0x253   : > { %2733 = vmatprep.mubr.msk.bf16.mxu0 %vm437_vm0, %v695_v39 }
 0x25a   : > { %2734 = vmatmul.mubr.msk.bf16.gmra.mrb[20].mxu0 %vm437_vm0, %v696_v36 }
 0x25b   : > { %2737 = vmatprep.mubr.msk.bf16.mxu0 %vm437_vm0, %v697_v53 }
 0x262   : > { %2738 = vmatmul.mubr.msk.bf16.gmra.mrb[24].mxu0 %vm437_vm0, %v698_v35 }
 0x263   : > { %2741 = vmatprep.mubr.msk.bf16.mxu0 %vm437_vm0, %v699_v7 }
 0x26a   : > { %2742 = vmatmul.mubr.msk.bf16.gmra.mrb[28].mxu0 %vm437_vm0, %v700_v45 }
 0x305   : > { %v2691_v25 = vpop.f32.mrb[0].mxu0  ;;  %v2711_v34 = vpop.f32.mrb[0].mxu1 }
 0x306   : > { %v775_v49 = vpop.f32.mrb[1].mxu0  ;;  %v912_v54 = vpop.f32.mrb[1].mxu1  ;;  %v840_v12 = vmul.f32 0.25, %v2691_v25 }
 0x307   : > { %v2692_v63 = vpop.f32.mrb[2].mxu0  ;;  %v2712_v9 = vpop.f32.mrb[2].mxu1  ;;  %v838_v19 = vmul.f32 0.25, %v775_v49 }
 0x308   : > { %v841_v13 = vmul.f32 0.25, %v2692_v63  ;;  %v976_v14 = vpack.c.bf16 %v2712_v9, %v2711_v34  ;;  %v778_v15 = vpop.f32.mrb[3].mxu0  ;;  %v915_v18 = vpop.f32.mrb[3].mxu1 }
 0x309   : > { %v839_v22 = vmul.f32 0.25, %v778_v15  ;;  %v975_v16 = vpack.c.bf16 %v915_v18, %v912_v54 }
 0x30a   : > { %v4174_v26 = vpack.c.bf16 %v841_v13, %v840_v12  ;;  %1562 = vrot.lane.b32.xlu1 %v976_v14, %s3571_s12  ;;  %v1136_v24 = vsel %vm1107_vm1, %v976_v14, 0 }
 0x30b   : > { %v4177_v27 = vpack.c.bf16 %v839_v22, %v838_v19  ;;  %1560 = vrot.lane.b32.xlu0 %v975_v16, %s3571_s12  ;;  %2941 = vmatprep.subr.msk.bf16.mxu1 %vm1107_vm1, %v975_v16  ;;  %v1133_v30 = vsel %vm1107_vm1, %v975_v16, 0 }
 0x30c   : > { %2746 = vmatpush3.bf16.xpose.msra.mxu1 %v1133_v30 }
 0x30d   : > { %v2695_v31 = vpop.f32.mrb[4].mxu0  ;;  %v2715_v32 = vpop.f32.mrb[4].mxu1  ;;  %2942 = vmatprep.subr.msk.bf16.mxu1 %vm1107_vm1, %v976_v14  ;;  %2761 = vmatprep.mubr.msk.bf16.mxu1 %vm1107_vm1, %v4177_v27 }
 0x30e   : > { %v791_v55 = vpop.f32.mrb[5].mxu0  ;;  %v928_v0 = vpop.f32.mrb[5].mxu1  ;;  %v844_v38 = vmul.f32 0.25, %v2695_v31 }
 0x30f   : > { %v2696_v33 = vpop.f32.mrb[6].mxu0  ;;  %v2716_v20 = vpop.f32.mrb[6].mxu1  ;;  %v842_v43 = vmul.f32 0.25, %v791_v55 }
 0x310   : > { %v845_v39 = vmul.f32 0.25, %v2696_v33  ;;  %v4185_v40 = vpack.c.bf16 %v2716_v20, %v2715_v32  ;;  %v794_v41 = vpop.f32.mrb[7].mxu0  ;;  %v931_v42 = vpop.f32.mrb[7].mxu1 }
 0x311   : > { %v843_v46 = vmul.f32 0.25, %v794_v41  ;;  %v977_v1 = vpack.c.bf16 %v931_v42, %v928_v0 }
 0x312   : > { %v4187_v10 = vpack.c.bf16 %v845_v39, %v844_v38  ;;  %v1142_v54 = vsel %vm1107_vm1, %v4185_v40, 0 }
 0x313   : > { %v4189_v58 = vpack.c.bf16 %v843_v46, %v842_v43  ;;  %1564 = vrot.lane.b32.xlu0 %v977_v1, %s3571_s12  ;;  %v1139_v17 = vsel %vm1107_vm1, %v977_v1, 0 }
 0x314   : > { %2748 = vmatpush3.bf16.xpose.msra.mxu1 %v1136_v24 }
 0x315   : > { %v2699_v36 = vpop.f32.mrb[8].mxu0  ;;  %v2719_v48 = vpop.f32.mrb[8].mxu1  ;;  %2943 = vmatprep.subr.msk.bf16.mxu1 %vm1107_vm1, %v977_v1 }
 0x316   : > { %v807_v50 = vpop.f32.mrb[9].mxu0  ;;  %v944_v51 = vpop.f32.mrb[9].mxu1  ;;  %v848_v29 = vmul.f32 0.25, %v2699_v36 }
 0x317   : > { %v2700_v52 = vpop.f32.mrb[10].mxu0  ;;  %v2720_v28 = vpop.f32.mrb[10].mxu1  ;;  %v846_v44 = vmul.f32 0.25, %v807_v50 }
 0x318   : > { %v849_v11 = vmul.f32 0.25, %v2700_v52  ;;  %v4194_v23 = vpack.c.bf16 %v2720_v28, %v2719_v48  ;;  %v810_v53 = vpop.f32.mrb[11].mxu0  ;;  %v947_v56 = vpop.f32.mrb[11].mxu1  ;;  %v1104_v52 = vlaneseq }
 0x319   : > { %v847_v57 = vmul.f32 0.25, %v810_v53  ;;  %v4196_v37 = vpack.c.bf16 %v947_v56, %v944_v51 }
 0x31a   : > { %v4198_v59 = vpack.c.bf16 %v849_v11, %v848_v29  ;;  %v1148_v55 = vsel %vm1107_vm1, %v4194_v23, 0  ;;  %v4281_v28 = vand.u32 127, %v1104_v52 }
 0x31b   : > { %v4200_v60 = vpack.c.bf16 %v847_v57, %v846_v44  ;;  %v1145_v18 = vsel %vm1107_vm1, %v4196_v37, 0 }
 0x31c   : > { %2750 = vmatpush3.bf16.xpose.msra.mxu1 %v1139_v17  ;;  %vm1106_vm2 = vcmp.lt.s32.totalorder %v4281_v28, 8 }
 0x31d   : > { %v2703_v61 = vpop.f32.mrb[12].mxu0  ;;  %v2723_v35 = vpop.f32.mrb[12].mxu1  ;;  %2944 = vmatprep.subr.msk.bf16.mxu1 %vm1107_vm1, %v4185_v40 }
 0x31e   : > { %v823_v62 = vpop.f32.mrb[13].mxu0  ;;  %v960_v2 = vpop.f32.mrb[13].mxu1  ;;  %v852_v5 = vmul.f32 0.25, %v2703_v61 }
 0x31f   : > { %v2704_v3 = vpop.f32.mrb[14].mxu0  ;;  %v2724_v4 = vpop.f32.mrb[14].mxu1  ;;  %v850_v8 = vmul.f32 0.25, %v823_v62 }
 0x320   : > { %v853_v6 = vmul.f32 0.25, %v2704_v3  ;;  %v4205_v7 = vpack.c.bf16 %v2724_v4, %v2723_v35  ;;  %v826_v21 = vpop.f32.mrb[15].mxu0  ;;  %v963_v47 = vpop.f32.mrb[15].mxu1 }
 0x321   : > { %v851_v45 = vmul.f32 0.25, %v826_v21  ;;  %v4207_v25 = vpack.c.bf16 %v963_v47, %v960_v2 }
 0x322   : > { %v4209_v34 = vpack.c.bf16 %v853_v6, %v852_v5  ;;  %v1154_v50 = vsel %vm1107_vm1, %v4205_v7, 0 }
 0x323   : > { %v4211_v49 = vpack.c.bf16 %v851_v45, %v850_v8  ;;  %v1151_v42 = vsel %vm1107_vm1, %v4207_v25, 0 }
 0x324   : > { %2752 = vmatpush3.bf16.xpose.msra.mxu1 %v1142_v54 }
 0x325   : > { %v2731_v63 = vpop.f32.mrb[16].mxu0  ;;  %2945 = vmatprep.subr.msk.bf16.mxu1 %vm1107_vm1, %v4196_v37 }
 0x326   : > { %v1033_v9 = vpop.f32.mrb[17].mxu0 }
 0x327   : > { %v2732_v12 = vpop.f32.mrb[18].mxu0 }
 0x328   : > { %v4217_v13 = vpack.c.bf16 %v2732_v12, %v2731_v63  ;;  %v1036_v14 = vpop.f32.mrb[19].mxu0 }
 0x329   : > { %v4219_v15 = vpack.c.bf16 %v1036_v14, %v1033_v9 }
 0x32b   : > { %2777 = vmatprep.subr.bf16.mxu0 %v4219_v15 }
 0x32c   : > { %2754 = vmatpush3.bf16.xpose.msra.mxu1 %v1145_v18  ;;  %2778 = vmatpush3.bf16.msra.mxu0 %v4219_v15 }
 0x32d   : > { %v2735_v19 = vpop.f32.mrb[20].mxu0  ;;  %2946 = vmatprep.subr.msk.bf16.mxu1 %vm1107_vm1, %v4194_v23  ;;  %2779 = vmatprep.subr.bf16.mxu0 %v4217_v13 }
 0x32e   : > { %v1049_v22 = vpop.f32.mrb[21].mxu0 }
 0x32f   : > { %v2736_v16 = vpop.f32.mrb[22].mxu0 }
 0x330   : > { %v4228_v30 = vpack.c.bf16 %v2736_v16, %v2735_v19  ;;  %v1052_v31 = vpop.f32.mrb[23].mxu0  ;;  %2780 = vmatpush3.bf16.msra.mxu0 %v4217_v13 }
 0x331   : > { %v4231_v32 = vpack.c.bf16 %v1052_v31, %v1049_v22 }
 0x333   : > { %2781 = vmatprep.subr.bf16.mxu0 %v4231_v32 }
 0x334   : > { %2756 = vmatpush3.bf16.xpose.msra.mxu1 %v1148_v55  ;;  %2782 = vmatpush3.bf16.msra.mxu0 %v4231_v32 }
 0x335   : > { %v2739_v0 = vpop.f32.mrb[24].mxu0  ;;  %2947 = vmatprep.subr.msk.bf16.mxu1 %vm1107_vm1, %v4207_v25  ;;  %2783 = vmatprep.subr.bf16.mxu0 %v4228_v30 }
 0x336   : > { %v1065_v33 = vpop.f32.mrb[25].mxu0 }
 0x337   : > { %v2740_v20 = vpop.f32.mrb[26].mxu0 }
 0x338   : > { %v4240_v38 = vpack.c.bf16 %v2740_v20, %v2739_v0  ;;  %v1068_v39 = vpop.f32.mrb[27].mxu0  ;;  %2784 = vmatpush3.bf16.msra.mxu0 %v4228_v30 }
 0x339   : > { %v4243_v41 = vpack.c.bf16 %v1068_v39, %v1065_v33 }
 0x33b   : > { %2785 = vmatprep.subr.bf16.mxu0 %v4243_v41 }
 0x33c   : > { %2758 = vmatpush3.bf16.xpose.msra.mxu1 %v1151_v42  ;;  %2786 = vmatpush3.bf16.msra.mxu0 %v4243_v41 }
 0x33d   : > { %v2743_v43 = vpop.f32.mrb[28].mxu0  ;;  %2948 = vmatprep.subr.msk.bf16.mxu1 %vm1107_vm1, %v4205_v7  ;;  %2787 = vmatprep.subr.bf16.mxu0 %v4240_v38 }
 0x33e   : > { %v1081_v46 = vpop.f32.mrb[29].mxu0 }
 0x33f   : > { %v2744_v1 = vpop.f32.mrb[30].mxu0 }
 0x340   : > { %v4252_v24 = vpack.c.bf16 %v2744_v1, %v2743_v43  ;;  %v1084_v36 = vpop.f32.mrb[31].mxu0  ;;  %2788 = vmatpush3.bf16.msra.mxu0 %v4240_v38 }
 0x341   : > { %v4255_v48 = vpack.c.bf16 %v1084_v36, %v1081_v46 }
 0x343   : > { %2789 = vmatprep.subr.bf16.mxu0 %v4255_v48 }
 0x344   : > { %2760 = vmatpush3.bf16.xpose.msra.mxu1 %v1154_v50  ;;  %2790 = vmatpush3.bf16.msra.mxu0 %v4255_v48 }
 0x345   : > { %2791 = vmatprep.subr.bf16.mxu0 %v4252_v24 }
 0x348   : > { %2792 = vmatpush3.bf16.msra.mxu0 %v4252_v24 }
 0x34b   : > { %2762 = vmatmul.mubr.msk.bf16.vlgmr.msra.gmra.mrb[16].mxu1 %vm1107_vm1, %v4174_v26 }
 0x34c   : > { %2765 = vmatprep.mubr.msk.bf16.mxu1 %vm1107_vm1, %v4189_v58 }
 0x353   : > { %2766 = vmatmul.mubr.msk.bf16.gmra.mrb[20].mxu1 %vm1107_vm1, %v4187_v10 }
 0x354   : > { %2769 = vmatprep.mubr.msk.bf16.mxu1 %vm1107_vm1, %v4200_v60 }
 0x35b   : > { %2770 = vmatmul.mubr.msk.bf16.gmra.mrb[24].mxu1 %vm1107_vm1, %v4198_v59 }
 0x35c   : > { %2773 = vmatprep.mubr.msk.bf16.mxu1 %vm1107_vm1, %v4211_v49 }
 0x363   : > { %2774 = vmatmul.mubr.msk.bf16.gmra.mrb[28].mxu1 %vm1107_vm1, %v4209_v34 }
 0x37d   : > { %v4277_v51 = vpop.permute.xlu0 %1560 }
 0x37e   : > { %2949 = vmatprep.subr.msk.bf16.mxu0 %vm1107_vm1, %v4277_v51 }
 0x41e   : > { %v2763_v29 = vpop.f32.mrb[16].mxu1 }
 0x41f   : > { %v1190_v11 = vpop.f32.mrb[17].mxu1  ;;  %v4286_v53 = vsel %vm1106_vm2, %v2763_v29, -1e+30 }
 0x420   : > { %1273 = vmax.xlane.f32.xlu0 %v4286_v53  ;;  %v2764_v56 = vpop.f32.mrb[18].mxu1  ;;  %v4296_v17 = vsel %vm1106_vm2, %v1190_v11, -1e+30 }
 0x421   : > { %v1193_v44 = vpop.f32.mrb[19].mxu1  ;;  %v4291_v57 = vsel %vm1106_vm2, %v2764_v56, -1e+30 }
 0x422   : > { %1275 = vmax.xlane.f32.xlu1 %v4291_v57  ;;  %v4301_v61 = vsel %vm1106_vm2, %v1193_v44, -1e+30 }
 0x424   : > { %1269 = vmax.xlane.f32.xlu0 %v4296_v17 }
 0x426   : > { %1271 = vmax.xlane.f32.xlu1 %v4301_v61  ;;  %v2767_v35 = vpop.f32.mrb[20].mxu1 }
 0x427   : > { %v1206_v62 = vpop.f32.mrb[21].mxu1  ;;  %v4310_v63 = vsel %vm1106_vm2, %v2767_v35, -1e+30 }
 0x428   : > { %v2768_v2 = vpop.f32.mrb[22].mxu1  ;;  %v4315_v9 = vsel %vm1106_vm2, %v1206_v62, -1e+30 }
 0x429   : > { %v1209_v3 = vpop.f32.mrb[23].mxu1 }
 0x42a   : > { %v4335_v14 = vsel %vm1106_vm2, %v1209_v3, -1e+30 }
 0x42e   : > { %v2771_v4 = vpop.f32.mrb[24].mxu1 }
 0x42f   : > { %v1222_v5 = vpop.f32.mrb[25].mxu1  ;;  %v4345_v19 = vsel %vm1106_vm2, %v2771_v4, -1e+30 }
 0x430   : > { %v2772_v6 = vpop.f32.mrb[26].mxu1 }
 0x431   : > { %v1225_v21 = vpop.f32.mrb[27].mxu1  ;;  %v4350_v22 = vsel %vm1106_vm2, %v2772_v6, -1e+30 }
 0x432   : > { %v4330_v12 = vsel %vm1106_vm2, %v1225_v21, -1e+30 }
 0x436   : > { %v2775_v47 = vpop.f32.mrb[28].mxu1 }
 0x437   : > { %1566 = vrot.lane.b32.xlu1 %v4185_v40, %s3571_s12  ;;  %v1238_v8 = vpop.f32.mrb[29].mxu1  ;;  %v4320_v40 = vsel %vm1106_vm2, %v1222_v5, -1e+30  ;;  %v4340_v18 = vsel %vm1106_vm2, %v2775_v47, -1e+30 }
 0x438   : > { %v2776_v45 = vpop.f32.mrb[30].mxu1  ;;  %v4355_v16 = vsel %vm1106_vm2, %v1238_v8, -1e+30 }
 0x439   : > { %v1241_v54 = vpop.f32.mrb[31].mxu1  ;;  %v4360_v31 = vsel %vm1106_vm2, %v2776_v45, -1e+30 }
 0x43a   : > { %1568 = vrot.lane.b32.xlu0 %v4196_v37, %s3571_s12  ;;  %v4325_v37 = vsel %vm1106_vm2, %v2768_v2, -1e+30  ;;  %v4365_v55 = vsel %vm1106_vm2, %v1241_v54, -1e+30 }
 0x459   : > { %1281 = vmax.xlane.f32.xlu0 %v4310_v63 }
 0x45b   : > { %1277 = vmax.xlane.f32.xlu1 %v4315_v9 }
 0x45d   : > { %1285 = vmax.xlane.f32.xlu0 %v4320_v40 }
 0x45f   : > { %1283 = vmax.xlane.f32.xlu1 %v4325_v37 }
 0x461   : > { %1287 = vmax.xlane.f32.xlu0 %v4330_v12 }
 0x463   : > { %1279 = vmax.xlane.f32.xlu1 %v4335_v14 }
 0x465   : > { %1297 = vmax.xlane.f32.xlu0 %v4340_v18 }
 0x467   : > { %1289 = vmax.xlane.f32.xlu1 %v4345_v19 }
 0x46b   : > { %1291 = vmax.xlane.f32.xlu1 %v4350_v22 }
 0x46f   : > { %1293 = vmax.xlane.f32.xlu1 %v4355_v16 }
 0x473   : > { %1299 = vmax.xlane.f32.xlu1 %v4360_v31 }
 0x477   : > { %1295 = vmax.xlane.f32.xlu1 %v4365_v55 }
 0x47b   : > { %1572 = vrot.lane.b32.xlu0 %v4207_v25, %s3571_s12 }
 0x47f   : > { %1574 = vrot.lane.b32.xlu0 %v4205_v7, %s3571_s12 }
 0x483   : > { %1536 = vrot.lane.b32.xlu0 %v4177_v27, %s3571_s12  ;;  %v1563_v27 = vpop.permute.xlu1 %1562 }
 0x484   : > { %v1604_v42 = vsel %vm1107_vm1, %v1563_v27, 0 }
 0x487   : > { %1540 = vrot.lane.b32.xlu0 %v4189_v58, %s3571_s12 }
 0x488   : > { %1570 = vrot.lane.b32.xlu1 %v4194_v23, %s3571_s12 }
 0x48b   : > { %1544 = vrot.lane.b32.xlu0 %v4200_v60, %s3571_s12 }
 0x48c   : > { %1538 = vrot.lane.b32.xlu1 %v4174_v26, %s3571_s12  ;;  %v1565_v26 = vpop.permute.xlu0 %1564 }
 0x48d   : > { %v1607_v43 = vsel %vm1107_vm1, %v1565_v26, 0 }
 0x48f   : > { %1548 = vrot.lane.b32.xlu0 %v4211_v49, %s3571_s12 }
 0x490   : > { %1542 = vrot.lane.b32.xlu1 %v4187_v10, %s3571_s12 }
 0x493   : > { %1865 = vrot.lane.b32.xlu0 %v4219_v15, %s3571_s12 }
 0x494   : > { %1546 = vrot.lane.b32.xlu1 %v4198_v59, %s3571_s12 }
 0x497   : > { %1869 = vrot.lane.b32.xlu0 %v4231_v32, %s3571_s12 }
 0x498   : > { %1550 = vrot.lane.b32.xlu1 %v4209_v34, %s3571_s12 }
 0x49b   : > { %1871 = vrot.lane.b32.xlu0 %v4228_v30, %s3571_s12 }
 0x49c   : > { %1867 = vrot.lane.b32.xlu1 %v4217_v13, %s3571_s12 }
 0x49f   : > { %1875 = vrot.lane.b32.xlu0 %v4240_v38, %s3571_s12 }
 0x4a0   : > { %1873 = vrot.lane.b32.xlu1 %v4243_v41, %s3571_s12  ;;  %v1601_v41 = vsel %vm1107_vm1, %v4277_v51, 0 }
 0x4ad   : > { %v1274_v10 = vpop.xlane.xlu0 %1273 }
 0x4ae   : > { %v1303_v59 = vsub.f32 %v4286_v53, %v1274_v10 }
 0x4af   : > { %v1276_v58 = vpop.xlane.xlu1 %1275 }
 0x4b0   : > { %v1304_v23 = vsub.f32 %v4291_v57, %v1276_v58  ;;  %v1321_v15 = vmul.f32 1.442695, %v1303_v59 }
 0x4b1   : > { %v1270_v60 = vpop.xlane.xlu0 %1269 }
 0x4b2   : > { %v1323_v7 = vmul.f32 1.442695, %v1304_v23  ;;  %v1301_v25 = vsub.f32 %v4296_v17, %v1270_v60 }
 0x4b3   : > { %v1272_v34 = vpop.xlane.xlu1 %1271 }
 0x4b4   : > { %v1317_v49 = vmul.f32 1.442695, %v1301_v25  ;;  %v1302_v13 = vsub.f32 %v4301_v61, %v1272_v34  ;;  %3121 = vpow2.f32 %v1323_v7 }
 0x4b5   : > { %v1569_v36 = vpop.permute.xlu0 %1568 }
 0x4b6   : > { %v1319_v30 = vmul.f32 1.442695, %v1302_v13  ;;  %3123 = vpow2.f32 %v1317_v49  ;;  %v1613_v50 = vsel %vm1107_vm1, %v1569_v36, 0 }
 0x4b7   : > { %v1567_v46 = vpop.permute.xlu1 %1566 }
 0x4b8   : > { %3125 = vpow2.f32 %v1319_v30  ;;  %v1610_v1 = vsel %vm1107_vm1, %v1567_v46, 0 }
 0x4b9   : > { %3127 = vpow2.f32 %v1321_v15 }
 0x4be   : > { %v4406_v32 = vpop.eup %3121 }
 0x4c0   : > { %v4408_v0 = vpop.eup %3123 }
 0x4c2   : > { %v4410_v33 = vpop.eup %3125 }
 0x4c3   : > { %v4412_v20 = vpop.eup %3127  ;;  %v1381_v38 = vpack.c.bf16 %v4410_v33, %v4408_v0 }
 0x4c4   : > { %v1382_v39 = vpack.c.bf16 %v4406_v32, %v4412_v20 }
 0x4c5   : > { %2793 = vmatprep.mubr.bf16.mxu0 %v1381_v38 }
 0x4c6   : > { %2794 = vmatmul.mubr.bf16.vlgmr.msra.gmra.mrb[32].mxu0 %v1382_v39 }
 0x4c7   : > { %2810 = vmatpush3.bf16.xpose.msra.mxu0 %v1601_v41 }
 0x4c8   : > { %2950 = vmatprep.subr.msk.bf16.mxu0 %vm1107_vm1, %v1563_v27 }
 0x4cf   : > { %2812 = vmatpush3.bf16.xpose.msra.mxu0 %v1604_v42 }
 0x4d0   : > { %2951 = vmatprep.subr.msk.bf16.mxu0 %vm1107_vm1, %v1565_v26 }
 0x4d7   : > { %2814 = vmatpush3.bf16.xpose.msra.mxu0 %v1607_v43 }
 0x4d8   : > { %2952 = vmatprep.subr.msk.bf16.mxu0 %vm1107_vm1, %v1567_v46 }
 0x4df   : > { %2816 = vmatpush3.bf16.xpose.msra.mxu0 %v1610_v1 }
 0x4e0   : > { %2953 = vmatprep.subr.msk.bf16.mxu0 %vm1107_vm1, %v1569_v36 }
 0x4e6   : > { %v1282_v51 = vpop.xlane.xlu0 %1281 }
 0x4e7   : > { %2818 = vmatpush3.bf16.xpose.msra.mxu0 %v1613_v50  ;;  %v1307_v44 = vsub.f32 %v4310_v63, %v1282_v51 }
 0x4e8   : > { %v1278_v52 = vpop.xlane.xlu1 %1277 }
 0x4e9   : > { %v1305_v29 = vsub.f32 %v4315_v9, %v1278_v52  ;;  %v1329_v5 = vmul.f32 1.442695, %v1307_v44 }
 0x4ea   : > { %v1286_v11 = vpop.xlane.xlu0 %1285 }
 0x4eb   : > { %v1325_v57 = vmul.f32 1.442695, %v1305_v29  ;;  %v1309_v61 = vsub.f32 %v4320_v40, %v1286_v11 }
 0x4ec   : > { %v1284_v53 = vpop.xlane.xlu1 %1283 }
 0x4ed   : > { %v1308_v56 = vsub.f32 %v4325_v37, %v1284_v53  ;;  %3129 = vpow2.f32 %v1325_v57  ;;  %v1333_v21 = vmul.f32 1.442695, %v1309_v61 }
 0x4ee   : > { %v1288_v17 = vpop.xlane.xlu0 %1287 }
 0x4ef   : > { %v1331_v35 = vmul.f32 1.442695, %v1308_v56  ;;  %v1310_v62 = vsub.f32 %v4330_v12, %v1288_v17 }
 0x4f0   : > { %v1280_v2 = vpop.xlane.xlu1 %1279 }
 0x4f1   : > { %v1335_v3 = vmul.f32 1.442695, %v1310_v62  ;;  %v1306_v4 = vsub.f32 %v4335_v14, %v1280_v2  ;;  %3131 = vpow2.f32 %v1331_v35 }
 0x4f2   : > { %v1298_v6 = vpop.xlane.xlu0 %1297 }
 0x4f3   : > { %v1327_v47 = vmul.f32 1.442695, %v1306_v4  ;;  %3133 = vpow2.f32 %v1335_v3  ;;  %v1315_v49 = vsub.f32 %v4340_v18, %v1298_v6 }
 0x4f4   : > { %v1290_v8 = vpop.xlane.xlu1 %1289 }
 0x4f5   : > { %3135 = vpow2.f32 %v1327_v47  ;;  %v1311_v45 = vsub.f32 %v4345_v19, %v1290_v8 }
 0x4f6   : > { %3137 = vpow2.f32 %v1329_v5  ;;  %v1573_v54 = vpop.permute.xlu0 %1572 }
 0x4f7   : > { %3139 = vpow2.f32 %v1333_v21  ;;  %v1337_v63 = vmul.f32 1.442695, %v1311_v45  ;;  %v4438_v14 = vpop.eup %3129  ;;  %v1619_v11 = vsel %vm1107_vm1, %v1573_v54, 0 }
 0x4f8   : > { %v1292_v9 = vpop.xlane.xlu1 %1291 }
 0x4f9   : > { %v1312_v40 = vsub.f32 %v4350_v22, %v1292_v9  ;;  %3141 = vpow2.f32 %v1337_v63 }
 0x4fa   : > { %v4436_v37 = vpop.permute.xlu0 %1574 }
 0x4fb   : > { %v1339_v12 = vmul.f32 1.442695, %v1312_v40  ;;  %v4440_v27 = vpop.eup %3131  ;;  %v1622_v62 = vsel %vm1107_vm1, %v4436_v37, 0 }
 0x4fc   : > { %v1294_v26 = vpop.xlane.xlu1 %1293 }
 0x4fd   : > { %3143 = vpow2.f32 %v1339_v12  ;;  %v4442_v10 = vpop.eup %3133  ;;  %v1313_v23 = vsub.f32 %v4355_v16, %v1294_v26 }
 0x4fe   : > { %v1537_v19 = vpop.permute.xlu0 %1536 }
 0x4ff   : > { %v4444_v58 = vpop.eup %3135  ;;  %v1341_v15 = vmul.f32 1.442695, %v1313_v23 }
 0x500   : > { %v4447_v59 = vpop.eup %3137  ;;  %v1300_v22 = vpop.xlane.xlu1 %1299  ;;  %v1383_v60 = vpack.c.bf16 %v4444_v58, %v4438_v14 }
 0x501   : > { %v4451_v7 = vpop.eup %3139  ;;  %v1316_v25 = vsub.f32 %v4360_v31, %v1300_v22  ;;  %v1384_v34 = vpack.c.bf16 %v4440_v27, %v4447_v59  ;;  %v1345_v31 = vmul.f32 1.442695, %v1315_v49  ;;  %3145 = vpow2.f32 %v1341_v15 }
 0x502   : > { %2797 = vmatprep.mubr.bf16.mxu0 %v1383_v60  ;;  %v1541_v13 = vpop.permute.xlu0 %1540  ;;  %v1385_v16 = vpack.c.bf16 %v4442_v10, %v4451_v7 }
 0x503   : > { %2798 = vmatmul.mubr.bf16.gmra.mrb[36].mxu0 %v1384_v34  ;;  %v1347_v30 = vmul.f32 1.442695, %v1316_v25  ;;  %v4460_v41 = vpop.eup %3141 }
 0x504   : > { %v1296_v38 = vpop.xlane.xlu1 %1295  ;;  %2801 = vmatprep.mubr.bf16.mxu0 %v1385_v16 }
 0x505   : > { %v1314_v39 = vsub.f32 %v4365_v55, %v1296_v38  ;;  %3147 = vpow2.f32 %v1347_v30 }
 0x506   : > { %v1545_v42 = vpop.permute.xlu0 %1544 }
 0x507   : > { %v4462_v43 = vpop.eup %3143  ;;  %v1343_v18 = vmul.f32 1.442695, %v1314_v39 }
 0x508   : > { %v1571_v46 = vpop.permute.xlu1 %1570  ;;  %v1386_v1 = vpack.c.bf16 %v4462_v43, %v4460_v41 }
 0x509   : > { %3149 = vpow2.f32 %v1343_v18  ;;  %v1616_v36 = vsel %vm1107_vm1, %v1571_v46, 0  ;;  %2954 = vmatprep.subr.msk.bf16.mxu0 %vm1107_vm1, %v1571_v46 }
 0x50a   : > { %3151 = vpow2.f32 %v1345_v31  ;;  %2820 = vmatpush3.bf16.xpose.msra.mxu0 %v1616_v36  ;;  %v1549_v55 = vpop.permute.xlu0 %1548 }
 0x50b   : > { %2802 = vmatmul.mubr.bf16.gmra.mrb[40].mxu0 %v1386_v1  ;;  %2955 = vmatprep.subr.msk.bf16.mxu0 %vm1107_vm1, %v1573_v54  ;;  %v4469_v29 = vpop.eup %3145 }
 0x50c   : > { %v1539_v50 = vpop.permute.xlu1 %1538 }
 0x50e   : > { %v1866_v51 = vpop.permute.xlu0 %1865 }
 0x50f   : > { %2909 = vmatprep.subr.bf16.mxu1 %v1866_v51  ;;  %v4472_v53 = vpop.eup %3147 }
 0x510   : > { %v1543_v52 = vpop.permute.xlu1 %1542  ;;  %2917 = vmatpush3.bf16.msra.mxu1 %v1866_v51 }
 0x512   : > { %2822 = vmatpush3.bf16.xpose.msra.mxu0 %v1619_v11  ;;  %v1870_v3 = vpop.permute.xlu0 %1869 }
 0x513   : > { %v4474_v56 = vpop.eup %3149  ;;  %2956 = vmatprep.subr.msk.bf16.mxu0 %vm1107_vm1, %v4436_v37 }
 0x514   : > { %v4478_v44 = vpop.eup %3151  ;;  %v1547_v57 = vpop.permute.xlu1 %1546  ;;  %v1387_v17 = vpack.c.bf16 %v4474_v56, %v4469_v29 }
 0x515   : > { %v1388_v61 = vpack.c.bf16 %v4472_v53, %v4478_v44 }
 0x516   : > { %2805 = vmatprep.mubr.bf16.mxu0 %v1387_v17  ;;  %v1872_v4 = vpop.permute.xlu0 %1871 }
 0x517   : > { %2806 = vmatmul.mubr.bf16.gmra.mrb[44].mxu0 %v1388_v61 }
 0x518   : > { %v1551_v35 = vpop.permute.xlu1 %1550  ;;  %2825 = vmatprep.mubr.msk.bf16.mxu0 %vm1107_vm1, %v1537_v19 }
 0x51a   : > { %2824 = vmatpush3.bf16.xpose.msra.mxu0 %v1622_v62  ;;  %v1876_v6 = vpop.permute.xlu0 %1875 }
 0x51b   : > { %2841 = vmatprep.subr.bf16.mxu0 %v1866_v51 }
 0x51c   : > { %v1868_v2 = vpop.permute.xlu1 %1867 }
 0x51d   : > { %2910 = vmatprep.subr.bf16.mxu1 %v1868_v2 }
 0x51e   : > { %2918 = vmatpush3.bf16.msra.mxu1 %v1868_v2 }
 0x51f   : > { %2911 = vmatprep.subr.bf16.mxu1 %v1870_v3 }
 0x520   : > { %v1874_v5 = vpop.permute.xlu1 %1873 }
 0x521   : > { %2826 = vmatmul.mubr.msk.bf16.vlgmr.msra.gmra.mrb[48].mxu0 %vm1107_vm1, %v1539_v50 }
 0x522   : > { %2829 = vmatprep.mubr.msk.bf16.mxu0 %vm1107_vm1, %v1541_v13  ;;  %2842 = vmatpush3.bf16.msra.mxu0 %v1866_v51 }
 0x523   : > { %2919 = vmatpush3.bf16.msra.mxu1 %v1870_v3  ;;  %2843 = vmatprep.subr.bf16.mxu0 %v1868_v2 }
 0x524   : > { %2912 = vmatprep.subr.bf16.mxu1 %v1872_v4 }
 0x526   : > { %2844 = vmatpush3.bf16.msra.mxu0 %v1868_v2 }
 0x527   : > { %2920 = vmatpush3.bf16.msra.mxu1 %v1872_v4  ;;  %2845 = vmatprep.subr.bf16.mxu0 %v1870_v3 }
 0x528   : > { %2913 = vmatprep.subr.bf16.mxu1 %v1874_v5 }
 0x529   : > { %2830 = vmatmul.mubr.msk.bf16.gmra.mrb[52].mxu0 %vm1107_vm1, %v1543_v52 }
 0x52a   : > { %2833 = vmatprep.mubr.msk.bf16.mxu0 %vm1107_vm1, %v1545_v42  ;;  %2846 = vmatpush3.bf16.msra.mxu0 %v1870_v3 }
 0x52b   : > { %2921 = vmatpush3.bf16.msra.mxu1 %v1874_v5  ;;  %2847 = vmatprep.subr.bf16.mxu0 %v1872_v4 }
 0x52c   : > { %2914 = vmatprep.subr.bf16.mxu1 %v1876_v6 }
 0x52e   : > { %2848 = vmatpush3.bf16.msra.mxu0 %v1872_v4 }
 0x52f   : > { %2922 = vmatpush3.bf16.msra.mxu1 %v1876_v6  ;;  %2849 = vmatprep.subr.bf16.mxu0 %v1874_v5 }
 0x531   : > { %2834 = vmatmul.mubr.msk.bf16.gmra.mrb[56].mxu0 %vm1107_vm1, %v1547_v57 }
 0x532   : > { %2837 = vmatprep.mubr.msk.bf16.mxu0 %vm1107_vm1, %v1549_v55  ;;  %2850 = vmatpush3.bf16.msra.mxu0 %v1874_v5 }
 0x533   : > { %2851 = vmatprep.subr.bf16.mxu0 %v1876_v6 }
 0x536   : > { %2852 = vmatpush3.bf16.msra.mxu0 %v1876_v6 }
 0x539   : > { %2838 = vmatmul.mubr.msk.bf16.gmra.mrb[60].mxu0 %vm1107_vm1, %v1551_v35 }
 0x599   : > { %v4494_v21 = vpop.f32.mrb[32].mxu0 }
 0x59a   : > { %v4496_v47 = vpop.f32.mrb[33].mxu0 }
 0x59b   : > { %v4498_v8 = vpop.f32.mrb[34].mxu0 }
 0x59c   : > { %v4500_v45 = vpop.f32.mrb[35].mxu0 }
 0x5d6   : > { %v4502_v54 = vpop.f32.mrb[36].mxu0 }
 0x5d7   : > { %v4504_v63 = vpop.f32.mrb[37].mxu0 }
 0x5d8   : > { %v4506_v9 = vpop.f32.mrb[38].mxu0 }
 0x5d9   : > { %v4508_v40 = vpop.f32.mrb[39].mxu0 }
 0x5de   : > { %v4510_v37 = vpop.f32.mrb[40].mxu0 }
 0x5df   : > { %v4512_v12 = vpop.f32.mrb[41].mxu0 }
 0x5e0   : > { %v4514_v26 = vpop.f32.mrb[42].mxu0 }
 0x5e1   : > { %v4516_v19 = vpop.f32.mrb[43].mxu0 }
 0x5ea   : > { %v4518_v23 = vpop.f32.mrb[44].mxu0 }
 0x5eb   : > { %4797 = vst [vmem:[#allocation23_spill] sm:$0xff] %v4518_v23  ;;  %v4520_v22 = vpop.f32.mrb[45].mxu0 }
 0x5ec   : > { %v4522_v60 = vpop.f32.mrb[46].mxu0 }
 0x5ed   : > { %4798 = vst [vmem:[#allocation24_spill] sm:$0xff] %v4522_v60  ;;  %v4524_v25 = vpop.f32.mrb[47].mxu0 }
 0x5f4   : > { %v2827_v34 = vpop.f32.mrb[48].mxu0 }
 0x5f5   : > { %v1658_v49 = vpop.f32.mrb[49].mxu0  ;;  %v1723_v13 = vsel %vm1106_vm2, %v2827_v34, -1e+30 }
 0x5f6   : > { %1741 = vmax.xlane.f32.xlu1 %v1723_v13  ;;  %v2828_v16 = vpop.f32.mrb[50].mxu0  ;;  %v1721_v15 = vsel %vm1106_vm2, %v1658_v49, -1e+30 }
 0x5f7   : > { %1737 = vmax.xlane.f32.xlu0 %v1721_v15  ;;  %v1661_v30 = vpop.f32.mrb[51].mxu0  ;;  %v1724_v38 = vsel %vm1106_vm2, %v2828_v16, -1e+30 }
 0x5f8   : > { %v1722_v42 = vsel %vm1106_vm2, %v1661_v30, -1e+30 }
 0x5fa   : > { %1743 = vmax.xlane.f32.xlu1 %v1724_v38 }
 0x5fc   : > { %v2831_v39 = vpop.f32.mrb[52].mxu0 }
 0x5fd   : > { %v1674_v31 = vpop.f32.mrb[53].mxu0  ;;  %v1727_v36 = vsel %vm1106_vm2, %v2831_v39, -1e+30 }
 0x5fe   : > { %1739 = vmax.xlane.f32.xlu1 %v1722_v42  ;;  %v2832_v18 = vpop.f32.mrb[54].mxu0  ;;  %v1725_v46 = vsel %vm1106_vm2, %v1674_v31, -1e+30 }
 0x5ff   : > { %1745 = vmax.xlane.f32.xlu0 %v1725_v46  ;;  %v1677_v1 = vpop.f32.mrb[55].mxu0  ;;  %v1728_v51 = vsel %vm1106_vm2, %v2832_v18, -1e+30 }
 0x600   : > { %v1726_v17 = vsel %vm1106_vm2, %v1677_v1, -1e+30 }
 0x602   : > { %1749 = vmax.xlane.f32.xlu1 %v1727_v36 }
 0x604   : > { %v2835_v55 = vpop.f32.mrb[56].mxu0 }
 0x605   : > { %v1690_v50 = vpop.f32.mrb[57].mxu0  ;;  %v4554_v2 = vsel %vm1106_vm2, %v2835_v55, -1e+30 }
 0x606   : > { %1751 = vmax.xlane.f32.xlu1 %v1728_v51  ;;  %v2836_v52 = vpop.f32.mrb[58].mxu0  ;;  %v4564_v6 = vsel %vm1106_vm2, %v1690_v50, -1e+30 }
 0x607   : > { %v1693_v11 = vpop.f32.mrb[59].mxu0  ;;  %v4542_v57 = vsel %vm1106_vm2, %v2836_v52, -1e+30 }
 0x608   : > { %1759 = vmax.xlane.f32.xlu0 %v4542_v57  ;;  %v4549_v61 = vsel %vm1106_vm2, %v1693_v11, -1e+30 }
 0x60a   : > { %1747 = vmax.xlane.f32.xlu1 %v1726_v17 }
 0x60c   : > { %1755 = vmax.xlane.f32.xlu0 %v4549_v61  ;;  %v2839_v35 = vpop.f32.mrb[60].mxu0 }
 0x60d   : > { %v1706_v62 = vpop.f32.mrb[61].mxu0  ;;  %v4583_v16 = vsel %vm1106_vm2, %v2839_v35, -1e+30 }
 0x60e   : > { %1757 = vmax.xlane.f32.xlu1 %v4554_v2  ;;  %v2840_v3 = vpop.f32.mrb[62].mxu0  ;;  %v4578_v49 = vsel %vm1106_vm2, %v1706_v62, -1e+30 }
 0x60f   : > { %v1709_v4 = vpop.f32.mrb[63].mxu0  ;;  %v4559_v5 = vsel %vm1106_vm2, %v2840_v3, -1e+30 }
 0x610   : > { %1767 = vmax.xlane.f32.xlu0 %v4559_v5  ;;  %v4569_v34 = vsel %vm1106_vm2, %v1709_v4, -1e+30 }
 0x612   : > { %1753 = vmax.xlane.f32.xlu1 %v4564_v6 }
 0x614   : > { %1763 = vmax.xlane.f32.xlu0 %v4569_v34 }
 0x623   : > { %1877 = vrot.lane.b32.xlu1 %v4255_v48, %s3571_s12 }
 0x62a   : > { %1879 = vrot.lane.b32.xlu0 %v4252_v24, %s3571_s12 }
 0x647   : > { %1761 = vmax.xlane.f32.xlu1 %v4578_v49 }
 0x64b   : > { %1765 = vmax.xlane.f32.xlu1 %v4583_v16 }
 0x683   : > { %v1742_v30 = vpop.xlane.xlu1 %1741 }
 0x684   : > { %v1738_v39 = vpop.xlane.xlu0 %1737  ;;  %v1771_v31 = vsub.f32 %v1723_v13, %v1742_v30 }
 0x685   : > { %v1769_v18 = vsub.f32 %v1721_v15, %v1738_v39 }
 0x686   : > { %v1789_v55 = vmul.f32 1.442695, %v1771_v31 }
 0x687   : > { %v1785_v48 = vmul.f32 1.442695, %v1769_v18  ;;  %v1744_v1 = vpop.xlane.xlu1 %1743 }
 0x688   : > { %v1772_v24 = vsub.f32 %v1724_v38, %v1744_v1 }
 0x689   : > { %3153 = vpow2.f32 %v1785_v48 }
 0x68a   : > { %3155 = vpow2.f32 %v1789_v55  ;;  %v1791_v11 = vmul.f32 1.442695, %v1772_v24 }
 0x68b   : > { %v1740_v50 = vpop.xlane.xlu1 %1739 }
 0x68c   : > { %v1770_v52 = vsub.f32 %v1722_v42, %v1740_v50  ;;  %v1746_v3 = vpop.xlane.xlu0 %1745 }
 0x68d   : > { %v1773_v4 = vsub.f32 %v1725_v46, %v1746_v3 }
 0x68e   : > { %v1787_v62 = vmul.f32 1.442695, %v1770_v52 }
 0x68f   : > { %v1750_v28 = vpop.xlane.xlu1 %1749  ;;  %v1793_v39 = vmul.f32 1.442695, %v1773_v4 }
 0x690   : > { %3157 = vpow2.f32 %v1787_v62  ;;  %v1775_v35 = vsub.f32 %v1727_v36, %v1750_v28 }
 0x691   : > { %3159 = vpow2.f32 %v1791_v11 }
 0x692   : > { %v1797_v60 = vmul.f32 1.442695, %v1775_v35 }
 0x693   : > { %v3154_v23 = vpop.eup %3153  ;;  %v1752_v13 = vpop.xlane.xlu1 %1751 }
 0x694   : > { %3161 = vpow2.f32 %v1797_v60  ;;  %1817 = vadd.xlane.f32.xlu1 %v3154_v23  ;;  %v1776_v15 = vsub.f32 %v1728_v51, %v1752_v13  ;;  %v3156_v38 = vpop.eup %3155 }
 0x695   : > { %v1760_v30 = vpop.xlane.xlu0 %1759  ;;  %3163 = vpow2.f32 %v1793_v39 }
 0x696   : > { %v1799_v18 = vmul.f32 1.442695, %v1776_v15  ;;  %v1780_v51 = vsub.f32 %v4542_v57, %v1760_v30 }
 0x697   : > { %v1748_v31 = vpop.xlane.xlu1 %1747 }
 0x698   : > { %v1774_v42 = vsub.f32 %v1726_v17, %v1748_v31  ;;  %1821 = vadd.xlane.f32.xlu1 %v3156_v38  ;;  %3165 = vpow2.f32 %v1799_v18 }
 0x699   : > { %v1756_v48 = vpop.xlane.xlu0 %1755 }
 0x69a   : > { %v3158_v1 = vpop.eup %3157  ;;  %v1795_v55 = vmul.f32 1.442695, %v1774_v42  ;;  %v1778_v46 = vsub.f32 %v4549_v61, %v1756_v48  ;;  %v1807_v61 = vmul.f32 1.442695, %v1780_v51 }
 0x69b   : > { %v3160_v36 = vpop.eup %3159  ;;  %v1758_v24 = vpop.xlane.xlu1 %1757  ;;  %1819 = vadd.xlane.f32.xlu0 %v3158_v1  ;;  %v1849_v50 = vpack.c.bf16 %v3158_v1, %v3154_v23 }
 0x69c   : > { %v1779_v60 = vsub.f32 %v4554_v2, %v1758_v24  ;;  %1823 = vadd.xlane.f32.xlu1 %v3160_v36  ;;  %3167 = vpow2.f32 %v1795_v55  ;;  %v1803_v62 = vmul.f32 1.442695, %v1778_v46  ;;  %v1850_v39 = vpack.c.bf16 %v3160_v36, %v3156_v38 }
 0x69d   : > { %2857 = vmatprep.mubr.bf16.mxu0 %v1849_v50  ;;  %v1768_v17 = vpop.xlane.xlu0 %1767 }
 0x69e   : > { %v3162_v52 = vpop.eup %3161  ;;  %v1805_v11 = vmul.f32 1.442695, %v1779_v60  ;;  %v1784_v48 = vsub.f32 %v4559_v5, %v1768_v17 }
 0x69f   : > { %v1754_v3 = vpop.xlane.xlu1 %1753  ;;  %v3164_v4 = vpop.eup %3163 }
 0x6a0   : > { %3169 = vpow2.f32 %v1805_v11  ;;  %v1777_v28 = vsub.f32 %v4564_v6, %v1754_v3  ;;  %1829 = vadd.xlane.f32.xlu1 %v3162_v52  ;;  %v1815_v50 = vmul.f32 1.442695, %v1784_v48 }
 0x6a1   : > { %v1764_v35 = vpop.xlane.xlu0 %1763  ;;  %3171 = vpow2.f32 %v1803_v62 }
 0x6a2   : > { %v1801_v23 = vmul.f32 1.442695, %v1777_v28  ;;  %v3166_v13 = vpop.eup %3165  ;;  %v1782_v30 = vsub.f32 %v4569_v34, %v1764_v35 }
 0x6a3   : > { %v1878_v2 = vpop.permute.xlu1 %1877  ;;  %v1852_v34 = vpack.c.bf16 %v3166_v13, %v3162_v52 }
 0x6a4   : > { %3173 = vpow2.f32 %v1801_v23  ;;  %2853 = vmatprep.subr.bf16.mxu0 %v1878_v2  ;;  %2915 = vmatprep.subr.bf16.mxu1 %v1878_v2  ;;  %v1811_v1 = vmul.f32 1.442695, %v1782_v30 }
 0x6a5   : > { %3175 = vpow2.f32 %v1807_v61  ;;  %1825 = vadd.xlane.f32.xlu1 %v3164_v4  ;;  %2854 = vmatpush3.bf16.msra.mxu0 %v1878_v2  ;;  %v1880_v57 = vpop.permute.xlu0 %1879 }
 0x6a6   : > { %2923 = vmatpush3.bf16.msra.mxu1 %v1878_v2  ;;  %2855 = vmatprep.subr.bf16.mxu0 %v1880_v57  ;;  %v3168_v15 = vpop.eup %3167  ;;  %3177 = vpow2.f32 %v1811_v1 }
 0x6a7   : > { %2916 = vmatprep.subr.bf16.mxu1 %v1880_v57  ;;  %v1851_v31 = vpack.c.bf16 %v3168_v15, %v3164_v4  ;;  %3179 = vpow2.f32 %v1815_v50 }
 0x6a9   : > { %1831 = vadd.xlane.f32.xlu1 %v3166_v13  ;;  %2856 = vmatpush3.bf16.msra.mxu0 %v1880_v57 }
 0x6aa   : > { %v3170_v6 = vpop.eup %3169  ;;  %2924 = vmatpush3.bf16.msra.mxu1 %v1880_v57 }
 0x6ab   : > { %1837 = vadd.xlane.f32.xlu0 %v3170_v6  ;;  %v3172_v42 = vpop.eup %3171 }
 0x6ac   : > { %2858 = vmatmul.mubr.bf16.vlgmr.msra.gmra.mrb[64].mxu0 %v1850_v39 }
 0x6ad   : > { %1827 = vadd.xlane.f32.xlu1 %v3168_v15  ;;  %2861 = vmatprep.mubr.bf16.mxu0 %v1851_v31 }
 0x6ae   : > { %v3174_v18 = vpop.eup %3173 }
 0x6af   : > { %v3176_v55 = vpop.eup %3175  ;;  %v1853_v46 = vpack.c.bf16 %v3172_v42, %v3174_v18 }
 0x6b0   : > { %v1854_v24 = vpack.c.bf16 %v3176_v55, %v3170_v6  ;;  %v3178_v38 = vpop.eup %3177 }
 0x6b1   : > { %1833 = vadd.xlane.f32.xlu1 %v3174_v18  ;;  %2865 = vmatprep.mubr.bf16.mxu1 %v1853_v46  ;;  %v3180_v36 = vpop.eup %3179 }
 0x6b2   : > { %2866 = vmatmul.mubr.bf16.vlgmr.msra.gmra.mrb[32].mxu1 %v1854_v24 }
 0x6b4   : > { %2862 = vmatmul.mubr.bf16.gmra.mrb[68].mxu0 %v1852_v34 }
 0x6b5   : > { %1835 = vadd.xlane.f32.xlu1 %v3172_v42 }
 0x6b9   : > { %1839 = vadd.xlane.f32.xlu1 %v3176_v55 }
 0x6bd   : > { %1843 = vadd.xlane.f32.xlu1 %v3178_v38 }
 0x6c1   : > { %1847 = vadd.xlane.f32.xlu1 %v3180_v36 }
 0x6c5   : > { %1351 = vadd.xlane.f32.xlu1 %v4410_v33 }
 0x6c9   : > { %1355 = vadd.xlane.f32.xlu1 %v4406_v32 }
 0x6cd   : > { %1359 = vadd.xlane.f32.xlu1 %v4444_v58  ;;  %v3087_v58 = vld [vmem:[#allocation13 + $0x8] sm:$0xff]  }
 0x6ce   : > { %2873 = vmatprep.subr.bf16.mxu1 %v3087_v58 }
 0x6cf   : > { %2874 = vmatpush3.bf16.msra.mxu1 %v3087_v58 }
 0x6d1   : > { %1363 = vadd.xlane.f32.xlu1 %v4440_v27 }
 0x6d4   : > { %v1762_v5 = vpop.xlane.xlu1 %1761 }
 0x6d5   : > { %v1781_v60 = vsub.f32 %v4578_v49, %v1762_v5  ;;  %1367 = vadd.xlane.f32.xlu1 %v4442_v10 }
 0x6d7   : > { %v1809_v51 = vmul.f32 1.442695, %v1781_v60 }
 0x6d8   : > { %v1766_v17 = vpop.xlane.xlu1 %1765 }
 0x6d9   : > { %3181 = vpow2.f32 %v1809_v51  ;;  %v1783_v52 = vsub.f32 %v4583_v16, %v1766_v17  ;;  %1371 = vadd.xlane.f32.xlu1 %v4462_v43  ;;  %v4610_v43 = vld [vmem:[#allocation13] sm:$0xff]  }
 0x6da   : > { %2891 = vmatprep.subr.bf16.mxu1 %v4610_v43 }
 0x6db   : > { %v1813_v11 = vmul.f32 1.442695, %v1783_v52 }
 0x6dd   : > { %3183 = vpow2.f32 %v1813_v11  ;;  %1375 = vadd.xlane.f32.xlu1 %v4474_v56 }
 0x6e1   : > { %1379 = vadd.xlane.f32.xlu1 %v4472_v53 }
 0x6e3   : > { %v3182_v32 = vpop.eup %3181 }
 0x6e4   : > { %1841 = vadd.xlane.f32.xlu0 %v3182_v32  ;;  %v1855_v33 = vpack.c.bf16 %v3178_v38, %v3182_v32 }
 0x6e6   : > { %2869 = vmatprep.mubr.bf16.mxu1 %v1855_v33 }
 0x6e7   : > { %v3184_v27 = vpop.eup %3183 }
 0x6e8   : > { %1845 = vadd.xlane.f32.xlu0 %v3184_v27  ;;  %v1856_v10 = vpack.c.bf16 %v3180_v36, %v3184_v27 }
 0x6ea   : > { %2870 = vmatmul.mubr.bf16.gmra.mrb[36].mxu1 %v1856_v10 }
 0x6ec   : > { %1349 = vadd.xlane.f32.xlu0 %v4408_v0 }
 0x6f0   : > { %1353 = vadd.xlane.f32.xlu0 %v4412_v20 }
 0x6f4   : > { %1357 = vadd.xlane.f32.xlu0 %v4438_v14 }
 0x6f8   : > { %1361 = vadd.xlane.f32.xlu0 %v4447_v59 }
 0x6fc   : > { %1365 = vadd.xlane.f32.xlu0 %v4451_v7 }
 0x700   : > { %1369 = vadd.xlane.f32.xlu0 %v4460_v41 }
 0x704   : > { %1373 = vadd.xlane.f32.xlu0 %v4469_v29 }
 0x708   : > { %1377 = vadd.xlane.f32.xlu0 %v4478_v44 }
 0x721   : > { %v1818_v0 = vpop.xlane.xlu1 %1817 }
 0x722   : > { %3185 = vrcp.f32 %v1818_v0 }
 0x725   : > { %v1822_v20 = vpop.xlane.xlu1 %1821 }
 0x726   : > { %3187 = vrcp.f32 %v1822_v20 }
 0x728   : > { %v1820_v44 = vpop.xlane.xlu0 %1819 }
 0x729   : > { %v1824_v14 = vpop.xlane.xlu1 %1823  ;;  %3189 = vrcp.f32 %v1820_v44 }
 0x72a   : > { %3191 = vrcp.f32 %v1824_v14 }
 0x72c   : > { %v3186_v13 = vpop.eup %3185 }
 0x72d   : > { %v1830_v53 = vpop.xlane.xlu1 %1829 }
 0x72e   : > { %3193 = vrcp.f32 %v1830_v53 }
 0x730   : > { %v3188_v15 = vpop.eup %3187 }
 0x732   : > { %v1826_v59 = vpop.xlane.xlu1 %1825 }
 0x733   : > { %3195 = vrcp.f32 %v1826_v59  ;;  %v3190_v6 = vpop.eup %3189 }
 0x734   : > { %v3192_v30 = vpop.eup %3191 }
 0x736   : > { %v1832_v56 = vpop.xlane.xlu1 %1831 }
 0x737   : > { %3197 = vrcp.f32 %v1832_v56 }
 0x738   : > { %v1838_v61 = vpop.xlane.xlu0 %1837  ;;  %v3194_v31 = vpop.eup %3193 }
 0x739   : > { %3199 = vrcp.f32 %v1838_v61 }
 0x73a   : > { %v1828_v7 = vpop.xlane.xlu1 %1827 }
 0x73d   : > { %v3196_v18 = vpop.eup %3195 }
 0x73e   : > { %v1834_v49 = vpop.xlane.xlu1 %1833 }
 0x741   : > { %v3198_v1 = vpop.eup %3197 }
 0x742   : > { %v1836_v41 = vpop.xlane.xlu1 %1835 }
 0x743   : > { %v3200_v46 = vpop.eup %3199 }
 0x746   : > { %v1840_v16 = vpop.xlane.xlu1 %1839 }
 0x74a   : > { %v4613_v29 = vpop.xlane.xlu1 %1843 }
 0x74e   : > { %v4615_v62 = vpop.xlane.xlu1 %1847 }
 0x752   : > { %v1352_v3 = vpop.xlane.xlu1 %1351 }
 0x753   : > { %3201 = vrcp.f32 %v1352_v3 }
 0x754   : > { %3203 = vrcp.f32 %v1834_v49 }
 0x756   : > { %v1356_v28 = vpop.xlane.xlu1 %1355 }
 0x75a   : > { %v1360_v23 = vpop.xlane.xlu1 %1359 }
 0x75d   : > { %v3202_v34 = vpop.eup %3201 }
 0x75e   : > { %v1364_v4 = vpop.xlane.xlu1 %1363  ;;  %v3204_v60 = vpop.eup %3203  ;;  %v4625_v20 = vmul.f32 %v3202_v34, %v4500_v45 }
 0x762   : > { %v1368_v42 = vpop.xlane.xlu1 %1367 }
 0x766   : > { %v1372_v11 = vpop.xlane.xlu1 %1371 }
 0x771   : > { %v4617_v35 = vpop.xlane.xlu0 %1841 }
 0x775   : > { %v4619_v2 = vpop.xlane.xlu0 %1845 }
 0x779   : > { %v1350_v57 = vpop.xlane.xlu0 %1349 }
 0x77a   : > { %3205 = vrcp.f32 %v1350_v57 }
 0x77b   : > { %3207 = vrcp.f32 %v1836_v41 }
 0x77c   : > { %3209 = vrcp.f32 %v1356_v28 }
 0x77d   : > { %3211 = vrcp.f32 %v1840_v16  ;;  %v1354_v39 = vpop.xlane.xlu0 %1353 }
 0x77e   : > { %3213 = vrcp.f32 %v1354_v39 }
 0x77f   : > { %3215 = vrcp.f32 %v1828_v7  ;;  %v2859_v48 = vpop.f32.mrb[64].mxu0 }
 0x780   : > { %3217 = vrcp.f32 %v1360_v23  ;;  %v1923_v55 = vpop.f32.mrb[65].mxu0  ;;  %v2004_v38 = vmul.f32 %v3188_v15, %v2859_v48  ;;  %v1376_v48 = vpop.xlane.xlu1 %1375 }
 0x781   : > { %v2860_v24 = vpop.f32.mrb[66].mxu0  ;;  %v1358_v50 = vpop.xlane.xlu0 %1357  ;;  %v2002_v51 = vmul.f32 %v3186_v13, %v1923_v55 }
 0x782   : > { %v2005_v36 = vmul.f32 %v3192_v30, %v2860_v24  ;;  %3219 = vrcp.f32 %v1358_v50  ;;  %v1926_v5 = vpop.f32.mrb[67].mxu0 }
 0x783   : > { %v2003_v17 = vmul.f32 %v3190_v6, %v1926_v5  ;;  %3221 = vrcp.f32 %v1364_v4 }
 0x784   : > { %v3206_v52 = vpop.eup %3205  ;;  %v2019_v32 = vpack.c.bf16 %v2005_v36, %v2004_v38 }
 0x785   : > { %v3208_v33 = vpop.eup %3207  ;;  %v2018_v27 = vpack.c.bf16 %v2003_v17, %v2002_v51  ;;  %v2867_v10 = vpop.f32.mrb[32].mxu1  ;;  %v4622_v0 = vmul.f32 %v3206_v52, %v4496_v47 }
 0x786   : > { %v1362_v58 = vpop.xlane.xlu0 %1361  ;;  %v3210_v14 = vpop.eup %3209  ;;  %v2012_v16 = vmul.f32 %v3200_v46, %v2867_v10 }
 0x787   : > { %3223 = vrcp.f32 %v1362_v58  ;;  %v1955_v53 = vpop.f32.mrb[33].mxu1  ;;  %v3212_v59 = vpop.eup %3211  ;;  %2875 = vmatprep.mubr.msk.bf16.mxu1 %vm1107_vm1, %v2018_v27  ;;  %v1518_v49 = vpack.c.bf16 %v4625_v20, %v4622_v0  ;;  %v4632_v28 = vmul.f32 %v3210_v14, %v4498_v8 }
 0x788   : > { %v2863_v56 = vpop.f32.mrb[68].mxu0  ;;  %v2868_v7 = vpop.f32.mrb[34].mxu1  ;;  %3225 = vrcp.f32 %v1368_v42  ;;  %2876 = vmatmul.mubr.msk.bf16.vlgmr.msra.gmra.mrb[40].mxu1 %vm1107_vm1, %v2019_v32  ;;  %v2010_v23 = vmul.f32 %v3204_v60, %v1955_v53 }
 0x789   : > { %v3214_v41 = vpop.eup %3213  ;;  %v2013_v3 = vmul.f32 %v3212_v59, %v2868_v7  ;;  %v1939_v47 = vpop.f32.mrb[69].mxu0  ;;  %2892 = vmatpush3.bf16.msra.mxu1 %v4610_v43  ;;  %v2008_v6 = vmul.f32 %v3194_v31, %v2863_v56 }
 0x78a   : > { %v1958_v44 = vpop.f32.mrb[35].mxu1  ;;  %v3216_v45 = vpop.eup %3215  ;;  %v4635_v61 = vmul.f32 %v3214_v41, %v4494_v21  ;;  %v2006_v55 = vmul.f32 %v3196_v18, %v1939_v47  ;;  %v4800_v47 = vld [vmem:[#allocation24_spill] sm:$0xff] }
 0x78b   : > { %v2011_v4 = vmul.f32 %v3208_v33, %v1958_v44  ;;  %v2864_v57 = vpop.f32.mrb[70].mxu0  ;;  %v1366_v13 = vpop.xlane.xlu0 %1365  ;;  %v2023_v30 = vpack.c.bf16 %v2013_v3, %v2012_v16  ;;  %v4799_v16 = vld [vmem:[#allocation23_spill] sm:$0xff] }
 0x78c   : > { %v3218_v15 = vpop.eup %3217  ;;  %v2009_v39 = vmul.f32 %v3198_v1, %v2864_v57  ;;  %3227 = vrcp.f32 %v1366_v13  ;;  %v1942_v42 = vpop.f32.mrb[71].mxu0  ;;  %v1519_v8 = vpack.c.bf16 %v4632_v28, %v4635_v61 }
 0x78d   : > { %v2022_v46 = vpack.c.bf16 %v2011_v4, %v2010_v23  ;;  %v2007_v21 = vmul.f32 %v3216_v45, %v1942_v42  ;;  %v3220_v24 = vpop.eup %3219  ;;  %3229 = vrcp.f32 %v1372_v11  ;;  %v1507_v31 = vmul.f32 %v3218_v15, %v4508_v40  ;;  %v1380_v18 = vpop.xlane.xlu1 %1379 }
 0x78e   : > { %v2021_v50 = vpack.c.bf16 %v2009_v39, %v2008_v6  ;;  %v4641_v43 = vmul.f32 %v3220_v24, %v4504_v63  ;;  %v3222_v1 = vpop.eup %3221 }
 0x78f   : > { %v2020_v34 = vpack.c.bf16 %v2007_v21, %v2006_v55  ;;  %v1370_v38 = vpop.xlane.xlu0 %1369  ;;  %v1509_v63 = vmul.f32 %v3222_v1, %v4506_v9 }
 0x790   : > { %3231 = vrcp.f32 %v1370_v38  ;;  %v1520_v36 = vpack.c.bf16 %v1507_v31, %v4641_v43 }
 0x791   : > { %2879 = vmatprep.mubr.msk.bf16.mxu1 %vm1107_vm1, %v2020_v34  ;;  %v3224_v5 = vpop.eup %3223  ;;  %3233 = vrcp.f32 %v1376_v48 }
 0x792   : > { %2880 = vmatmul.mubr.msk.bf16.gmra.mrb[44].mxu1 %vm1107_vm1, %v2021_v50  ;;  %v1508_v51 = vmul.f32 %v3224_v5, %v4502_v54  ;;  %v3226_v17 = vpop.eup %3225 }
 0x793   : > { %2883 = vmatprep.mubr.msk.bf16.mxu1 %vm1107_vm1, %v2022_v46  ;;  %v1374_v60 = vpop.xlane.xlu0 %1373  ;;  %v1511_v33 = vmul.f32 %v3226_v17, %v4516_v19 }
 0x794   : > { %3235 = vrcp.f32 %v1374_v60  ;;  %v1521_v40 = vpack.c.bf16 %v1509_v63, %v1508_v51 }
 0x795   : > { %3237 = vrcp.f32 %v1380_v18 }
 0x796   : > { %v3228_v52 = vpop.eup %3227 }
 0x797   : > { %v1378_v11 = vpop.xlane.xlu0 %1377  ;;  %v1510_v32 = vmul.f32 %v3228_v52, %v4512_v12  ;;  %v3230_v27 = vpop.eup %3229 }
 0x798   : > { %3239 = vrcp.f32 %v1378_v11  ;;  %v1513_v9 = vmul.f32 %v3230_v27, %v4514_v26 }
 0x799   : > { %v1522_v10 = vpack.c.bf16 %v1511_v33, %v1510_v32  ;;  %3241 = vrcp.f32 %v4613_v29 }
 0x79a   : > { %v3232_v58 = vpop.eup %3231  ;;  %2884 = vmatmul.mubr.msk.bf16.gmra.mrb[48].mxu1 %vm1107_vm1, %v2023_v30  ;;  %3243 = vrcp.f32 %v4615_v62  ;;  %v2565_v62 = vld [vmem:[#allocation14] ss:$0 sm:$0xff] }
 0x79b   : > { %v1512_v54 = vmul.f32 %v3232_v58, %v4510_v37  ;;  %v3234_v14 = vpop.eup %3233  ;;  %3245 = vrcp.f32 %v4619_v2 }
 0x79c   : > { %v1515_v7 = vmul.f32 %v3234_v14, %v4524_v25  ;;  %3247 = vrcp.f32 %v4617_v35 }
 0x79d   : > { %v1523_v53 = vpack.c.bf16 %v1513_v9, %v1512_v54 }
 0x79e   : > { %v3236_v59 = vpop.eup %3235 }
 0x79f   : > { %v1514_v56 = vmul.f32 %v3236_v59, %v4520_v22  ;;  %v3238_v12 = vpop.eup %3237 }
 0x7a0   : > { %v1517_v44 = vmul.f32 %v3238_v12, %v4800_v47 }
 0x7a1   : > { %v1524_v41 = vpack.c.bf16 %v1515_v7, %v1514_v56 }
 0x7a2   : > { %v3240_v19 = vpop.eup %3239 }
 0x7a3   : > { %v1516_v3 = vmul.f32 %v3240_v19, %v4799_v16  ;;  %v3242_v37 = vpop.eup %3241 }
 0x7a4   : > { %v3244_v22 = vpop.eup %3243 }
 0x7a5   : > { %v1525_v45 = vpack.c.bf16 %v1517_v44, %v1516_v3  ;;  %v3246_v23 = vpop.eup %3245 }
 0x7a6   : > { %v3248_v57 = vpop.eup %3247 }
 0x7bd   : > { %v2871_v26 = vpop.f32.mrb[36].mxu1 }
 0x7be   : > { %v1971_v25 = vpop.f32.mrb[37].mxu1  ;;  %v2016_v13 = vmul.f32 %v3246_v23, %v2871_v26 }
 0x7bf   : > { %v2872_v4 = vpop.f32.mrb[38].mxu1  ;;  %v2014_v30 = vmul.f32 %v3248_v57, %v1971_v25 }
 0x7c0   : > { %v2017_v15 = vmul.f32 %v3244_v22, %v2872_v4  ;;  %v1974_v6 = vpop.f32.mrb[39].mxu1 }
 0x7c1   : > { %v2015_v39 = vmul.f32 %v3242_v37, %v1974_v6 }
 0x7c2   : > { %v2025_v42 = vpack.c.bf16 %v2017_v15, %v2016_v13 }
 0x7c3   : > { %v2024_v29 = vpack.c.bf16 %v2015_v39, %v2014_v30 }
 0x7c5   : > { %2887 = vmatprep.mubr.msk.bf16.mxu1 %vm1107_vm1, %v2024_v29 }
 0x7c6   : > { %2888 = vmatmul.mubr.msk.bf16.gmra.mrb[52].mxu1 %vm1107_vm1, %v2025_v42 }
 0x7c7   : > { %2893 = vmatprep.mubr.msk.bf16.mxu1 %vm1107_vm1, %v1518_v49 }
 0x7ce   : > { %2894 = vmatmul.mubr.msk.bf16.vlgmr.msra.gmra.mrb[40].mxu1 %vm1107_vm1, %v1519_v8 }
 0x7cf   : > { %2897 = vmatprep.mubr.msk.bf16.mxu1 %vm1107_vm1, %v1520_v36 }
 0x7d6   : > { %2898 = vmatmul.mubr.msk.bf16.gmra.mrb[44].mxu1 %vm1107_vm1, %v1521_v40 }
 0x7d7   : > { %2901 = vmatprep.mubr.msk.bf16.mxu1 %vm1107_vm1, %v1522_v10 }
 0x7de   : > { %2902 = vmatmul.mubr.msk.bf16.gmra.mrb[48].mxu1 %vm1107_vm1, %v1523_v53 }
 0x7df   : > { %2905 = vmatprep.mubr.msk.bf16.mxu1 %vm1107_vm1, %v1524_v41 }
 0x7e6   : > { %2906 = vmatmul.mubr.msk.bf16.gmra.mrb[52].mxu1 %vm1107_vm1, %v1525_v45 }
 0x8a1   : > { %v2895_v35 = vpop.f32.mrb[40].mxu1 }
 0x8a2   : > { %v2292_v2 = vadd.f32 %v2895_v35, %v2565_v62  ;;  %v2220_v0 = vpop.f32.mrb[41].mxu1 }
 0x8a3   : > { %v2290_v20 = vadd.f32 %v2565_v62, %v2220_v0  ;;  %v2896_v49 = vpop.f32.mrb[42].mxu1 }
 0x8a4   : > { %2308 = vst.msk [vmem:[%s4681_s1 + $0x10] sm:$0xff] %vm437_vm0, %v2292_v2  ;;  %v2293_v28 = vadd.f32 %v2896_v49, %v2565_v62  ;;  %v2223_v61 = vpop.f32.mrb[43].mxu1 }
 0x8a5   : > { %2306 = vst.msk [vmem:[%s4681_s1] sm:$0xff] %vm437_vm0, %v2290_v20  ;;  %v2291_v48 = vadd.f32 %v2565_v62, %v2223_v61 }
 0x8a6   : > { %2309 = vst.msk [vmem:[%s4681_s1 + $0x18] sm:$0xff] %vm437_vm0, %v2293_v28 }
 0x8a7   : > { %2307 = vst.msk [vmem:[%s4681_s1 + $0x8] sm:$0xff] %vm437_vm0, %v2291_v48 }
 0x8a9   : > { %v2899_v8 = vpop.f32.mrb[44].mxu1 }
 0x8aa   : > { %v2296_v55 = vadd.f32 %v2899_v8, %v2565_v62  ;;  %v2236_v46 = vpop.f32.mrb[45].mxu1 }
 0x8ab   : > { %v2294_v21 = vadd.f32 %v2565_v62, %v2236_v46  ;;  %v2900_v24 = vpop.f32.mrb[46].mxu1 }
 0x8ac   : > { %2312 = vst.msk [vmem:[%s4681_s1 + $0x30] sm:$0xff] %vm437_vm0, %v2296_v55  ;;  %v2297_v50 = vadd.f32 %v2900_v24, %v2565_v62  ;;  %v2239_v34 = vpop.f32.mrb[47].mxu1 }
 0x8ad   : > { %2310 = vst.msk [vmem:[%s4681_s1 + $0x20] sm:$0xff] %vm437_vm0, %v2294_v21  ;;  %v2295_v38 = vadd.f32 %v2565_v62, %v2239_v34 }
 0x8ae   : > { %2313 = vst.msk [vmem:[%s4681_s1 + $0x38] sm:$0xff] %vm437_vm0, %v2297_v50 }
 0x8af   : > { %2311 = vst.msk [vmem:[%s4681_s1 + $0x28] sm:$0xff] %vm437_vm0, %v2295_v38 }
 0x8b1   : > { %v2903_v43 = vpop.f32.mrb[48].mxu1 }
 0x8b2   : > { %v2300_v31 = vadd.f32 %v2903_v43, %v2565_v62  ;;  %v2252_v1 = vpop.f32.mrb[49].mxu1 }
 0x8b3   : > { %v2298_v36 = vadd.f32 %v2565_v62, %v2252_v1  ;;  %v2904_v5 = vpop.f32.mrb[50].mxu1 }
 0x8b4   : > { %2316 = vst.msk [vmem:[%s4681_s1 + $0x50] sm:$0xff] %vm437_vm0, %v2300_v31  ;;  %v2301_v18 = vadd.f32 %v2904_v5, %v2565_v62  ;;  %v2255_v60 = vpop.f32.mrb[51].mxu1 }
 0x8b5   : > { %2314 = vst.msk [vmem:[%s4681_s1 + $0x40] sm:$0xff] %vm437_vm0, %v2298_v36  ;;  %v2299_v51 = vadd.f32 %v2565_v62, %v2255_v60 }
 0x8b6   : > { %2317 = vst.msk [vmem:[%s4681_s1 + $0x58] sm:$0xff] %vm437_vm0, %v2301_v18 }
 0x8b7   : > { %2315 = vst.msk [vmem:[%s4681_s1 + $0x48] sm:$0xff] %vm437_vm0, %v2299_v51 }
 0x8b9   : > { %v2907_v63 = vpop.f32.mrb[52].mxu1 }
 0x8ba   : > { %v2304_v17 = vadd.f32 %v2907_v63, %v2565_v62  ;;  %v2268_v40 = vpop.f32.mrb[53].mxu1 }
 0x8bb   : > { %v2302_v52 = vadd.f32 %v2565_v62, %v2268_v40  ;;  %v2908_v11 = vpop.f32.mrb[54].mxu1 }
 0x8bc   : > { %2320 = vst.msk [vmem:[%s4681_s1 + $0x70] sm:$0xff] %vm437_vm0, %v2304_v17  ;;  %v2305_v32 = vadd.f32 %v2908_v11, %v2565_v62  ;;  %v2271_v33 = vpop.f32.mrb[55].mxu1 }
 0x8bd   : > { %2318 = vst.msk [vmem:[%s4681_s1 + $0x60] sm:$0xff] %vm437_vm0, %v2302_v52  ;;  %v2303_v27 = vadd.f32 %v2565_v62, %v2271_v33 }
 0x8be   : > { %2321 = vst.msk [vmem:[%s4681_s1 + $0x78] sm:$0xff] %vm437_vm0, %v2305_v32 }
 0x8bf   : > { %2319 = vst.msk [vmem:[%s4681_s1 + $0x68] sm:$0xff] %vm437_vm0, %v2303_v27 }
 0x8c0   : > { %3488 = shalt.err (!%p3485_p11)
}
 0x8c1   : > { %s3489_s22 = scalar_lea.hbm %s4714_s13, 2048  ;;  %s3493_s1 = scalar_lea.hbm %s4774_s8, 4096 }
 0x8c2   : > { %p3490_p12 = scmp.ne.s32.totalorder %s4714_s13, %s3489_s22  ;;  %p3494_p9 = scmp.lt.u32.totalorder %s4714_s13, %s4774_s8 }
 0x8c3   : > { %p3495_p7 = scmp.lt.u32.totalorder %s3493_s1, %s3489_s22  ;;  %p3497_p4 = scmp.lt.u32.totalorder %s3489_s22, %s4714_s13 }
 0x8c4   : > { %p3491_p0 = pnand %p3490_p12, %p4801_p13 }
 0x8c5   : > { %p3496_p10 = por %p3495_p7, %p3494_p9 }
 0x8c6   : > { %p3492_p5 = pneg %p3491_p0 }
 0x8c7   : > { %p3498_p1 = por %p3497_p4, %p3496_p10 }
 0x8c9   : > { %p3499_p3 = pnand %p3498_p1, %p3492_p5 }
 0x8cb   : > { %3502 = shalt.err (!%p3499_p3)
}
 0x8cc   : > { %s3573_s23 = smov 128   ;;  %s3574_s25 = smov 8  }
 0x8cd   : > { %2987 = dma.vmem_to_hbm [thread:$0]  (%p4801_p13), %s4716_s9, 2048, %s4714_s13, %s2323_s11, %s3573_s23, %s3573_s23, %s3574_s25  }
 0x8ce PF: > { %s2351_s20 = sand.u32 1, %s3545_s27   ;;  %p4802_p2 = scmp.ne.s32.totalorder %s4786_s24, 0 }
 0x8cf   : > { %p4803_p8 = scmp.ge.s32.totalorder %s3557_s30, 2  ;;  %s2352_s14 = scalar_lea.sflag [#allocation4], %s2351_s20 }
 0x8d1   : > { %p3016_p6 = pnand %p4803_p8, %p4802_p2 }
 0x8d3   : > { %3540 = dma.done.wait (!%p3016_p6), %s2352_s14, 2048  }
 0x8d4   : > { %3542 = vsyncadd (!%p3016_p6), %s2352_s14, 4294965248  ;;  %p25_p11 = scmp.ge.s32.totalorder %s3827_s15, 4   ;;  %s4804_s27 = smov %s3549_s28 }
 0x8d5   : > { %s4805_s28 = smov %s3553_s29  ;;  %s4806_s29 = smov %s3839_s16 }
 0x8d6   : > { %s4807_s30 = smov %s3827_s15  ;;  %27 = sbr.rel (!%p25_p11) target bundleno = 11 (0xb), region = 126 }
 0x8dd   :  { %2357 = vsyncpa [#allocation3], 1 }
 0x8de   :  { %2359 = vsyncpa [#allocation3 + $0x1], 1 }
 0x8df   :  { %2360 = vsyncpa [#allocation6], 1 }
 0x8e0   :  { %2361 = vsyncpa [#allocation9], 1 }
 0x8e1   :  { %2362 = vsyncpa [#allocation12], 1 }
 0x8e2   :  { %2363 = vsyncpa [#allocation15], 1 }
 0x8e3   :  { %2364 = vsyncpa [#allocation4], 1 }
 0x8e4   :  { %2366 = vsyncpa [#allocation4 + $0x1], 1 }

// kernel: tpu_custom_call.1
= control target key start
LH: loop header
LB: loop body
LE: loop exit
PB: predicated region body
PF: predicated region fallthrough
CT: control target
= control target key end

     0   :  { %s4766_s0 = inlined_call_operand.hbm [shape: f32[2,128,32], index: 0, kind: input, shape index: {}]   ;;  %s4767_s1 = inlined_call_operand.hbm [shape: f32[1,32], index: 1, kind: input, shape index: {}]   ;;  %s4768_s2 = inlined_call_operand.hbm [shape: f32[1,32], index: 2, kind: input, shape index: {}]   ;;  %s4769_s3 = inlined_call_operand.hbm [shape: bf16[32,32], index: 3, kind: input, shape index: {}]   ;;  %s4770_s4 = inlined_call_operand.hbm [shape: bf16[32,32], index: 4, kind: input, shape index: {}]   ;;  %s4771_s5 = inlined_call_operand.hbm [shape: bf16[32,32], index: 5, kind: input, shape index: {}]   ;;  %s4772_s6 = inlined_call_operand.hbm [shape: bf16[2,16,32], index: 6, kind: input, shape index: {}]   ;;  %s4773_s7 = inlined_call_operand.hbm [shape: f32[1,32], index: 7, kind: input, shape index: {}]   ;;  %s4774_s8 = inlined_call_operand.hbm [shape: f32[2,128,32], index: 8, kind: output, shape index: {}]  }
   0x1   :  { %4778 = sst [smem:[#allocation25_spill]] %s4767_s1 }
   0x2   :  { %13 = vsyncpa [#allocation3], 0 }
   0x3   :  { %15 = vsyncpa [#allocation3 + $0x1], 0 }
   0x4   :  { %16 = vsyncpa [#allocation6], 0 }
   0x5   :  { %17 = vsyncpa [#allocation9], 0 }
   0x6   :  { %18 = vsyncpa [#allocation12], 0 }
   0x7   :  { %19 = vsyncpa [#allocation15], 0 }
   0x8   :  { %20 = vsyncpa [#allocation4], 0 }
   0x9   :  { %22 = vsyncpa [#allocation4 + $0x1], 0  ;;  %s3620_s27 = smov 0   ;;  %s3622_s28 = smov 0  }
   0xa   :  { %s3624_s29 = smov 0   ;;  %s3626_s30 = smov 0  }
   0xb LB: > { %s3559_s9 = smov [#allocation5]   ;;  %s3641_s11 = sadd.s32 4294967295, %s3557_s30   ;;  %s3557_s30 = sphi %s3626_s30, %s4807_s30   ;;  %s3553_s29 = sphi %s3624_s29, %s4806_s29   ;;  %s3549_s28 = sphi %s3622_s28, %s4805_s28   ;;  %s3545_s27 = sphi %s3620_s27, %s4804_s27  }
   0xc   : > { %s245_s10 = sshll.u32 %s3559_s9, 4  ;;  %p2477_p0 = scmp.ge.s32.totalorder %s3557_s30, 1  ;;  %s3646_s10 = int_to_ptr.vmem [resolvable:$true] %s245_s10 }
   0xd   : > { %p4775_p1 = scmp.eq.s32.totalorder %s3641_s11, 0  ;;  %p232_p2 = scmp.lt.s32.totalorder %s3557_s30, 3 }
   0xe   : > { %s3560_s13 = smov [#allocation8]   ;;  %s3561_s16 = smov [#allocation11]  }
   0xf   : > { %p3648_p3 = pnand %p2477_p0, %p232_p2  ;;  %s266_s14 = sshll.u32 %s3560_s13, 4  ;;  %s3655_s14 = int_to_ptr.vmem [resolvable:$true] %s266_s14 }
  0x10   : > { %s292_s17 = sshll.u32 %s3561_s16, 4  ;;  %s4781_s1 = sld [smem:[#allocation25_spill]]  ;;  %s3663_s17 = int_to_ptr.vmem [resolvable:$true] %s292_s17 }
  0x11   : > { %s4779_s12 = scalar_select %p3648_p3, 1, 0 }
  0x12   : > { %p2989_p5 = pneg %p3648_p3 }
  0x14   : > { %p3659_p6 = pnand %p2989_p5, %p4775_p1 }
  0x16   : > { %s3249_s20 = scalar_lea.hbm %s4781_s1, 16  ;;  %p3673_p8 = pneg %p3659_p6 }
  0x17   : > { %p3250_p7 = scmp.ne.s32.totalorder %s4781_s1, %s3249_s20  ;;  %p3256_p11 = scmp.lt.u32.totalorder %s3249_s20, %s4781_s1 }
  0x19   : > { %p3252_p9 = pnand %p3673_p8, %p3250_p7 }
  0x1b   : > { %p3253_p10 = pneg %p3252_p9 }
  0x1d   : > { %p3258_p12 = pnand %p3256_p11, %p3253_p10 }
  0x1f   : > { %3261 = shalt.err (!%p3258_p12)
}
  0x20   : > { %s3262_s26 = scalar_lea.vmem %s3646_s10, 16  ;;  %s3269_s9 = scalar_lea.vmem %s3646_s10, 32 }
  0x21   : > { %p3263_p13 = scmp.ne.s32.totalorder %s3646_s10, %s3262_s26  ;;  %p3270_p5 = scmp.lt.s32.totalorder %s3646_s10, %s3646_s10 }
  0x22   : > { %p3271_p7 = scmp.lt.s32.totalorder %s3269_s9, %s3262_s26 }
  0x23   : > { %p3265_p0 = pnand %p3263_p13, %p3673_p8 }
  0x24   : > { %p3272_p9 = por %p3271_p7, %p3270_p5 }
  0x25   : > { %p3266_p2 = pneg %p3265_p0 }
  0x27   : > { %p3273_p4 = pnand %p3272_p9, %p3266_p2 }
  0x29   : > { %3276 = shalt.err (!%p3273_p4)
}
  0x2a   : > { %2992 = dma.hbm_to_vmem [thread:$0]  (!%p3659_p6), %s4781_s1, 16, %s3646_s10, [#allocation6]  }
  0x2b   : > { %s3277_s20 = scalar_lea.hbm %s4769_s3, 256 }
  0x2c   : > { %p3278_p10 = scmp.ne.s32.totalorder %s4769_s3, %s3277_s20  ;;  %p3284_p4 = scmp.lt.u32.totalorder %s3277_s20, %s4769_s3 }
  0x2e   : > { %p3280_p11 = pnand %p3278_p10, %p3673_p8 }
  0x30   : > { %p3281_p12 = pneg %p3280_p11 }
  0x32   : > { %p3286_p13 = pnand %p3284_p4, %p3281_p12 }
  0x34   : > { %3289 = shalt.err (!%p3286_p13)
}
  0x35   : > { %s3290_s10 = scalar_lea.vmem %s3655_s14, 256  ;;  %p3298_p7 = scmp.lt.s32.totalorder %s3655_s14, %s3655_s14 }
  0x36   : > { %p3291_p0 = scmp.ne.s32.totalorder %s3655_s14, %s3290_s10  ;;  %p3299_p9 = scmp.lt.s32.totalorder %s3290_s10, %s3290_s10 }
  0x38   : > { %p3293_p2 = pnand %p3291_p0, %p3673_p8  ;;  %p3300_p10 = por %p3299_p9, %p3298_p7 }
  0x3a   : > { %p3294_p5 = pneg %p3293_p2 }
  0x3c   : > { %p3301_p11 = pnand %p3300_p10, %p3294_p5 }
  0x3e   : > { %3304 = shalt.err (!%p3301_p11)
}
  0x3f   : > { %s3562_s26 = smov 64   ;;  %s3563_s9 = smov 4  }
  0x40   : > { %2998 = dma.hbm_to_vmem [thread:$0]  (!%p3659_p6), %s4769_s3, 256, %s3655_s14, [#allocation9], %s3562_s26, %s3562_s26, %s3563_s9  }
  0x41   : > { %s3305_s20 = scalar_lea.hbm %s4771_s5, 256 }
  0x42   : > { %p3306_p12 = scmp.ne.s32.totalorder %s4771_s5, %s3305_s20  ;;  %p3312_p0 = scmp.lt.u32.totalorder %s3305_s20, %s4771_s5 }
  0x44   : > { %p3308_p4 = pnand %p3306_p12, %p3673_p8 }
  0x46   : > { %p3309_p13 = pneg %p3308_p4 }
  0x48   : > { %p3314_p2 = pnand %p3312_p0, %p3309_p13 }
  0x4a   : > { %3317 = shalt.err (!%p3314_p2)
}
  0x4b   : > { %s3318_s14 = scalar_lea.vmem %s3663_s17, 256  ;;  %p3326_p10 = scmp.lt.s32.totalorder %s3663_s17, %s3663_s17 }
  0x4c   : > { %p3319_p5 = scmp.ne.s32.totalorder %s3663_s17, %s3318_s14  ;;  %p3327_p11 = scmp.lt.s32.totalorder %s3318_s14, %s3318_s14 }
  0x4e   : > { %p3321_p7 = pnand %p3319_p5, %p3673_p8  ;;  %p3328_p12 = por %p3327_p11, %p3326_p10 }
  0x50   : > { %p3322_p9 = pneg %p3321_p7 }
  0x52   : > { %p3329_p4 = pnand %p3328_p12, %p3322_p9 }
  0x54   : > { %3332 = shalt.err (!%p3329_p4)
}
  0x55   : > { %3004 = dma.hbm_to_vmem [thread:$0]  (!%p3659_p6), %s4771_s5, 256, %s3663_s17, [#allocation12], %s3562_s26, %s3562_s26, %s3563_s9  }
  0x56   : > { %s3564_s16 = smov [#allocation7]   ;;  %s3565_s19 = smov [#allocation10]  }
  0x57   : > { %s256_s18 = sshll.u32 %s3564_s16, 4  ;;  %s279_s20 = sshll.u32 %s3565_s19, 4  ;;  %s257_s18 = int_to_ptr.vmem [resolvable:$true] %s256_s18  ;;  %s280_s20 = int_to_ptr.vmem [resolvable:$true] %s279_s20 }
  0x58   : > { %s3333_s24 = scalar_lea.hbm %s4768_s2, 16 }
  0x59   : > { %p3334_p13 = scmp.ne.s32.totalorder %s4768_s2, %s3333_s24  ;;  %p3340_p5 = scmp.lt.u32.totalorder %s3333_s24, %s4768_s2 }
  0x5b   : > { %p3336_p0 = pnand %p3334_p13, %p3673_p8 }
  0x5d   : > { %p3337_p2 = pneg %p3336_p0 }
  0x5f   : > { %p3342_p7 = pnand %p3340_p5, %p3337_p2 }
  0x61   : > { %3345 = shalt.err (!%p3342_p7)
}
  0x62   : > { %s3346_s17 = scalar_lea.vmem %s257_s18, 16  ;;  %s3353_s13 = scalar_lea.vmem %s257_s18, 32 }
  0x63   : > { %p3347_p9 = scmp.ne.s32.totalorder %s257_s18, %s3346_s17  ;;  %p3354_p12 = scmp.lt.s32.totalorder %s257_s18, %s257_s18 }
  0x64   : > { %p3355_p4 = scmp.lt.s32.totalorder %s3353_s13, %s3346_s17 }
  0x65   : > { %p3349_p10 = pnand %p3347_p9, %p3673_p8 }
  0x66   : > { %p3356_p1 = por %p3355_p4, %p3354_p12 }
  0x67   : > { %p3350_p11 = pneg %p3349_p10 }
  0x69   : > { %p3357_p3 = pnand %p3356_p1, %p3350_p11 }
  0x6b   : > { %3360 = shalt.err (!%p3357_p3)
}
  0x6c   : > { %2995 = dma.hbm_to_vmem [thread:$0]  (!%p3659_p6), %s4768_s2, 16, %s257_s18, [#allocation6]  }
  0x6d   : > { %s3361_s22 = scalar_lea.hbm %s4770_s4, 256 }
  0x6e   : > { %p3362_p13 = scmp.ne.s32.totalorder %s4770_s4, %s3361_s22  ;;  %p3368_p3 = scmp.lt.u32.totalorder %s3361_s22, %s4770_s4 }
  0x70   : > { %p3364_p0 = pnand %p3362_p13, %p3673_p8 }
  0x72   : > { %p3365_p1 = pneg %p3364_p0 }
  0x74   : > { %p3370_p2 = pnand %p3368_p3, %p3365_p1 }
  0x76   : > { %3373 = shalt.err (!%p3370_p2)
}
  0x77   : > { %s3374_s17 = scalar_lea.vmem %s280_s20, 256  ;;  %p3382_p10 = scmp.lt.s32.totalorder %s280_s20, %s280_s20 }
  0x78   : > { %p3375_p5 = scmp.ne.s32.totalorder %s280_s20, %s3374_s17  ;;  %p3383_p11 = scmp.lt.s32.totalorder %s3374_s17, %s3374_s17 }
  0x7a   : > { %p3377_p7 = pnand %p3375_p5, %p3673_p8  ;;  %p3384_p12 = por %p3383_p11, %p3382_p10 }
  0x7c   : > { %p3378_p9 = pneg %p3377_p7 }
  0x7e   : > { %p3385_p4 = pnand %p3384_p12, %p3378_p9 }
  0x80   : > { %3388 = shalt.err (!%p3385_p4)
}
  0x81   : > { %3001 = dma.hbm_to_vmem [thread:$0]  (!%p3659_p6), %s4770_s4, 256, %s280_s20, [#allocation9], %s3562_s26, %s3562_s26, %s3563_s9  }
  0x82   : > { %s3566_s16 = smov [#allocation13]   ;;  %s3567_s1 = smov [#allocation14]  }
  0x83   : > { %s305_s19 = sshll.u32 %s3566_s16, 4  ;;  %s319_s21 = sshll.u32 %s3567_s1, 4  ;;  %s306_s19 = int_to_ptr.vmem [resolvable:$true] %s305_s19  ;;  %s320_s21 = int_to_ptr.vmem [resolvable:$true] %s319_s21 }
  0x84   : > { %s3389_s25 = scalar_lea.hbm %s4772_s6, 256 }
  0x85   : > { %p3390_p13 = scmp.ne.s32.totalorder %s4772_s6, %s3389_s25  ;;  %p3396_p3 = scmp.lt.u32.totalorder %s3389_s25, %s4772_s6 }
  0x87   : > { %p3392_p0 = pnand %p3390_p13, %p3673_p8 }
  0x89   : > { %p3393_p1 = pneg %p3392_p0 }
  0x8b   : > { %p3398_p2 = pnand %p3396_p3, %p3393_p1 }
  0x8d   : > { %3401 = shalt.err (!%p3398_p2)
}
  0x8e   : > { %s3402_s20 = scalar_lea.vmem %s306_s19, 256  ;;  %p3410_p10 = scmp.lt.s32.totalorder %s306_s19, %s306_s19 }
  0x8f   : > { %p3403_p5 = scmp.ne.s32.totalorder %s306_s19, %s3402_s20  ;;  %p3411_p11 = scmp.lt.s32.totalorder %s3402_s20, %s3402_s20 }
  0x91   : > { %p3405_p7 = pnand %p3403_p5, %p3673_p8  ;;  %p3412_p12 = por %p3411_p11, %p3410_p10 }
  0x93   : > { %p3406_p9 = pneg %p3405_p7 }
  0x95   : > { %p3413_p4 = pnand %p3412_p12, %p3406_p9 }
  0x97   : > { %3416 = shalt.err (!%p3413_p4)
}
  0x98   : > { %3007 = dma.hbm_to_vmem [thread:$0]  (!%p3659_p6), %s4772_s6, 256, %s306_s19, [#allocation12], %s3562_s26, %s3562_s26, %s3563_s9  }
  0x99   : > { %s3417_s24 = scalar_lea.hbm %s4773_s7, 16 }
  0x9a   : > { %p3418_p13 = scmp.ne.s32.totalorder %s4773_s7, %s3417_s24  ;;  %p3424_p3 = scmp.lt.u32.totalorder %s3417_s24, %s4773_s7 }
  0x9c   : > { %p3420_p0 = pnand %p3418_p13, %p3673_p8 }
  0x9e   : > { %p3421_p1 = pneg %p3420_p0 }
  0xa0   : > { %p3426_p2 = pnand %p3424_p3, %p3421_p1 }
  0xa2   : > { %3429 = shalt.err (!%p3426_p2)
}
  0xa3   : > { %s3430_s18 = scalar_lea.vmem %s320_s21, 16  ;;  %s3437_s26 = scalar_lea.vmem %s320_s21, 32 }
  0xa4   : > { %p3431_p5 = scmp.ne.s32.totalorder %s320_s21, %s3430_s18  ;;  %p3438_p10 = scmp.lt.s32.totalorder %s320_s21, %s320_s21 }
  0xa5   : > { %p3439_p11 = scmp.lt.s32.totalorder %s3437_s26, %s3430_s18 }
  0xa6   : > { %p3433_p7 = pnand %p3431_p5, %p3673_p8 }
  0xa7   : > { %p3440_p12 = por %p3439_p11, %p3438_p10 }
  0xa8   : > { %p3434_p9 = pneg %p3433_p7 }
  0xaa   : > { %p3441_p4 = pnand %p3440_p12, %p3434_p9 }
  0xac   : > { %3444 = shalt.err (!%p3441_p4)
}
  0xad   : > { %3010 = dma.hbm_to_vmem [thread:$0]  (!%p3659_p6), %s4773_s7, 16, %s320_s21, [#allocation15]  }
  0xae   : > { %s2476_s23 = sadd.s32 4294967294, %s3557_s30   ;;  %s3827_s15 = sadd.s32 1, %s3557_s30  }
  0xaf   : > { %s35_s20 = sadd.s32 1, %s3553_s29  ;;  %s32_s13 = ssub.s32 %s3557_s30, %s3827_s15 }
  0xb0   : > { %p42_p8 = scmp.ne.s32.totalorder %s3553_s29, %s3549_s28  ;;  %p33_p13 = scmp.eq.s32.totalorder %s32_s13, 0 }
  0xb1   : > { %p43_p0 = scmp.eq.s32.totalorder %s3557_s30, 0  ;;  %p48_p1 = scmp.ne.s32.totalorder %s3549_s28, %s3545_s27 }
  0xb2   : > { %p219_p3 = scmp.eq.s32.totalorder %s3641_s11, 1  ;;  %p4783_p5 = scmp.eq.s32.totalorder %s3641_s11, 0 }
  0xb3   : > { %s3839_s16 = scalar_select %p33_p13, %s3553_s29, %s35_s20  }
  0xb4   : > { %p44_p2 = por %p43_p0, %p42_p8  ;;  %p3843_p7 = por %p4783_p5, %p48_p1 }
  0xb5   : > { %p3847_p6 = por %p219_p3, %p42_p8  ;;  %p225_p9 = scmp.eq.s32.totalorder %s2476_s23, 1 }
  0xb6   : > { %p3026_p10 = scmp.lt.s32.totalorder %s3557_s30, 2  ;;  %s330_s22 = sand.u32 1, %s3553_s29  }
  0xb7   : > { %s4785_s21 = scalar_select %p3847_p6, 1, 0 }
  0xb8   : > { %p3853_p11 = por %p225_p9, %p48_p1  ;;  %s2486_s25 = sshll.u32 %s330_s22, 7 }
  0xb9   : > { %s2571_s14 = sshll.u32 %s3557_s30, 11  ;;  %s334_s26 = scalar_lea.vmem [#allocation2], %s2486_s25 }
  0xba   : > { %s4786_s24 = scalar_select %p3853_p11, 1, 0 }
  0xbb   : > { %s3861_s18 = scalar_lea.hbm %s4766_s0, %s2571_s14  ;;  %s341_s9 = sshll.u32 %s334_s26, 4  ;;  %s3867_s9 = int_to_ptr.vmem [resolvable:$true] %s341_s9 }
  0xbc   : > { %p3863_p12 = pnand %p3026_p10, %p44_p2  ;;  %s3869_s23 = scalar_lea.sflag [#allocation3], %s330_s22 }
  0xbd   : > { %s3445_s20 = scalar_lea.hbm %s3861_s18, 2048  ;;  %s3450_s14 = scalar_lea.hbm %s4766_s0, 4096 }
  0xbe   : > { %p3446_p4 = scmp.ne.s32.totalorder %s3861_s18, %s3445_s20  ;;  %p3447_p8 = pneg %p3863_p12 }
  0xbf   : > { %p3451_p1 = scmp.lt.u32.totalorder %s3861_s18, %s4766_s0  ;;  %p3452_p3 = scmp.lt.u32.totalorder %s3450_s14, %s3445_s20 }
  0xc0   : > { %p3448_p13 = pnand %p3447_p8, %p3446_p4  ;;  %p3454_p5 = scmp.lt.u32.totalorder %s3445_s20, %s3861_s18 }
  0xc1   : > { %p3453_p2 = por %p3452_p3, %p3451_p1 }
  0xc2   : > { %p3449_p0 = pneg %p3448_p13 }
  0xc3   : > { %p3455_p9 = por %p3454_p5, %p3453_p2 }
  0xc5   : > { %p3456_p10 = pnand %p3455_p9, %p3449_p0 }
  0xc7   : > { %3459 = shalt.err (!%p3456_p10)
}
  0xc8   : > { %s3460_s22 = scalar_lea.vmem %s3867_s9, 2048  ;;  %s3568_s26 = smov [#allocation2]  }
  0xc9   : > { %p3461_p4 = scmp.ne.s32.totalorder %s3867_s9, %s3460_s22  ;;  %s3465_s13 = sshll.u32 %s3568_s26, 4  ;;  %s3466_s13 = int_to_ptr.vmem [resolvable:$false] %s3465_s13 }
  0xca   : > { %s3467_s25 = scalar_lea.vmem %s3466_s13, 4096  ;;  %p3468_p6 = scmp.lt.s32.totalorder %s3867_s9, %s3466_s13 }
  0xcb   : > { %p3463_p13 = pnand %p3461_p4, %p3447_p8  ;;  %p3469_p1 = scmp.lt.s32.totalorder %s3467_s25, %s3460_s22 }
  0xcd   : > { %p3464_p11 = pneg %p3463_p13  ;;  %p3470_p3 = por %p3469_p1, %p3468_p6 }
  0xcf   : > { %p3471_p2 = pnand %p3470_p3, %p3464_p11 }
  0xd1   : > { %3474 = shalt.err (!%p3471_p2)
}
  0xd2   : > { %s3569_s20 = smov 128   ;;  %s3570_s14 = smov 8  }
  0xd3   : > { %3014 = dma.hbm_to_vmem [thread:$0]  (!%p3863_p12), %s3861_s18, 2048, %s3867_s9, %s3869_s23, %s3569_s20, %s3569_s20, %s3570_s14  }
  0xd4   : > { %p4788_p8 = scmp.ne.s32.totalorder %s4779_s12, 0 }
  0xd6   : > { %353 = sbr.rel (%p4788_p8) target bundleno = 2254 (0x8ce), region = 52 }
  0xdd   : > { %s3900_s10 = sand.u32 1, %s3549_s28  }
  0xde   : > { %s2490_s17 = sshll.u32 %s3900_s10, 7  ;;  %s356_s22 = scalar_lea.sflag [#allocation3], %s3900_s10 }
  0xdf   : > { %s3906_s26 = scalar_lea.vmem [#allocation2], %s2490_s17 }
  0xe0   : > { %3520 = dma.done.wait (%p3843_p7), %s356_s22, 2048  }
  0xe1   : > { %3522 = vsyncadd (%p3843_p7), %s356_s22, 4294965248  ;;  %p4789_p6 = scmp.eq.s32.totalorder %s3641_s11, 0 }
  0xe3   : > { %3524 = dma.done.wait (%p4789_p6), [#allocation6], 32   ;;  %p4790_p11 = pmov %p4789_p6 }
  0xe4   : > { %p4791_p12 = pmov %p4789_p6 }
  0xe5   : > { %3526 = vsyncadd (%p4790_p11), [#allocation6], 4294967264 }
  0xe6   : > { %3528 = dma.done.wait (%p4791_p12), [#allocation9], 512   ;;  %p4792_p0 = pmov %p4789_p6 }
  0xe8   : > { %3530 = vsyncadd (%p4792_p0), [#allocation9], 4294966784  ;;  %p4793_p5 = pmov %p4792_p0 }
  0xe9   : > { %p4794_p9 = pmov %p4792_p0 }
  0xea   : > { %3532 = dma.done.wait (%p4793_p5), [#allocation12], 512  }
  0xeb   : > { %3534 = vsyncadd (%p4794_p9), [#allocation12], 4294966784  ;;  %p4795_p7 = pmov %p4792_p0 }
  0xec   : > { %p4796_p10 = pmov %p4792_p0 }
  0xed   : > { %3536 = dma.done.wait (%p4795_p7), [#allocation15], 16  }
  0xee   : > { %3538 = vsyncadd (%p4796_p10), [#allocation15], 4294967280  ;;  %vm437_vm0 = vcmask 261120   ;;  %v421_v0 = vld [vmem:[%s3906_s26] sm:$0xff]  ;;  %v423_v1 = vld [vmem:[%s3906_s26 + $0x10] sm:$0xff]  ;;  %vm1107_vm1 = vcmask 130048  }
  0xef   : > { %v422_v2 = vld [vmem:[%s3906_s26 + $0x8] sm:$0xff]  ;;  %v438_v3 = vsel %vm437_vm0, %v421_v0, 0.0  ;;  %v444_v4 = vsel %vm437_vm0, %v423_v1, 0.0  ;;  %v424_v5 = vld [vmem:[%s3906_s26 + $0x18] sm:$0xff]  ;;  %v3935_v6 = vld [vmem:[%s3906_s26 + $0x20] sm:$0xff]  ;;  %s3571_s12 = smov 112  }
  0xf0   : > { %439 = vadd.xlane.f32.xlu0 %v438_v3  ;;  %445 = vadd.xlane.f32.xlu1 %v444_v4  ;;  %v441_v7 = vsel %vm437_vm0, %v422_v2, 0.0  ;;  %v447_v8 = vsel %vm437_vm0, %v424_v5, 0.0  ;;  %v426_v9 = vld [vmem:[%s3906_s26 + $0x28] sm:$0xff]  ;;  %v450_v10 = vsel %vm437_vm0, %v3935_v6, 0.0  ;;  %v3944_v12 = vld [vmem:[%s3906_s26 + $0x30] sm:$0xff]  ;;  %v3947_v13 = vld [vmem:[%s3906_s26 + $0x38] sm:$0xff] }
  0xf1   : > { %v453_v11 = vsel %vm437_vm0, %v426_v9, 0.0  ;;  %v456_v14 = vsel %vm437_vm0, %v3944_v12, 0.0  ;;  %v459_v15 = vsel %vm437_vm0, %v3947_v13, 0.0  ;;  %v3954_v16 = vld [vmem:[%s3906_s26 + $0x40] sm:$0xff]  ;;  %v3957_v17 = vld [vmem:[%s3906_s26 + $0x48] sm:$0xff]  ;;  %v3964_v20 = vld [vmem:[%s3906_s26 + $0x50] sm:$0xff] }
  0xf2   : > { %v462_v18 = vsel %vm437_vm0, %v3954_v16, 0.0  ;;  %v465_v19 = vsel %vm437_vm0, %v3957_v17, 0.0  ;;  %v3967_v21 = vld [vmem:[%s3906_s26 + $0x58] sm:$0xff]  ;;  %v468_v22 = vsel %vm437_vm0, %v3964_v20, 0.0  ;;  %v3974_v24 = vld [vmem:[%s3906_s26 + $0x60] sm:$0xff]  ;;  %v3977_v25 = vld [vmem:[%s3906_s26 + $0x68] sm:$0xff] }
  0xf3   : > { %v471_v23 = vsel %vm437_vm0, %v3967_v21, 0.0  ;;  %v474_v26 = vsel %vm437_vm0, %v3974_v24, 0.0  ;;  %v477_v27 = vsel %vm437_vm0, %v3977_v25, 0.0  ;;  %v3984_v28 = vld [vmem:[%s3906_s26 + $0x70] sm:$0xff]  ;;  %v3987_v29 = vld [vmem:[%s3906_s26 + $0x78] sm:$0xff]  ;;  %s4681_s1 = scalar_lea.vmem [#allocation16], %s2490_s17 }
  0xf4   : > { %442 = vadd.xlane.f32.xlu0 %v441_v7  ;;  %448 = vadd.xlane.f32.xlu1 %v447_v8  ;;  %v480_v30 = vsel %vm437_vm0, %v3984_v28, 0.0  ;;  %v483_v31 = vsel %vm437_vm0, %v3987_v29, 0.0  ;;  %s2572_s18 = sshll.u32 %s3641_s11, 11  ;;  %s2336_s9 = sshll.u32 %s4681_s1, 4  ;;  %s4716_s9 = int_to_ptr.vmem [resolvable:$true] %s2336_s9 }
  0xf5   : > { %s4714_s13 = scalar_lea.hbm %s4774_s8, %s2572_s18  ;;  %s2323_s11 = scalar_lea.sflag [#allocation4], %s3900_s10 }
  0xf6   : > { %s3475_s25 = scalar_lea.vmem %s4716_s9, 2048  ;;  %p4801_p13 = scmp.ne.s32.totalorder %s4785_s21, 0 }
  0xf7   : > { %p3476_p4 = scmp.ne.s32.totalorder %s4716_s9, %s3475_s25  ;;  %s3572_s20 = smov [#allocation16]  }
  0xf8   : > { %451 = vadd.xlane.f32.xlu0 %v450_v10  ;;  %454 = vadd.xlane.f32.xlu1 %v453_v11  ;;  %s3479_s14 = sshll.u32 %s3572_s20, 4  ;;  %s3480_s14 = int_to_ptr.vmem [resolvable:$false] %s3479_s14 }
  0xf9   : > { %p3477_p1 = pnand %p3476_p4, %p4801_p13  ;;  %s3481_s17 = scalar_lea.vmem %s3480_s14, 4096 }
  0xfa   : > { %p3482_p2 = scmp.lt.s32.totalorder %s4716_s9, %s3480_s14  ;;  %p3483_p8 = scmp.lt.s32.totalorder %s3481_s17, %s3475_s25 }
  0xfb   : > { %p3478_p3 = pneg %p3477_p1 }
  0xfc   : > { %457 = vadd.xlane.f32.xlu0 %v456_v14  ;;  %460 = vadd.xlane.f32.xlu1 %v459_v15  ;;  %p3484_p6 = por %p3483_p8, %p3482_p2 }
  0xfe   : > { %p3485_p11 = pnand %p3484_p6, %p3478_p3 }
 0x100   : > { %463 = vadd.xlane.f32.xlu0 %v462_v18  ;;  %466 = vadd.xlane.f32.xlu1 %v465_v19 }
 0x104   : > { %469 = vadd.xlane.f32.xlu0 %v468_v22  ;;  %472 = vadd.xlane.f32.xlu1 %v471_v23 }
 0x108   : > { %475 = vadd.xlane.f32.xlu0 %v474_v26  ;;  %478 = vadd.xlane.f32.xlu1 %v477_v27 }
 0x10c   : > { %481 = vadd.xlane.f32.xlu0 %v480_v30  ;;  %484 = vadd.xlane.f32.xlu1 %v483_v31 }
 0x17d   : > { %v440_v32 = vpop.xlane.xlu0 %439  ;;  %v446_v33 = vpop.xlane.xlu1 %445 }
 0x17e   : > { %v487_v34 = vmul.f32 0.03125, %v440_v32  ;;  %v489_v35 = vmul.f32 0.03125, %v446_v33 }
 0x180   : > { %v3993_v36 = vsub.f32 %v421_v0, %v487_v34  ;;  %v3995_v37 = vsub.f32 %v423_v1, %v489_v35 }
 0x181   : > { %v443_v38 = vpop.xlane.xlu0 %442  ;;  %v449_v39 = vpop.xlane.xlu1 %448 }
 0x182   : > { %v488_v40 = vmul.f32 0.03125, %v443_v38  ;;  %v490_v41 = vmul.f32 0.03125, %v449_v39  ;;  %v519_v42 = vmul.f32 %v3993_v36, %v3993_v36  ;;  %v521_v43 = vmul.f32 %v3995_v37, %v3995_v37 }
 0x184   : > { %v4001_v44 = vsub.f32 %v422_v2, %v488_v40  ;;  %v4003_v45 = vsub.f32 %v424_v5, %v490_v41  ;;  %v535_v46 = vsel %vm437_vm0, %v519_v42, 0.0  ;;  %v541_v49 = vsel %vm437_vm0, %v521_v43, 0.0 }
 0x185   : > { %536 = vadd.xlane.f32.xlu0 %v535_v46  ;;  %v452_v47 = vpop.xlane.xlu0 %451  ;;  %v455_v48 = vpop.xlane.xlu1 %454 }
 0x186   : > { %v491_v50 = vmul.f32 0.03125, %v452_v47  ;;  %v492_v51 = vmul.f32 0.03125, %v455_v48  ;;  %v520_v52 = vmul.f32 %v4001_v44, %v4001_v44  ;;  %v522_v53 = vmul.f32 %v4003_v45, %v4003_v45 }
 0x188   : > { %v4012_v54 = vsub.f32 %v3935_v6, %v491_v50  ;;  %v4014_v55 = vsub.f32 %v426_v9, %v492_v51  ;;  %v538_v56 = vsel %vm437_vm0, %v520_v52, 0.0  ;;  %v544_v59 = vsel %vm437_vm0, %v522_v53, 0.0  ;;  %v3082_v53 = vld [vmem:[#allocation10] sm:$0xff]  }
 0x189   : > { %542 = vadd.xlane.f32.xlu0 %v541_v49  ;;  %539 = vadd.xlane.f32.xlu1 %v538_v56  ;;  %v458_v57 = vpop.xlane.xlu0 %457  ;;  %v461_v58 = vpop.xlane.xlu1 %460  ;;  %v3083_v56 = vld [vmem:[#allocation8 + $0x8] sm:$0xff]  }
 0x18a   : > { %v493_v60 = vmul.f32 0.03125, %v458_v57  ;;  %v494_v61 = vmul.f32 0.03125, %v461_v58  ;;  %v523_v62 = vmul.f32 %v4012_v54, %v4012_v54  ;;  %v524_v63 = vmul.f32 %v4014_v55, %v4014_v55  ;;  %2705 = vmatprep.subr.bf16.mxu1 %v3082_v53  ;;  %v3084_v57 = vld [vmem:[#allocation10 + $0x8] sm:$0xff]   ;;  %v4084_v58 = vld [vmem:[#allocation11] sm:$0xff]  }
 0x18b   : > { %2706 = vmatpush3.bf16.msra.mxu1 %v3082_v53 }
 0x18c   : > { %v4023_v0 = vsub.f32 %v3944_v12, %v493_v60  ;;  %v4026_v1 = vsub.f32 %v3947_v13, %v494_v61  ;;  %v547_v2 = vsel %vm437_vm0, %v523_v62, 0.0  ;;  %v550_v5 = vsel %vm437_vm0, %v524_v63, 0.0  ;;  %2707 = vmatprep.subr.bf16.mxu1 %v3084_v57 }
 0x18d   : > { %545 = vadd.xlane.f32.xlu1 %v544_v59  ;;  %548 = vadd.xlane.f32.xlu0 %v547_v2  ;;  %v464_v3 = vpop.xlane.xlu0 %463  ;;  %v467_v4 = vpop.xlane.xlu1 %466 }
 0x18e   : > { %v495_v6 = vmul.f32 0.03125, %v464_v3  ;;  %v496_v7 = vmul.f32 0.03125, %v467_v4  ;;  %v525_v8 = vmul.f32 %v4023_v0, %v4023_v0  ;;  %v526_v9 = vmul.f32 %v4026_v1, %v4026_v1 }
 0x18f   : > { %2708 = vmatpush3.bf16.msra.mxu1 %v3084_v57 }
 0x190   : > { %v4035_v10 = vsub.f32 %v3954_v16, %v495_v6  ;;  %v4038_v11 = vsub.f32 %v3957_v17, %v496_v7  ;;  %v553_v12 = vsel %vm437_vm0, %v525_v8, 0.0  ;;  %v556_v15 = vsel %vm437_vm0, %v526_v9, 0.0 }
 0x191   : > { %551 = vadd.xlane.f32.xlu1 %v550_v5  ;;  %554 = vadd.xlane.f32.xlu0 %v553_v12  ;;  %v470_v13 = vpop.xlane.xlu0 %469  ;;  %v473_v14 = vpop.xlane.xlu1 %472 }
 0x192   : > { %v497_v18 = vmul.f32 0.03125, %v470_v13  ;;  %v498_v19 = vmul.f32 0.03125, %v473_v14  ;;  %v527_v22 = vmul.f32 %v4035_v10, %v4035_v10  ;;  %v528_v16 = vmul.f32 %v4038_v11, %v4038_v11 }
 0x194   : > { %v4047_v23 = vsub.f32 %v3964_v20, %v497_v18  ;;  %v4050_v17 = vsub.f32 %v3967_v21, %v498_v19  ;;  %v559_v26 = vsel %vm437_vm0, %v527_v22, 0.0  ;;  %v562_v31 = vsel %vm437_vm0, %v528_v16, 0.0 }
 0x195   : > { %557 = vadd.xlane.f32.xlu1 %v556_v15  ;;  %560 = vadd.xlane.f32.xlu0 %v559_v26  ;;  %v476_v27 = vpop.xlane.xlu0 %475  ;;  %v479_v30 = vpop.xlane.xlu1 %478 }
 0x196   : > { %v499_v32 = vmul.f32 0.03125, %v476_v27  ;;  %v500_v33 = vmul.f32 0.03125, %v479_v30  ;;  %v529_v34 = vmul.f32 %v4047_v23, %v4047_v23  ;;  %v530_v20 = vmul.f32 %v4050_v17, %v4050_v17 }
 0x198   : > { %v4059_v35 = vsub.f32 %v3974_v24, %v499_v32  ;;  %v4062_v21 = vsub.f32 %v3977_v25, %v500_v33  ;;  %v565_v38 = vsel %vm437_vm0, %v529_v34, 0.0  ;;  %v568_v41 = vsel %vm437_vm0, %v530_v20, 0.0  ;;  %v4088_v34 = vld [vmem:[#allocation5] ss:$0 sm:$0xff] }
 0x199   : > { %563 = vadd.xlane.f32.xlu1 %v562_v31  ;;  %566 = vadd.xlane.f32.xlu0 %v565_v38  ;;  %v482_v39 = vpop.xlane.xlu0 %481  ;;  %v485_v40 = vpop.xlane.xlu1 %484 }
 0x19a   : > { %v501_v42 = vmul.f32 0.03125, %v482_v39  ;;  %v502_v43 = vmul.f32 0.03125, %v485_v40  ;;  %v531_v46 = vmul.f32 %v4059_v35, %v4059_v35  ;;  %v532_v24 = vmul.f32 %v4062_v21, %v4062_v21 }
 0x19c   : > { %v4071_v47 = vsub.f32 %v3984_v28, %v501_v42  ;;  %v4074_v25 = vsub.f32 %v3987_v29, %v502_v43  ;;  %v571_v48 = vsel %vm437_vm0, %v531_v46, 0.0  ;;  %v574_v49 = vsel %vm437_vm0, %v532_v24, 0.0  ;;  %v3081_v29 = vld [vmem:[#allocation8] sm:$0xff]  }
 0x19d   : > { %569 = vadd.xlane.f32.xlu1 %v568_v41  ;;  %572 = vadd.xlane.f32.xlu0 %v571_v48 }
 0x19e   : > { %v533_v50 = vmul.f32 %v4071_v47, %v4071_v47  ;;  %v534_v51 = vmul.f32 %v4074_v25, %v4074_v25  ;;  %2685 = vmatprep.subr.bf16.mxu0 %v3081_v29 }
 0x19f   : > { %2686 = vmatpush3.bf16.msra.mxu0 %v3081_v29 }
 0x1a0   : > { %v577_v52 = vsel %vm437_vm0, %v533_v50, 0.0  ;;  %v580_v28 = vsel %vm437_vm0, %v534_v51, 0.0  ;;  %2687 = vmatprep.subr.bf16.mxu0 %v3083_v56 }
 0x1a1   : > { %575 = vadd.xlane.f32.xlu1 %v574_v49  ;;  %578 = vadd.xlane.f32.xlu0 %v577_v52  ;;  %v4093_v49 = vld [vmem:[#allocation7] ss:$0 sm:$0xff] }
 0x1a3   : > { %2688 = vmatpush3.bf16.msra.mxu0 %v3083_v56 }
 0x1a4   : > { %2725 = vmatprep.subr.bf16.mxu0 %v4084_v58 }
 0x1a5   : > { %581 = vadd.xlane.f32.xlu1 %v580_v28 }
 0x212   : > { %v537_v59 = vpop.xlane.xlu0 %536 }
 0x213   : > { %v583_v60 = vmul.f32 0.03125, %v537_v59 }
 0x215   : > { %v599_v61 = vadd.f32 1e-05, %v583_v60 }
 0x216   : > { %v540_v62 = vpop.xlane.xlu1 %539  ;;  %v543_v63 = vpop.xlane.xlu0 %542 }
 0x217   : > { %3089 = vrsqrt.f32 %v599_v61  ;;  %v584_v2 = vmul.f32 0.03125, %v540_v62  ;;  %v585_v3 = vmul.f32 0.03125, %v543_v63 }
 0x219   : > { %v600_v4 = vadd.f32 1e-05, %v584_v2  ;;  %v601_v5 = vadd.f32 1e-05, %v585_v3 }
 0x21a   : > { %v546_v6 = vpop.xlane.xlu1 %545  ;;  %v549_v7 = vpop.xlane.xlu0 %548 }
 0x21b   : > { %3091 = vrsqrt.f32 %v600_v4  ;;  %v586_v8 = vmul.f32 0.03125, %v546_v6  ;;  %v587_v9 = vmul.f32 0.03125, %v549_v7 }
 0x21c   : > { %3093 = vrsqrt.f32 %v601_v5 }
 0x21d   : > { %v602_v12 = vadd.f32 1e-05, %v586_v8  ;;  %v603_v13 = vadd.f32 1e-05, %v587_v9 }
 0x21e   : > { %v552_v14 = vpop.xlane.xlu1 %551  ;;  %v555_v15 = vpop.xlane.xlu0 %554 }
 0x21f   : > { %3095 = vrsqrt.f32 %v602_v12  ;;  %v588_v18 = vmul.f32 0.03125, %v552_v14  ;;  %v589_v19 = vmul.f32 0.03125, %v555_v15 }
 0x220   : > { %3097 = vrsqrt.f32 %v603_v13 }
 0x221   : > { %v3090_v22 = vpop.eup %3089  ;;  %v604_v16 = vadd.f32 1e-05, %v588_v18  ;;  %v605_v26 = vadd.f32 1e-05, %v589_v19 }
 0x222   : > { %v558_v27 = vpop.xlane.xlu1 %557  ;;  %v561_v30 = vpop.xlane.xlu0 %560  ;;  %v631_v31 = vmul.f32 %v3090_v22, %v3993_v36  ;;  %v3086_v22 = vld [vmem:[#allocation11 + $0x8] sm:$0xff]  }
 0x223   : > { %3099 = vrsqrt.f32 %v604_v16  ;;  %v590_v32 = vmul.f32 0.03125, %v558_v27  ;;  %v591_v33 = vmul.f32 0.03125, %v561_v30 }
 0x224   : > { %3101 = vrsqrt.f32 %v605_v26  ;;  %v654_v46 = vmul.f32 %v4088_v34, %v631_v31 }
 0x225   : > { %v3092_v20 = vpop.eup %3091  ;;  %v606_v38 = vadd.f32 1e-05, %v590_v32  ;;  %v607_v39 = vadd.f32 1e-05, %v591_v33 }
 0x226   : > { %v3094_v40 = vpop.eup %3093  ;;  %v564_v41 = vpop.xlane.xlu1 %563  ;;  %v632_v43 = vmul.f32 %v3092_v20, %v4001_v44  ;;  %v677_v44 = vadd.f32 %v4093_v49, %v654_v46 }
 0x227   : > { %v567_v42 = vpop.xlane.xlu0 %566  ;;  %v633_v24 = vmul.f32 %v3094_v40, %v3995_v37  ;;  %3103 = vrsqrt.f32 %v606_v38  ;;  %v592_v36 = vmul.f32 0.03125, %v564_v41 }
 0x228   : > { %v593_v48 = vmul.f32 0.03125, %v567_v42  ;;  %3105 = vrsqrt.f32 %v607_v39  ;;  %v655_v50 = vmul.f32 %v4088_v34, %v632_v43 }
 0x229   : > { %v3096_v51 = vpop.eup %3095  ;;  %v608_v52 = vadd.f32 1e-05, %v592_v36  ;;  %v656_v59 = vmul.f32 %v4088_v34, %v633_v24 }
 0x22a   : > { %v609_v28 = vadd.f32 1e-05, %v593_v48  ;;  %v3098_v29 = vpop.eup %3097  ;;  %v570_v53 = vpop.xlane.xlu1 %569  ;;  %v678_v57 = vadd.f32 %v4093_v49, %v655_v50  ;;  %v634_v37 = vmul.f32 %v3096_v51, %v4003_v45 }
 0x22b   : > { %v573_v56 = vpop.xlane.xlu0 %572  ;;  %v635_v60 = vmul.f32 %v3098_v29, %v4012_v54  ;;  %3107 = vrsqrt.f32 %v608_v52  ;;  %v594_v61 = vmul.f32 0.03125, %v570_v53  ;;  %v679_v54 = vadd.f32 %v4093_v49, %v656_v59 }
 0x22c   : > { %v595_v62 = vmul.f32 0.03125, %v573_v56  ;;  %3109 = vrsqrt.f32 %v609_v28  ;;  %v4101_v63 = vpack.c.bf16 %v678_v57, %v677_v44  ;;  %v657_v2 = vmul.f32 %v4088_v34, %v634_v37 }
 0x22d   : > { %v3100_v3 = vpop.eup %3099  ;;  %v610_v4 = vadd.f32 1e-05, %v594_v61  ;;  %v658_v6 = vmul.f32 %v4088_v34, %v635_v60 }
 0x22e   : > { %v611_v5 = vadd.f32 1e-05, %v595_v62  ;;  %v3102_v7 = vpop.eup %3101  ;;  %v576_v8 = vpop.xlane.xlu1 %575  ;;  %2689 = vmatprep.mubr.msk.bf16.mxu0 %vm437_vm0, %v4101_v63  ;;  %2709 = vmatprep.mubr.msk.bf16.mxu1 %vm437_vm0, %v4101_v63  ;;  %v680_v9 = vadd.f32 %v4093_v49, %v657_v2  ;;  %v636_v12 = vmul.f32 %v3100_v3, %v4014_v55 }
 0x22f   : > { %v579_v45 = vpop.xlane.xlu0 %578  ;;  %v637_v13 = vmul.f32 %v3102_v7, %v4023_v0  ;;  %3111 = vrsqrt.f32 %v610_v4  ;;  %v596_v14 = vmul.f32 0.03125, %v576_v8  ;;  %v681_v30 = vadd.f32 %v4093_v49, %v658_v6 }
 0x230   : > { %v597_v15 = vmul.f32 0.03125, %v579_v45  ;;  %3113 = vrsqrt.f32 %v611_v5  ;;  %v4113_v18 = vpack.c.bf16 %v680_v9, %v679_v54  ;;  %v659_v19 = vmul.f32 %v4088_v34, %v636_v12 }
 0x231   : > { %v3104_v16 = vpop.eup %3103  ;;  %v612_v26 = vadd.f32 1e-05, %v596_v14  ;;  %v660_v33 = vmul.f32 %v4088_v34, %v637_v13 }
 0x232   : > { %v613_v27 = vadd.f32 1e-05, %v597_v15  ;;  %v3106_v31 = vpop.eup %3105  ;;  %v582_v32 = vpop.xlane.xlu1 %581  ;;  %2690 = vmatmul.mubr.msk.bf16.vlgmr.msra.gmra.mrb[0].mxu0 %vm437_vm0, %v4113_v18  ;;  %2710 = vmatmul.mubr.msk.bf16.vlgmr.msra.gmra.mrb[0].mxu1 %vm437_vm0, %v4113_v18  ;;  %v682_v55 = vadd.f32 %v4093_v49, %v659_v19  ;;  %v638_v0 = vmul.f32 %v3104_v16, %v4026_v1 }
 0x233   : > { %v639_v20 = vmul.f32 %v3106_v31, %v4035_v10  ;;  %3115 = vrsqrt.f32 %v612_v26  ;;  %v598_v38 = vmul.f32 0.03125, %v582_v32  ;;  %2726 = vmatpush3.bf16.msra.mxu0 %v4084_v58  ;;  %v683_v1 = vadd.f32 %v4093_v49, %v660_v33 }
 0x234   : > { %3117 = vrsqrt.f32 %v613_v27  ;;  %v695_v39 = vpack.c.bf16 %v682_v55, %v681_v30  ;;  %v661_v40 = vmul.f32 %v4088_v34, %v638_v0  ;;  %2727 = vmatprep.subr.bf16.mxu0 %v3086_v22 }
 0x235   : > { %v3108_v41 = vpop.eup %3107  ;;  %v614_v42 = vadd.f32 1e-05, %v598_v38  ;;  %v662_v43 = vmul.f32 %v4088_v34, %v639_v20 }
 0x236   : > { %v3110_v46 = vpop.eup %3109  ;;  %2693 = vmatprep.mubr.msk.bf16.mxu0 %vm437_vm0, %v695_v39  ;;  %2713 = vmatprep.mubr.msk.bf16.mxu1 %vm437_vm0, %v695_v39  ;;  %v684_v10 = vadd.f32 %v4093_v49, %v661_v40  ;;  %v640_v58 = vmul.f32 %v3108_v41, %v4038_v11 }
 0x237   : > { %v641_v24 = vmul.f32 %v3110_v46, %v4047_v23  ;;  %3119 = vrsqrt.f32 %v614_v42  ;;  %2728 = vmatpush3.bf16.msra.mxu0 %v3086_v22  ;;  %v685_v51 = vadd.f32 %v4093_v49, %v662_v43 }
 0x238   : > { %v696_v36 = vpack.c.bf16 %v684_v10, %v683_v1  ;;  %v663_v48 = vmul.f32 %v4088_v34, %v640_v58 }
 0x239   : > { %v3112_v50 = vpop.eup %3111  ;;  %v664_v11 = vmul.f32 %v4088_v34, %v641_v24 }
 0x23a   : > { %v3114_v52 = vpop.eup %3113  ;;  %2694 = vmatmul.mubr.msk.bf16.gmra.mrb[4].mxu0 %vm437_vm0, %v696_v36  ;;  %2714 = vmatmul.mubr.msk.bf16.gmra.mrb[4].mxu1 %vm437_vm0, %v696_v36  ;;  %v686_v28 = vadd.f32 %v4093_v49, %v663_v48  ;;  %v642_v29 = vmul.f32 %v3112_v50, %v4050_v17 }
 0x23b   : > { %v643_v23 = vmul.f32 %v3114_v52, %v4059_v35  ;;  %v687_v59 = vadd.f32 %v4093_v49, %v664_v11 }
 0x23c   : > { %v697_v53 = vpack.c.bf16 %v686_v28, %v685_v51  ;;  %v665_v56 = vmul.f32 %v4088_v34, %v642_v29 }
 0x23d   : > { %v3116_v44 = vpop.eup %3115  ;;  %v666_v57 = vmul.f32 %v4088_v34, %v643_v23 }
 0x23e   : > { %v3118_v37 = vpop.eup %3117  ;;  %2697 = vmatprep.mubr.msk.bf16.mxu0 %vm437_vm0, %v697_v53  ;;  %2717 = vmatprep.mubr.msk.bf16.mxu1 %vm437_vm0, %v697_v53  ;;  %v688_v60 = vadd.f32 %v4093_v49, %v665_v56  ;;  %v644_v17 = vmul.f32 %v3116_v44, %v4062_v21 }
 0x23f   : > { %v645_v61 = vmul.f32 %v3118_v37, %v4071_v47  ;;  %v689_v3 = vadd.f32 %v4093_v49, %v666_v57 }
 0x240   : > { %v698_v35 = vpack.c.bf16 %v688_v60, %v687_v59  ;;  %v667_v62 = vmul.f32 %v4088_v34, %v644_v17 }
 0x241   : > { %v3120_v2 = vpop.eup %3119  ;;  %v668_v6 = vmul.f32 %v4088_v34, %v645_v61 }
 0x242   : > { %2698 = vmatmul.mubr.msk.bf16.gmra.mrb[8].mxu0 %vm437_vm0, %v698_v35  ;;  %2718 = vmatmul.mubr.msk.bf16.gmra.mrb[8].mxu1 %vm437_vm0, %v698_v35  ;;  %v690_v4 = vadd.f32 %v4093_v49, %v667_v62  ;;  %v646_v5 = vmul.f32 %v3120_v2, %v4074_v25 }
 0x243   : > { %v691_v47 = vadd.f32 %v4093_v49, %v668_v6 }
 0x244   : > { %v699_v7 = vpack.c.bf16 %v690_v4, %v689_v3  ;;  %v669_v21 = vmul.f32 %v4088_v34, %v646_v5 }
 0x246   : > { %2701 = vmatprep.mubr.msk.bf16.mxu0 %vm437_vm0, %v699_v7  ;;  %2721 = vmatprep.mubr.msk.bf16.mxu1 %vm437_vm0, %v699_v7  ;;  %v692_v8 = vadd.f32 %v4093_v49, %v669_v21 }
 0x248   : > { %v700_v45 = vpack.c.bf16 %v692_v8, %v691_v47 }
 0x24a   : > { %2702 = vmatmul.mubr.msk.bf16.gmra.mrb[12].mxu0 %vm437_vm0, %v700_v45  ;;  %2722 = vmatmul.mubr.msk.bf16.gmra.mrb[12].mxu1 %vm437_vm0, %v700_v45 }
 0x24b   : > { %2729 = vmatprep.mubr.msk.bf16.mxu0 %vm437_vm0, %v4101_v63 }
 0x252   : > { %2730 = vmatmul.mubr.msk.bf16.vlgmr.msra.gmra.mrb[16].mxu0 %vm437_vm0, %v4113_v18 }
 0x253   : > { %2733 = vmatprep.mubr.msk.bf16.mxu0 %vm437_vm0, %v695_v39 }
 0x25a   : > { %2734 = vmatmul.mubr.msk.bf16.gmra.mrb[20].mxu0 %vm437_vm0, %v696_v36 }
 0x25b   : > { %2737 = vmatprep.mubr.msk.bf16.mxu0 %vm437_vm0, %v697_v53 }
 0x262   : > { %2738 = vmatmul.mubr.msk.bf16.gmra.mrb[24].mxu0 %vm437_vm0, %v698_v35 }
 0x263   : > { %2741 = vmatprep.mubr.msk.bf16.mxu0 %vm437_vm0, %v699_v7 }
 0x26a   : > { %2742 = vmatmul.mubr.msk.bf16.gmra.mrb[28].mxu0 %vm437_vm0, %v700_v45 }
 0x305   : > { %v2691_v25 = vpop.f32.mrb[0].mxu0  ;;  %v2711_v34 = vpop.f32.mrb[0].mxu1 }
 0x306   : > { %v775_v49 = vpop.f32.mrb[1].mxu0  ;;  %v912_v54 = vpop.f32.mrb[1].mxu1  ;;  %v840_v12 = vmul.f32 0.25, %v2691_v25 }
 0x307   : > { %v2692_v63 = vpop.f32.mrb[2].mxu0  ;;  %v2712_v9 = vpop.f32.mrb[2].mxu1  ;;  %v838_v19 = vmul.f32 0.25, %v775_v49 }
 0x308   : > { %v841_v13 = vmul.f32 0.25, %v2692_v63  ;;  %v976_v14 = vpack.c.bf16 %v2712_v9, %v2711_v34  ;;  %v778_v15 = vpop.f32.mrb[3].mxu0  ;;  %v915_v18 = vpop.f32.mrb[3].mxu1 }
 0x309   : > { %v839_v22 = vmul.f32 0.25, %v778_v15  ;;  %v975_v16 = vpack.c.bf16 %v915_v18, %v912_v54 }
 0x30a   : > { %v4174_v26 = vpack.c.bf16 %v841_v13, %v840_v12  ;;  %1562 = vrot.lane.b32.xlu1 %v976_v14, %s3571_s12  ;;  %v1136_v24 = vsel %vm1107_vm1, %v976_v14, 0 }
 0x30b   : > { %v4177_v27 = vpack.c.bf16 %v839_v22, %v838_v19  ;;  %1560 = vrot.lane.b32.xlu0 %v975_v16, %s3571_s12  ;;  %2941 = vmatprep.subr.msk.bf16.mxu1 %vm1107_vm1, %v975_v16  ;;  %v1133_v30 = vsel %vm1107_vm1, %v975_v16, 0 }
 0x30c   : > { %2746 = vmatpush3.bf16.xpose.msra.mxu1 %v1133_v30 }
 0x30d   : > { %v2695_v31 = vpop.f32.mrb[4].mxu0  ;;  %v2715_v32 = vpop.f32.mrb[4].mxu1  ;;  %2942 = vmatprep.subr.msk.bf16.mxu1 %vm1107_vm1, %v976_v14  ;;  %2761 = vmatprep.mubr.msk.bf16.mxu1 %vm1107_vm1, %v4177_v27 }
 0x30e   : > { %v791_v55 = vpop.f32.mrb[5].mxu0  ;;  %v928_v0 = vpop.f32.mrb[5].mxu1  ;;  %v844_v38 = vmul.f32 0.25, %v2695_v31 }
 0x30f   : > { %v2696_v33 = vpop.f32.mrb[6].mxu0  ;;  %v2716_v20 = vpop.f32.mrb[6].mxu1  ;;  %v842_v43 = vmul.f32 0.25, %v791_v55 }
 0x310   : > { %v845_v39 = vmul.f32 0.25, %v2696_v33  ;;  %v4185_v40 = vpack.c.bf16 %v2716_v20, %v2715_v32  ;;  %v794_v41 = vpop.f32.mrb[7].mxu0  ;;  %v931_v42 = vpop.f32.mrb[7].mxu1 }
 0x311   : > { %v843_v46 = vmul.f32 0.25, %v794_v41  ;;  %v977_v1 = vpack.c.bf16 %v931_v42, %v928_v0 }
 0x312   : > { %v4187_v10 = vpack.c.bf16 %v845_v39, %v844_v38  ;;  %v1142_v54 = vsel %vm1107_vm1, %v4185_v40, 0 }
 0x313   : > { %v4189_v58 = vpack.c.bf16 %v843_v46, %v842_v43  ;;  %1564 = vrot.lane.b32.xlu0 %v977_v1, %s3571_s12  ;;  %v1139_v17 = vsel %vm1107_vm1, %v977_v1, 0 }
 0x314   : > { %2748 = vmatpush3.bf16.xpose.msra.mxu1 %v1136_v24 }
 0x315   : > { %v2699_v36 = vpop.f32.mrb[8].mxu0  ;;  %v2719_v48 = vpop.f32.mrb[8].mxu1  ;;  %2943 = vmatprep.subr.msk.bf16.mxu1 %vm1107_vm1, %v977_v1 }
 0x316   : > { %v807_v50 = vpop.f32.mrb[9].mxu0  ;;  %v944_v51 = vpop.f32.mrb[9].mxu1  ;;  %v848_v29 = vmul.f32 0.25, %v2699_v36 }
 0x317   : > { %v2700_v52 = vpop.f32.mrb[10].mxu0  ;;  %v2720_v28 = vpop.f32.mrb[10].mxu1  ;;  %v846_v44 = vmul.f32 0.25, %v807_v50 }
 0x318   : > { %v849_v11 = vmul.f32 0.25, %v2700_v52  ;;  %v4194_v23 = vpack.c.bf16 %v2720_v28, %v2719_v48  ;;  %v810_v53 = vpop.f32.mrb[11].mxu0  ;;  %v947_v56 = vpop.f32.mrb[11].mxu1  ;;  %v1104_v52 = vlaneseq }
 0x319   : > { %v847_v57 = vmul.f32 0.25, %v810_v53  ;;  %v4196_v37 = vpack.c.bf16 %v947_v56, %v944_v51 }
 0x31a   : > { %v4198_v59 = vpack.c.bf16 %v849_v11, %v848_v29  ;;  %v1148_v55 = vsel %vm1107_vm1, %v4194_v23, 0  ;;  %v4281_v28 = vand.u32 127, %v1104_v52 }
 0x31b   : > { %v4200_v60 = vpack.c.bf16 %v847_v57, %v846_v44  ;;  %v1145_v18 = vsel %vm1107_vm1, %v4196_v37, 0 }
 0x31c   : > { %2750 = vmatpush3.bf16.xpose.msra.mxu1 %v1139_v17  ;;  %vm1106_vm2 = vcmp.lt.s32.totalorder %v4281_v28, 8 }
 0x31d   : > { %v2703_v61 = vpop.f32.mrb[12].mxu0  ;;  %v2723_v35 = vpop.f32.mrb[12].mxu1  ;;  %2944 = vmatprep.subr.msk.bf16.mxu1 %vm1107_vm1, %v4185_v40 }
 0x31e   : > { %v823_v62 = vpop.f32.mrb[13].mxu0  ;;  %v960_v2 = vpop.f32.mrb[13].mxu1  ;;  %v852_v5 = vmul.f32 0.25, %v2703_v61 }
 0x31f   : > { %v2704_v3 = vpop.f32.mrb[14].mxu0  ;;  %v2724_v4 = vpop.f32.mrb[14].mxu1  ;;  %v850_v8 = vmul.f32 0.25, %v823_v62 }
 0x320   : > { %v853_v6 = vmul.f32 0.25, %v2704_v3  ;;  %v4205_v7 = vpack.c.bf16 %v2724_v4, %v2723_v35  ;;  %v826_v21 = vpop.f32.mrb[15].mxu0  ;;  %v963_v47 = vpop.f32.mrb[15].mxu1 }
 0x321   : > { %v851_v45 = vmul.f32 0.25, %v826_v21  ;;  %v4207_v25 = vpack.c.bf16 %v963_v47, %v960_v2 }
 0x322   : > { %v4209_v34 = vpack.c.bf16 %v853_v6, %v852_v5  ;;  %v1154_v50 = vsel %vm1107_vm1, %v4205_v7, 0 }
 0x323   : > { %v4211_v49 = vpack.c.bf16 %v851_v45, %v850_v8  ;;  %v1151_v42 = vsel %vm1107_vm1, %v4207_v25, 0 }
 0x324   : > { %2752 = vmatpush3.bf16.xpose.msra.mxu1 %v1142_v54 }
 0x325   : > { %v2731_v63 = vpop.f32.mrb[16].mxu0  ;;  %2945 = vmatprep.subr.msk.bf16.mxu1 %vm1107_vm1, %v4196_v37 }
 0x326   : > { %v1033_v9 = vpop.f32.mrb[17].mxu0 }
 0x327   : > { %v2732_v12 = vpop.f32.mrb[18].mxu0 }
 0x328   : > { %v4217_v13 = vpack.c.bf16 %v2732_v12, %v2731_v63  ;;  %v1036_v14 = vpop.f32.mrb[19].mxu0 }
 0x329   : > { %v4219_v15 = vpack.c.bf16 %v1036_v14, %v1033_v9 }
 0x32b   : > { %2777 = vmatprep.subr.bf16.mxu0 %v4219_v15 }
 0x32c   : > { %2754 = vmatpush3.bf16.xpose.msra.mxu1 %v1145_v18  ;;  %2778 = vmatpush3.bf16.msra.mxu0 %v4219_v15 }
 0x32d   : > { %v2735_v19 = vpop.f32.mrb[20].mxu0  ;;  %2946 = vmatprep.subr.msk.bf16.mxu1 %vm1107_vm1, %v4194_v23  ;;  %2779 = vmatprep.subr.bf16.mxu0 %v4217_v13 }
 0x32e   : > { %v1049_v22 = vpop.f32.mrb[21].mxu0 }
 0x32f   : > { %v2736_v16 = vpop.f32.mrb[22].mxu0 }
 0x330   : > { %v4228_v30 = vpack.c.bf16 %v2736_v16, %v2735_v19  ;;  %v1052_v31 = vpop.f32.mrb[23].mxu0  ;;  %2780 = vmatpush3.bf16.msra.mxu0 %v4217_v13 }
 0x331   : > { %v4231_v32 = vpack.c.bf16 %v1052_v31, %v1049_v22 }
 0x333   : > { %2781 = vmatprep.subr.bf16.mxu0 %v4231_v32 }
 0x334   : > { %2756 = vmatpush3.bf16.xpose.msra.mxu1 %v1148_v55  ;;  %2782 = vmatpush3.bf16.msra.mxu0 %v4231_v32 }
 0x335   : > { %v2739_v0 = vpop.f32.mrb[24].mxu0  ;;  %2947 = vmatprep.subr.msk.bf16.mxu1 %vm1107_vm1, %v4207_v25  ;;  %2783 = vmatprep.subr.bf16.mxu0 %v4228_v30 }
 0x336   : > { %v1065_v33 = vpop.f32.mrb[25].mxu0 }
 0x337   : > { %v2740_v20 = vpop.f32.mrb[26].mxu0 }
 0x338   : > { %v4240_v38 = vpack.c.bf16 %v2740_v20, %v2739_v0  ;;  %v1068_v39 = vpop.f32.mrb[27].mxu0  ;;  %2784 = vmatpush3.bf16.msra.mxu0 %v4228_v30 }
 0x339   : > { %v4243_v41 = vpack.c.bf16 %v1068_v39, %v1065_v33 }
 0x33b   : > { %2785 = vmatprep.subr.bf16.mxu0 %v4243_v41 }
 0x33c   : > { %2758 = vmatpush3.bf16.xpose.msra.mxu1 %v1151_v42  ;;  %2786 = vmatpush3.bf16.msra.mxu0 %v4243_v41 }
 0x33d   : > { %v2743_v43 = vpop.f32.mrb[28].mxu0  ;;  %2948 = vmatprep.subr.msk.bf16.mxu1 %vm1107_vm1, %v4205_v7  ;;  %2787 = vmatprep.subr.bf16.mxu0 %v4240_v38 }
 0x33e   : > { %v1081_v46 = vpop.f32.mrb[29].mxu0 }
 0x33f   : > { %v2744_v1 = vpop.f32.mrb[30].mxu0 }
 0x340   : > { %v4252_v24 = vpack.c.bf16 %v2744_v1, %v2743_v43  ;;  %v1084_v36 = vpop.f32.mrb[31].mxu0  ;;  %2788 = vmatpush3.bf16.msra.mxu0 %v4240_v38 }
 0x341   : > { %v4255_v48 = vpack.c.bf16 %v1084_v36, %v1081_v46 }
 0x343   : > { %2789 = vmatprep.subr.bf16.mxu0 %v4255_v48 }
 0x344   : > { %2760 = vmatpush3.bf16.xpose.msra.mxu1 %v1154_v50  ;;  %2790 = vmatpush3.bf16.msra.mxu0 %v4255_v48 }
 0x345   : > { %2791 = vmatprep.subr.bf16.mxu0 %v4252_v24 }
 0x348   : > { %2792 = vmatpush3.bf16.msra.mxu0 %v4252_v24 }
 0x34b   : > { %2762 = vmatmul.mubr.msk.bf16.vlgmr.msra.gmra.mrb[16].mxu1 %vm1107_vm1, %v4174_v26 }
 0x34c   : > { %2765 = vmatprep.mubr.msk.bf16.mxu1 %vm1107_vm1, %v4189_v58 }
 0x353   : > { %2766 = vmatmul.mubr.msk.bf16.gmra.mrb[20].mxu1 %vm1107_vm1, %v4187_v10 }
 0x354   : > { %2769 = vmatprep.mubr.msk.bf16.mxu1 %vm1107_vm1, %v4200_v60 }
 0x35b   : > { %2770 = vmatmul.mubr.msk.bf16.gmra.mrb[24].mxu1 %vm1107_vm1, %v4198_v59 }
 0x35c   : > { %2773 = vmatprep.mubr.msk.bf16.mxu1 %vm1107_vm1, %v4211_v49 }
 0x363   : > { %2774 = vmatmul.mubr.msk.bf16.gmra.mrb[28].mxu1 %vm1107_vm1, %v4209_v34 }
 0x37d   : > { %v4277_v51 = vpop.permute.xlu0 %1560 }
 0x37e   : > { %2949 = vmatprep.subr.msk.bf16.mxu0 %vm1107_vm1, %v4277_v51 }
 0x41e   : > { %v2763_v29 = vpop.f32.mrb[16].mxu1 }
 0x41f   : > { %v1190_v11 = vpop.f32.mrb[17].mxu1  ;;  %v4286_v53 = vsel %vm1106_vm2, %v2763_v29, -1e+30 }
 0x420   : > { %1273 = vmax.xlane.f32.xlu0 %v4286_v53  ;;  %v2764_v56 = vpop.f32.mrb[18].mxu1  ;;  %v4296_v17 = vsel %vm1106_vm2, %v1190_v11, -1e+30 }
 0x421   : > { %v1193_v44 = vpop.f32.mrb[19].mxu1  ;;  %v4291_v57 = vsel %vm1106_vm2, %v2764_v56, -1e+30 }
 0x422   : > { %1275 = vmax.xlane.f32.xlu1 %v4291_v57  ;;  %v4301_v61 = vsel %vm1106_vm2, %v1193_v44, -1e+30 }
 0x424   : > { %1269 = vmax.xlane.f32.xlu0 %v4296_v17 }
 0x426   : > { %1271 = vmax.xlane.f32.xlu1 %v4301_v61  ;;  %v2767_v35 = vpop.f32.mrb[20].mxu1 }
 0x427   : > { %v1206_v62 = vpop.f32.mrb[21].mxu1  ;;  %v4310_v63 = vsel %vm1106_vm2, %v2767_v35, -1e+30 }
 0x428   : > { %v2768_v2 = vpop.f32.mrb[22].mxu1  ;;  %v4315_v9 = vsel %vm1106_vm2, %v1206_v62, -1e+30 }
 0x429   : > { %v1209_v3 = vpop.f32.mrb[23].mxu1 }
 0x42a   : > { %v4335_v14 = vsel %vm1106_vm2, %v1209_v3, -1e+30 }
 0x42e   : > { %v2771_v4 = vpop.f32.mrb[24].mxu1 }
 0x42f   : > { %v1222_v5 = vpop.f32.mrb[25].mxu1  ;;  %v4345_v19 = vsel %vm1106_vm2, %v2771_v4, -1e+30 }
 0x430   : > { %v2772_v6 = vpop.f32.mrb[26].mxu1 }
 0x431   : > { %v1225_v21 = vpop.f32.mrb[27].mxu1  ;;  %v4350_v22 = vsel %vm1106_vm2, %v2772_v6, -1e+30 }
 0x432   : > { %v4330_v12 = vsel %vm1106_vm2, %v1225_v21, -1e+30 }
 0x436   : > { %v2775_v47 = vpop.f32.mrb[28].mxu1 }
 0x437   : > { %1566 = vrot.lane.b32.xlu1 %v4185_v40, %s3571_s12  ;;  %v1238_v8 = vpop.f32.mrb[29].mxu1  ;;  %v4320_v40 = vsel %vm1106_vm2, %v1222_v5, -1e+30  ;;  %v4340_v18 = vsel %vm1106_vm2, %v2775_v47, -1e+30 }
 0x438   : > { %v2776_v45 = vpop.f32.mrb[30].mxu1  ;;  %v4355_v16 = vsel %vm1106_vm2, %v1238_v8, -1e+30 }
 0x439   : > { %v1241_v54 = vpop.f32.mrb[31].mxu1  ;;  %v4360_v31 = vsel %vm1106_vm2, %v2776_v45, -1e+30 }
 0x43a   : > { %1568 = vrot.lane.b32.xlu0 %v4196_v37, %s3571_s12  ;;  %v4325_v37 = vsel %vm1106_vm2, %v2768_v2, -1e+30  ;;  %v4365_v55 = vsel %vm1106_vm2, %v1241_v54, -1e+30 }
 0x459   : > { %1281 = vmax.xlane.f32.xlu0 %v4310_v63 }
 0x45b   : > { %1277 = vmax.xlane.f32.xlu1 %v4315_v9 }
 0x45d   : > { %1285 = vmax.xlane.f32.xlu0 %v4320_v40 }
 0x45f   : > { %1283 = vmax.xlane.f32.xlu1 %v4325_v37 }
 0x461   : > { %1287 = vmax.xlane.f32.xlu0 %v4330_v12 }
 0x463   : > { %1279 = vmax.xlane.f32.xlu1 %v4335_v14 }
 0x465   : > { %1297 = vmax.xlane.f32.xlu0 %v4340_v18 }
 0x467   : > { %1289 = vmax.xlane.f32.xlu1 %v4345_v19 }
 0x46b   : > { %1291 = vmax.xlane.f32.xlu1 %v4350_v22 }
 0x46f   : > { %1293 = vmax.xlane.f32.xlu1 %v4355_v16 }
 0x473   : > { %1299 = vmax.xlane.f32.xlu1 %v4360_v31 }
 0x477   : > { %1295 = vmax.xlane.f32.xlu1 %v4365_v55 }
 0x47b   : > { %1572 = vrot.lane.b32.xlu0 %v4207_v25, %s3571_s12 }
 0x47f   : > { %1574 = vrot.lane.b32.xlu0 %v4205_v7, %s3571_s12 }
 0x483   : > { %1536 = vrot.lane.b32.xlu0 %v4177_v27, %s3571_s12  ;;  %v1563_v27 = vpop.permute.xlu1 %1562 }
 0x484   : > { %v1604_v42 = vsel %vm1107_vm1, %v1563_v27, 0 }
 0x487   : > { %1540 = vrot.lane.b32.xlu0 %v4189_v58, %s3571_s12 }
 0x488   : > { %1570 = vrot.lane.b32.xlu1 %v4194_v23, %s3571_s12 }
 0x48b   : > { %1544 = vrot.lane.b32.xlu0 %v4200_v60, %s3571_s12 }
 0x48c   : > { %1538 = vrot.lane.b32.xlu1 %v4174_v26, %s3571_s12  ;;  %v1565_v26 = vpop.permute.xlu0 %1564 }
 0x48d   : > { %v1607_v43 = vsel %vm1107_vm1, %v1565_v26, 0 }
 0x48f   : > { %1548 = vrot.lane.b32.xlu0 %v4211_v49, %s3571_s12 }
 0x490   : > { %1542 = vrot.lane.b32.xlu1 %v4187_v10, %s3571_s12 }
 0x493   : > { %1865 = vrot.lane.b32.xlu0 %v4219_v15, %s3571_s12 }
 0x494   : > { %1546 = vrot.lane.b32.xlu1 %v4198_v59, %s3571_s12 }
 0x497   : > { %1869 = vrot.lane.b32.xlu0 %v4231_v32, %s3571_s12 }
 0x498   : > { %1550 = vrot.lane.b32.xlu1 %v4209_v34, %s3571_s12 }
 0x49b   : > { %1871 = vrot.lane.b32.xlu0 %v4228_v30, %s3571_s12 }
 0x49c   : > { %1867 = vrot.lane.b32.xlu1 %v4217_v13, %s3571_s12 }
 0x49f   : > { %1875 = vrot.lane.b32.xlu0 %v4240_v38, %s3571_s12 }
 0x4a0   : > { %1873 = vrot.lane.b32.xlu1 %v4243_v41, %s3571_s12  ;;  %v1601_v41 = vsel %vm1107_vm1, %v4277_v51, 0 }
 0x4ad   : > { %v1274_v10 = vpop.xlane.xlu0 %1273 }
 0x4ae   : > { %v1303_v59 = vsub.f32 %v4286_v53, %v1274_v10 }
 0x4af   : > { %v1276_v58 = vpop.xlane.xlu1 %1275 }
 0x4b0   : > { %v1304_v23 = vsub.f32 %v4291_v57, %v1276_v58  ;;  %v1321_v15 = vmul.f32 1.442695, %v1303_v59 }
 0x4b1   : > { %v1270_v60 = vpop.xlane.xlu0 %1269 }
 0x4b2   : > { %v1323_v7 = vmul.f32 1.442695, %v1304_v23  ;;  %v1301_v25 = vsub.f32 %v4296_v17, %v1270_v60 }
 0x4b3   : > { %v1272_v34 = vpop.xlane.xlu1 %1271 }
 0x4b4   : > { %v1317_v49 = vmul.f32 1.442695, %v1301_v25  ;;  %v1302_v13 = vsub.f32 %v4301_v61, %v1272_v34  ;;  %3121 = vpow2.f32 %v1323_v7 }
 0x4b5   : > { %v1569_v36 = vpop.permute.xlu0 %1568 }
 0x4b6   : > { %v1319_v30 = vmul.f32 1.442695, %v1302_v13  ;;  %3123 = vpow2.f32 %v1317_v49  ;;  %v1613_v50 = vsel %vm1107_vm1, %v1569_v36, 0 }
 0x4b7   : > { %v1567_v46 = vpop.permute.xlu1 %1566 }
 0x4b8   : > { %3125 = vpow2.f32 %v1319_v30  ;;  %v1610_v1 = vsel %vm1107_vm1, %v1567_v46, 0 }
 0x4b9   : > { %3127 = vpow2.f32 %v1321_v15 }
 0x4be   : > { %v4406_v32 = vpop.eup %3121 }
 0x4c0   : > { %v4408_v0 = vpop.eup %3123 }
 0x4c2   : > { %v4410_v33 = vpop.eup %3125 }
 0x4c3   : > { %v4412_v20 = vpop.eup %3127  ;;  %v1381_v38 = vpack.c.bf16 %v4410_v33, %v4408_v0 }
 0x4c4   : > { %v1382_v39 = vpack.c.bf16 %v4406_v32, %v4412_v20 }
 0x4c5   : > { %2793 = vmatprep.mubr.bf16.mxu0 %v1381_v38 }
 0x4c6   : > { %2794 = vmatmul.mubr.bf16.vlgmr.msra.gmra.mrb[32].mxu0 %v1382_v39 }
 0x4c7   : > { %2810 = vmatpush3.bf16.xpose.msra.mxu0 %v1601_v41 }
 0x4c8   : > { %2950 = vmatprep.subr.msk.bf16.mxu0 %vm1107_vm1, %v1563_v27 }
 0x4cf   : > { %2812 = vmatpush3.bf16.xpose.msra.mxu0 %v1604_v42 }
 0x4d0   : > { %2951 = vmatprep.subr.msk.bf16.mxu0 %vm1107_vm1, %v1565_v26 }
 0x4d7   : > { %2814 = vmatpush3.bf16.xpose.msra.mxu0 %v1607_v43 }
 0x4d8   : > { %2952 = vmatprep.subr.msk.bf16.mxu0 %vm1107_vm1, %v1567_v46 }
 0x4df   : > { %2816 = vmatpush3.bf16.xpose.msra.mxu0 %v1610_v1 }
 0x4e0   : > { %2953 = vmatprep.subr.msk.bf16.mxu0 %vm1107_vm1, %v1569_v36 }
 0x4e6   : > { %v1282_v51 = vpop.xlane.xlu0 %1281 }
 0x4e7   : > { %2818 = vmatpush3.bf16.xpose.msra.mxu0 %v1613_v50  ;;  %v1307_v44 = vsub.f32 %v4310_v63, %v1282_v51 }
 0x4e8   : > { %v1278_v52 = vpop.xlane.xlu1 %1277 }
 0x4e9   : > { %v1305_v29 = vsub.f32 %v4315_v9, %v1278_v52  ;;  %v1329_v5 = vmul.f32 1.442695, %v1307_v44 }
 0x4ea   : > { %v1286_v11 = vpop.xlane.xlu0 %1285 }
 0x4eb   : > { %v1325_v57 = vmul.f32 1.442695, %v1305_v29  ;;  %v1309_v61 = vsub.f32 %v4320_v40, %v1286_v11 }
 0x4ec   : > { %v1284_v53 = vpop.xlane.xlu1 %1283 }
 0x4ed   : > { %v1308_v56 = vsub.f32 %v4325_v37, %v1284_v53  ;;  %3129 = vpow2.f32 %v1325_v57  ;;  %v1333_v21 = vmul.f32 1.442695, %v1309_v61 }
 0x4ee   : > { %v1288_v17 = vpop.xlane.xlu0 %1287 }
 0x4ef   : > { %v1331_v35 = vmul.f32 1.442695, %v1308_v56  ;;  %v1310_v62 = vsub.f32 %v4330_v12, %v1288_v17 }
 0x4f0   : > { %v1280_v2 = vpop.xlane.xlu1 %1279 }
 0x4f1   : > { %v1335_v3 = vmul.f32 1.442695, %v1310_v62  ;;  %v1306_v4 = vsub.f32 %v4335_v14, %v1280_v2  ;;  %3131 = vpow2.f32 %v1331_v35 }
 0x4f2   : > { %v1298_v6 = vpop.xlane.xlu0 %1297 }
 0x4f3   : > { %v1327_v47 = vmul.f32 1.442695, %v1306_v4  ;;  %3133 = vpow2.f32 %v1335_v3  ;;  %v1315_v49 = vsub.f32 %v4340_v18, %v1298_v6 }
 0x4f4   : > { %v1290_v8 = vpop.xlane.xlu1 %1289 }
 0x4f5   : > { %3135 = vpow2.f32 %v1327_v47  ;;  %v1311_v45 = vsub.f32 %v4345_v19, %v1290_v8 }
 0x4f6   : > { %3137 = vpow2.f32 %v1329_v5  ;;  %v1573_v54 = vpop.permute.xlu0 %1572 }
 0x4f7   : > { %3139 = vpow2.f32 %v1333_v21  ;;  %v1337_v63 = vmul.f32 1.442695, %v1311_v45  ;;  %v4438_v14 = vpop.eup %3129  ;;  %v1619_v11 = vsel %vm1107_vm1, %v1573_v54, 0 }
 0x4f8   : > { %v1292_v9 = vpop.xlane.xlu1 %1291 }
 0x4f9   : > { %v1312_v40 = vsub.f32 %v4350_v22, %v1292_v9  ;;  %3141 = vpow2.f32 %v1337_v63 }
 0x4fa   : > { %v4436_v37 = vpop.permute.xlu0 %1574 }
 0x4fb   : > { %v1339_v12 = vmul.f32 1.442695, %v1312_v40  ;;  %v4440_v27 = vpop.eup %3131  ;;  %v1622_v62 = vsel %vm1107_vm1, %v4436_v37, 0 }
 0x4fc   : > { %v1294_v26 = vpop.xlane.xlu1 %1293 }
 0x4fd   : > { %3143 = vpow2.f32 %v1339_v12  ;;  %v4442_v10 = vpop.eup %3133  ;;  %v1313_v23 = vsub.f32 %v4355_v16, %v1294_v26 }
 0x4fe   : > { %v1537_v19 = vpop.permute.xlu0 %1536 }
 0x4ff   : > { %v4444_v58 = vpop.eup %3135  ;;  %v1341_v15 = vmul.f32 1.442695, %v1313_v23 }
 0x500   : > { %v4447_v59 = vpop.eup %3137  ;;  %v1300_v22 = vpop.xlane.xlu1 %1299  ;;  %v1383_v60 = vpack.c.bf16 %v4444_v58, %v4438_v14 }
 0x501   : > { %v4451_v7 = vpop.eup %3139  ;;  %v1316_v25 = vsub.f32 %v4360_v31, %v1300_v22  ;;  %v1384_v34 = vpack.c.bf16 %v4440_v27, %v4447_v59  ;;  %v1345_v31 = vmul.f32 1.442695, %v1315_v49  ;;  %3145 = vpow2.f32 %v1341_v15 }
 0x502   : > { %2797 = vmatprep.mubr.bf16.mxu0 %v1383_v60  ;;  %v1541_v13 = vpop.permute.xlu0 %1540  ;;  %v1385_v16 = vpack.c.bf16 %v4442_v10, %v4451_v7 }
 0x503   : > { %2798 = vmatmul.mubr.bf16.gmra.mrb[36].mxu0 %v1384_v34  ;;  %v1347_v30 = vmul.f32 1.442695, %v1316_v25  ;;  %v4460_v41 = vpop.eup %3141 }
 0x504   : > { %v1296_v38 = vpop.xlane.xlu1 %1295  ;;  %2801 = vmatprep.mubr.bf16.mxu0 %v1385_v16 }
 0x505   : > { %v1314_v39 = vsub.f32 %v4365_v55, %v1296_v38  ;;  %3147 = vpow2.f32 %v1347_v30 }
 0x506   : > { %v1545_v42 = vpop.permute.xlu0 %1544 }
 0x507   : > { %v4462_v43 = vpop.eup %3143  ;;  %v1343_v18 = vmul.f32 1.442695, %v1314_v39 }
 0x508   : > { %v1571_v46 = vpop.permute.xlu1 %1570  ;;  %v1386_v1 = vpack.c.bf16 %v4462_v43, %v4460_v41 }
 0x509   : > { %3149 = vpow2.f32 %v1343_v18  ;;  %v1616_v36 = vsel %vm1107_vm1, %v1571_v46, 0  ;;  %2954 = vmatprep.subr.msk.bf16.mxu0 %vm1107_vm1, %v1571_v46 }
 0x50a   : > { %3151 = vpow2.f32 %v1345_v31  ;;  %2820 = vmatpush3.bf16.xpose.msra.mxu0 %v1616_v36  ;;  %v1549_v55 = vpop.permute.xlu0 %1548 }
 0x50b   : > { %2802 = vmatmul.mubr.bf16.gmra.mrb[40].mxu0 %v1386_v1  ;;  %2955 = vmatprep.subr.msk.bf16.mxu0 %vm1107_vm1, %v1573_v54  ;;  %v4469_v29 = vpop.eup %3145 }
 0x50c   : > { %v1539_v50 = vpop.permute.xlu1 %1538 }
 0x50e   : > { %v1866_v51 = vpop.permute.xlu0 %1865 }
 0x50f   : > { %2909 = vmatprep.subr.bf16.mxu1 %v1866_v51  ;;  %v4472_v53 = vpop.eup %3147 }
 0x510   : > { %v1543_v52 = vpop.permute.xlu1 %1542  ;;  %2917 = vmatpush3.bf16.msra.mxu1 %v1866_v51 }
 0x512   : > { %2822 = vmatpush3.bf16.xpose.msra.mxu0 %v1619_v11  ;;  %v1870_v3 = vpop.permute.xlu0 %1869 }
 0x513   : > { %v4474_v56 = vpop.eup %3149  ;;  %2956 = vmatprep.subr.msk.bf16.mxu0 %vm1107_vm1, %v4436_v37 }
 0x514   : > { %v4478_v44 = vpop.eup %3151  ;;  %v1547_v57 = vpop.permute.xlu1 %1546  ;;  %v1387_v17 = vpack.c.bf16 %v4474_v56, %v4469_v29 }
 0x515   : > { %v1388_v61 = vpack.c.bf16 %v4472_v53, %v4478_v44 }
 0x516   : > { %2805 = vmatprep.mubr.bf16.mxu0 %v1387_v17  ;;  %v1872_v4 = vpop.permute.xlu0 %1871 }
 0x517   : > { %2806 = vmatmul.mubr.bf16.gmra.mrb[44].mxu0 %v1388_v61 }
 0x518   : > { %v1551_v35 = vpop.permute.xlu1 %1550  ;;  %2825 = vmatprep.mubr.msk.bf16.mxu0 %vm1107_vm1, %v1537_v19 }
 0x51a   : > { %2824 = vmatpush3.bf16.xpose.msra.mxu0 %v1622_v62  ;;  %v1876_v6 = vpop.permute.xlu0 %1875 }
 0x51b   : > { %2841 = vmatprep.subr.bf16.mxu0 %v1866_v51 }
 0x51c   : > { %v1868_v2 = vpop.permute.xlu1 %1867 }
 0x51d   : > { %2910 = vmatprep.subr.bf16.mxu1 %v1868_v2 }
 0x51e   : > { %2918 = vmatpush3.bf16.msra.mxu1 %v1868_v2 }
 0x51f   : > { %2911 = vmatprep.subr.bf16.mxu1 %v1870_v3 }
 0x520   : > { %v1874_v5 = vpop.permute.xlu1 %1873 }
 0x521   : > { %2826 = vmatmul.mubr.msk.bf16.vlgmr.msra.gmra.mrb[48].mxu0 %vm1107_vm1, %v1539_v50 }
 0x522   : > { %2829 = vmatprep.mubr.msk.bf16.mxu0 %vm1107_vm1, %v1541_v13  ;;  %2842 = vmatpush3.bf16.msra.mxu0 %v1866_v51 }
 0x523   : > { %2919 = vmatpush3.bf16.msra.mxu1 %v1870_v3  ;;  %2843 = vmatprep.subr.bf16.mxu0 %v1868_v2 }
 0x524   : > { %2912 = vmatprep.subr.bf16.mxu1 %v1872_v4 }
 0x526   : > { %2844 = vmatpush3.bf16.msra.mxu0 %v1868_v2 }
 0x527   : > { %2920 = vmatpush3.bf16.msra.mxu1 %v1872_v4  ;;  %2845 = vmatprep.subr.bf16.mxu0 %v1870_v3 }
 0x528   : > { %2913 = vmatprep.subr.bf16.mxu1 %v1874_v5 }
 0x529   : > { %2830 = vmatmul.mubr.msk.bf16.gmra.mrb[52].mxu0 %vm1107_vm1, %v1543_v52 }
 0x52a   : > { %2833 = vmatprep.mubr.msk.bf16.mxu0 %vm1107_vm1, %v1545_v42  ;;  %2846 = vmatpush3.bf16.msra.mxu0 %v1870_v3 }
 0x52b   : > { %2921 = vmatpush3.bf16.msra.mxu1 %v1874_v5  ;;  %2847 = vmatprep.subr.bf16.mxu0 %v1872_v4 }
 0x52c   : > { %2914 = vmatprep.subr.bf16.mxu1 %v1876_v6 }
 0x52e   : > { %2848 = vmatpush3.bf16.msra.mxu0 %v1872_v4 }
 0x52f   : > { %2922 = vmatpush3.bf16.msra.mxu1 %v1876_v6  ;;  %2849 = vmatprep.subr.bf16.mxu0 %v1874_v5 }
 0x531   : > { %2834 = vmatmul.mubr.msk.bf16.gmra.mrb[56].mxu0 %vm1107_vm1, %v1547_v57 }
 0x532   : > { %2837 = vmatprep.mubr.msk.bf16.mxu0 %vm1107_vm1, %v1549_v55  ;;  %2850 = vmatpush3.bf16.msra.mxu0 %v1874_v5 }
 0x533   : > { %2851 = vmatprep.subr.bf16.mxu0 %v1876_v6 }
 0x536   : > { %2852 = vmatpush3.bf16.msra.mxu0 %v1876_v6 }
 0x539   : > { %2838 = vmatmul.mubr.msk.bf16.gmra.mrb[60].mxu0 %vm1107_vm1, %v1551_v35 }
 0x599   : > { %v4494_v21 = vpop.f32.mrb[32].mxu0 }
 0x59a   : > { %v4496_v47 = vpop.f32.mrb[33].mxu0 }
 0x59b   : > { %v4498_v8 = vpop.f32.mrb[34].mxu0 }
 0x59c   : > { %v4500_v45 = vpop.f32.mrb[35].mxu0 }
 0x5d6   : > { %v4502_v54 = vpop.f32.mrb[36].mxu0 }
 0x5d7   : > { %v4504_v63 = vpop.f32.mrb[37].mxu0 }
 0x5d8   : > { %v4506_v9 = vpop.f32.mrb[38].mxu0 }
 0x5d9   : > { %v4508_v40 = vpop.f32.mrb[39].mxu0 }
 0x5de   : > { %v4510_v37 = vpop.f32.mrb[40].mxu0 }
 0x5df   : > { %v4512_v12 = vpop.f32.mrb[41].mxu0 }
 0x5e0   : > { %v4514_v26 = vpop.f32.mrb[42].mxu0 }
 0x5e1   : > { %v4516_v19 = vpop.f32.mrb[43].mxu0 }
 0x5ea   : > { %v4518_v23 = vpop.f32.mrb[44].mxu0 }
 0x5eb   : > { %4797 = vst [vmem:[#allocation23_spill] sm:$0xff] %v4518_v23  ;;  %v4520_v22 = vpop.f32.mrb[45].mxu0 }
 0x5ec   : > { %v4522_v60 = vpop.f32.mrb[46].mxu0 }
 0x5ed   : > { %4798 = vst [vmem:[#allocation24_spill] sm:$0xff] %v4522_v60  ;;  %v4524_v25 = vpop.f32.mrb[47].mxu0 }
 0x5f4   : > { %v2827_v34 = vpop.f32.mrb[48].mxu0 }
 0x5f5   : > { %v1658_v49 = vpop.f32.mrb[49].mxu0  ;;  %v1723_v13 = vsel %vm1106_vm2, %v2827_v34, -1e+30 }
 0x5f6   : > { %1741 = vmax.xlane.f32.xlu1 %v1723_v13  ;;  %v2828_v16 = vpop.f32.mrb[50].mxu0  ;;  %v1721_v15 = vsel %vm1106_vm2, %v1658_v49, -1e+30 }
 0x5f7   : > { %1737 = vmax.xlane.f32.xlu0 %v1721_v15  ;;  %v1661_v30 = vpop.f32.mrb[51].mxu0  ;;  %v1724_v38 = vsel %vm1106_vm2, %v2828_v16, -1e+30 }
 0x5f8   : > { %v1722_v42 = vsel %vm1106_vm2, %v1661_v30, -1e+30 }
 0x5fa   : > { %1743 = vmax.xlane.f32.xlu1 %v1724_v38 }
 0x5fc   : > { %v2831_v39 = vpop.f32.mrb[52].mxu0 }
 0x5fd   : > { %v1674_v31 = vpop.f32.mrb[53].mxu0  ;;  %v1727_v36 = vsel %vm1106_vm2, %v2831_v39, -1e+30 }
 0x5fe   : > { %1739 = vmax.xlane.f32.xlu1 %v1722_v42  ;;  %v2832_v18 = vpop.f32.mrb[54].mxu0  ;;  %v1725_v46 = vsel %vm1106_vm2, %v1674_v31, -1e+30 }
 0x5ff   : > { %1745 = vmax.xlane.f32.xlu0 %v1725_v46  ;;  %v1677_v1 = vpop.f32.mrb[55].mxu0  ;;  %v1728_v51 = vsel %vm1106_vm2, %v2832_v18, -1e+30 }
 0x600   : > { %v1726_v17 = vsel %vm1106_vm2, %v1677_v1, -1e+30 }
 0x602   : > { %1749 = vmax.xlane.f32.xlu1 %v1727_v36 }
 0x604   : > { %v2835_v55 = vpop.f32.mrb[56].mxu0 }
 0x605   : > { %v1690_v50 = vpop.f32.mrb[57].mxu0  ;;  %v4554_v2 = vsel %vm1106_vm2, %v2835_v55, -1e+30 }
 0x606   : > { %1751 = vmax.xlane.f32.xlu1 %v1728_v51  ;;  %v2836_v52 = vpop.f32.mrb[58].mxu0  ;;  %v4564_v6 = vsel %vm1106_vm2, %v1690_v50, -1e+30 }
 0x607   : > { %v1693_v11 = vpop.f32.mrb[59].mxu0  ;;  %v4542_v57 = vsel %vm1106_vm2, %v2836_v52, -1e+30 }
 0x608   : > { %1759 = vmax.xlane.f32.xlu0 %v4542_v57  ;;  %v4549_v61 = vsel %vm1106_vm2, %v1693_v11, -1e+30 }
 0x60a   : > { %1747 = vmax.xlane.f32.xlu1 %v1726_v17 }
 0x60c   : > { %1755 = vmax.xlane.f32.xlu0 %v4549_v61  ;;  %v2839_v35 = vpop.f32.mrb[60].mxu0 }
 0x60d   : > { %v1706_v62 = vpop.f32.mrb[61].mxu0  ;;  %v4583_v16 = vsel %vm1106_vm2, %v2839_v35, -1e+30 }
 0x60e   : > { %1757 = vmax.xlane.f32.xlu1 %v4554_v2  ;;  %v2840_v3 = vpop.f32.mrb[62].mxu0  ;;  %v4578_v49 = vsel %vm1106_vm2, %v1706_v62, -1e+30 }
 0x60f   : > { %v1709_v4 = vpop.f32.mrb[63].mxu0  ;;  %v4559_v5 = vsel %vm1106_vm2, %v2840_v3, -1e+30 }
 0x610   : > { %1767 = vmax.xlane.f32.xlu0 %v4559_v5  ;;  %v4569_v34 = vsel %vm1106_vm2, %v1709_v4, -1e+30 }
 0x612   : > { %1753 = vmax.xlane.f32.xlu1 %v4564_v6 }
 0x614   : > { %1763 = vmax.xlane.f32.xlu0 %v4569_v34 }
 0x623   : > { %1877 = vrot.lane.b32.xlu1 %v4255_v48, %s3571_s12 }
 0x62a   : > { %1879 = vrot.lane.b32.xlu0 %v4252_v24, %s3571_s12 }
 0x647   : > { %1761 = vmax.xlane.f32.xlu1 %v4578_v49 }
 0x64b   : > { %1765 = vmax.xlane.f32.xlu1 %v4583_v16 }
 0x683   : > { %v1742_v30 = vpop.xlane.xlu1 %1741 }
 0x684   : > { %v1738_v39 = vpop.xlane.xlu0 %1737  ;;  %v1771_v31 = vsub.f32 %v1723_v13, %v1742_v30 }
 0x685   : > { %v1769_v18 = vsub.f32 %v1721_v15, %v1738_v39 }
 0x686   : > { %v1789_v55 = vmul.f32 1.442695, %v1771_v31 }
 0x687   : > { %v1785_v48 = vmul.f32 1.442695, %v1769_v18  ;;  %v1744_v1 = vpop.xlane.xlu1 %1743 }
 0x688   : > { %v1772_v24 = vsub.f32 %v1724_v38, %v1744_v1 }
 0x689   : > { %3153 = vpow2.f32 %v1785_v48 }
 0x68a   : > { %3155 = vpow2.f32 %v1789_v55  ;;  %v1791_v11 = vmul.f32 1.442695, %v1772_v24 }
 0x68b   : > { %v1740_v50 = vpop.xlane.xlu1 %1739 }
 0x68c   : > { %v1770_v52 = vsub.f32 %v1722_v42, %v1740_v50  ;;  %v1746_v3 = vpop.xlane.xlu0 %1745 }
 0x68d   : > { %v1773_v4 = vsub.f32 %v1725_v46, %v1746_v3 }
 0x68e   : > { %v1787_v62 = vmul.f32 1.442695, %v1770_v52 }
 0x68f   : > { %v1750_v28 = vpop.xlane.xlu1 %1749  ;;  %v1793_v39 = vmul.f32 1.442695, %v1773_v4 }
 0x690   : > { %3157 = vpow2.f32 %v1787_v62  ;;  %v1775_v35 = vsub.f32 %v1727_v36, %v1750_v28 }
 0x691   : > { %3159 = vpow2.f32 %v1791_v11 }
 0x692   : > { %v1797_v60 = vmul.f32 1.442695, %v1775_v35 }
 0x693   : > { %v3154_v23 = vpop.eup %3153  ;;  %v1752_v13 = vpop.xlane.xlu1 %1751 }
 0x694   : > { %3161 = vpow2.f32 %v1797_v60  ;;  %1817 = vadd.xlane.f32.xlu1 %v3154_v23  ;;  %v1776_v15 = vsub.f32 %v1728_v51, %v1752_v13  ;;  %v3156_v38 = vpop.eup %3155 }
 0x695   : > { %v1760_v30 = vpop.xlane.xlu0 %1759  ;;  %3163 = vpow2.f32 %v1793_v39 }
 0x696   : > { %v1799_v18 = vmul.f32 1.442695, %v1776_v15  ;;  %v1780_v51 = vsub.f32 %v4542_v57, %v1760_v30 }
 0x697   : > { %v1748_v31 = vpop.xlane.xlu1 %1747 }
 0x698   : > { %v1774_v42 = vsub.f32 %v1726_v17, %v1748_v31  ;;  %1821 = vadd.xlane.f32.xlu1 %v3156_v38  ;;  %3165 = vpow2.f32 %v1799_v18 }
 0x699   : > { %v1756_v48 = vpop.xlane.xlu0 %1755 }
 0x69a   : > { %v3158_v1 = vpop.eup %3157  ;;  %v1795_v55 = vmul.f32 1.442695, %v1774_v42  ;;  %v1778_v46 = vsub.f32 %v4549_v61, %v1756_v48  ;;  %v1807_v61 = vmul.f32 1.442695, %v1780_v51 }
 0x69b   : > { %v3160_v36 = vpop.eup %3159  ;;  %v1758_v24 = vpop.xlane.xlu1 %1757  ;;  %1819 = vadd.xlane.f32.xlu0 %v3158_v1  ;;  %v1849_v50 = vpack.c.bf16 %v3158_v1, %v3154_v23 }
 0x69c   : > { %v1779_v60 = vsub.f32 %v4554_v2, %v1758_v24  ;;  %1823 = vadd.xlane.f32.xlu1 %v3160_v36  ;;  %3167 = vpow2.f32 %v1795_v55  ;;  %v1803_v62 = vmul.f32 1.442695, %v1778_v46  ;;  %v1850_v39 = vpack.c.bf16 %v3160_v36, %v3156_v38 }
 0x69d   : > { %2857 = vmatprep.mubr.bf16.mxu0 %v1849_v50  ;;  %v1768_v17 = vpop.xlane.xlu0 %1767 }
 0x69e   : > { %v3162_v52 = vpop.eup %3161  ;;  %v1805_v11 = vmul.f32 1.442695, %v1779_v60  ;;  %v1784_v48 = vsub.f32 %v4559_v5, %v1768_v17 }
 0x69f   : > { %v1754_v3 = vpop.xlane.xlu1 %1753  ;;  %v3164_v4 = vpop.eup %3163 }
 0x6a0   : > { %3169 = vpow2.f32 %v1805_v11  ;;  %v1777_v28 = vsub.f32 %v4564_v6, %v1754_v3  ;;  %1829 = vadd.xlane.f32.xlu1 %v3162_v52  ;;  %v1815_v50 = vmul.f32 1.442695, %v1784_v48 }
 0x6a1   : > { %v1764_v35 = vpop.xlane.xlu0 %1763  ;;  %3171 = vpow2.f32 %v1803_v62 }
 0x6a2   : > { %v1801_v23 = vmul.f32 1.442695, %v1777_v28  ;;  %v3166_v13 = vpop.eup %3165  ;;  %v1782_v30 = vsub.f32 %v4569_v34, %v1764_v35 }
 0x6a3   : > { %v1878_v2 = vpop.permute.xlu1 %1877  ;;  %v1852_v34 = vpack.c.bf16 %v3166_v13, %v3162_v52 }
 0x6a4   : > { %3173 = vpow2.f32 %v1801_v23  ;;  %2853 = vmatprep.subr.bf16.mxu0 %v1878_v2  ;;  %2915 = vmatprep.subr.bf16.mxu1 %v1878_v2  ;;  %v1811_v1 = vmul.f32 1.442695, %v1782_v30 }
 0x6a5   : > { %3175 = vpow2.f32 %v1807_v61  ;;  %1825 = vadd.xlane.f32.xlu1 %v3164_v4  ;;  %2854 = vmatpush3.bf16.msra.mxu0 %v1878_v2  ;;  %v1880_v57 = vpop.permute.xlu0 %1879 }
 0x6a6   : > { %2923 = vmatpush3.bf16.msra.mxu1 %v1878_v2  ;;  %2855 = vmatprep.subr.bf16.mxu0 %v1880_v57  ;;  %v3168_v15 = vpop.eup %3167  ;;  %3177 = vpow2.f32 %v1811_v1 }
 0x6a7   : > { %2916 = vmatprep.subr.bf16.mxu1 %v1880_v57  ;;  %v1851_v31 = vpack.c.bf16 %v3168_v15, %v3164_v4  ;;  %3179 = vpow2.f32 %v1815_v50 }
 0x6a9   : > { %1831 = vadd.xlane.f32.xlu1 %v3166_v13  ;;  %2856 = vmatpush3.bf16.msra.mxu0 %v1880_v57 }
 0x6aa   : > { %v3170_v6 = vpop.eup %3169  ;;  %2924 = vmatpush3.bf16.msra.mxu1 %v1880_v57 }
 0x6ab   : > { %1837 = vadd.xlane.f32.xlu0 %v3170_v6  ;;  %v3172_v42 = vpop.eup %3171 }
 0x6ac   : > { %2858 = vmatmul.mubr.bf16.vlgmr.msra.gmra.mrb[64].mxu0 %v1850_v39 }
 0x6ad   : > { %1827 = vadd.xlane.f32.xlu1 %v3168_v15  ;;  %2861 = vmatprep.mubr.bf16.mxu0 %v1851_v31 }
 0x6ae   : > { %v3174_v18 = vpop.eup %3173 }
 0x6af   : > { %v3176_v55 = vpop.eup %3175  ;;  %v1853_v46 = vpack.c.bf16 %v3172_v42, %v3174_v18 }
 0x6b0   : > { %v1854_v24 = vpack.c.bf16 %v3176_v55, %v3170_v6  ;;  %v3178_v38 = vpop.eup %3177 }
 0x6b1   : > { %1833 = vadd.xlane.f32.xlu1 %v3174_v18  ;;  %2865 = vmatprep.mubr.bf16.mxu1 %v1853_v46  ;;  %v3180_v36 = vpop.eup %3179 }
 0x6b2   : > { %2866 = vmatmul.mubr.bf16.vlgmr.msra.gmra.mrb[32].mxu1 %v1854_v24 }
 0x6b4   : > { %2862 = vmatmul.mubr.bf16.gmra.mrb[68].mxu0 %v1852_v34 }
 0x6b5   : > { %1835 = vadd.xlane.f32.xlu1 %v3172_v42 }
 0x6b9   : > { %1839 = vadd.xlane.f32.xlu1 %v3176_v55 }
 0x6bd   : > { %1843 = vadd.xlane.f32.xlu1 %v3178_v38 }
 0x6c1   : > { %1847 = vadd.xlane.f32.xlu1 %v3180_v36 }
 0x6c5   : > { %1351 = vadd.xlane.f32.xlu1 %v4410_v33 }
 0x6c9   : > { %1355 = vadd.xlane.f32.xlu1 %v4406_v32 }
 0x6cd   : > { %1359 = vadd.xlane.f32.xlu1 %v4444_v58  ;;  %v3087_v58 = vld [vmem:[#allocation13 + $0x8] sm:$0xff]  }
 0x6ce   : > { %2873 = vmatprep.subr.bf16.mxu1 %v3087_v58 }
 0x6cf   : > { %2874 = vmatpush3.bf16.msra.mxu1 %v3087_v58 }
 0x6d1   : > { %1363 = vadd.xlane.f32.xlu1 %v4440_v27 }
 0x6d4   : > { %v1762_v5 = vpop.xlane.xlu1 %1761 }
 0x6d5   : > { %v1781_v60 = vsub.f32 %v4578_v49, %v1762_v5  ;;  %1367 = vadd.xlane.f32.xlu1 %v4442_v10 }
 0x6d7   : > { %v1809_v51 = vmul.f32 1.442695, %v1781_v60 }
 0x6d8   : > { %v1766_v17 = vpop.xlane.xlu1 %1765 }
 0x6d9   : > { %3181 = vpow2.f32 %v1809_v51  ;;  %v1783_v52 = vsub.f32 %v4583_v16, %v1766_v17  ;;  %1371 = vadd.xlane.f32.xlu1 %v4462_v43  ;;  %v4610_v43 = vld [vmem:[#allocation13] sm:$0xff]  }
 0x6da   : > { %2891 = vmatprep.subr.bf16.mxu1 %v4610_v43 }
 0x6db   : > { %v1813_v11 = vmul.f32 1.442695, %v1783_v52 }
 0x6dd   : > { %3183 = vpow2.f32 %v1813_v11  ;;  %1375 = vadd.xlane.f32.xlu1 %v4474_v56 }
 0x6e1   : > { %1379 = vadd.xlane.f32.xlu1 %v4472_v53 }
 0x6e3   : > { %v3182_v32 = vpop.eup %3181 }
 0x6e4   : > { %1841 = vadd.xlane.f32.xlu0 %v3182_v32  ;;  %v1855_v33 = vpack.c.bf16 %v3178_v38, %v3182_v32 }
 0x6e6   : > { %2869 = vmatprep.mubr.bf16.mxu1 %v1855_v33 }
 0x6e7   : > { %v3184_v27 = vpop.eup %3183 }
 0x6e8   : > { %1845 = vadd.xlane.f32.xlu0 %v3184_v27  ;;  %v1856_v10 = vpack.c.bf16 %v3180_v36, %v3184_v27 }
 0x6ea   : > { %2870 = vmatmul.mubr.bf16.gmra.mrb[36].mxu1 %v1856_v10 }
 0x6ec   : > { %1349 = vadd.xlane.f32.xlu0 %v4408_v0 }
 0x6f0   : > { %1353 = vadd.xlane.f32.xlu0 %v4412_v20 }
 0x6f4   : > { %1357 = vadd.xlane.f32.xlu0 %v4438_v14 }
 0x6f8   : > { %1361 = vadd.xlane.f32.xlu0 %v4447_v59 }
 0x6fc   : > { %1365 = vadd.xlane.f32.xlu0 %v4451_v7 }
 0x700   : > { %1369 = vadd.xlane.f32.xlu0 %v4460_v41 }
 0x704   : > { %1373 = vadd.xlane.f32.xlu0 %v4469_v29 }
 0x708   : > { %1377 = vadd.xlane.f32.xlu0 %v4478_v44 }
 0x721   : > { %v1818_v0 = vpop.xlane.xlu1 %1817 }
 0x722   : > { %3185 = vrcp.f32 %v1818_v0 }
 0x725   : > { %v1822_v20 = vpop.xlane.xlu1 %1821 }
 0x726   : > { %3187 = vrcp.f32 %v1822_v20 }
 0x728   : > { %v1820_v44 = vpop.xlane.xlu0 %1819 }
 0x729   : > { %v1824_v14 = vpop.xlane.xlu1 %1823  ;;  %3189 = vrcp.f32 %v1820_v44 }
 0x72a   : > { %3191 = vrcp.f32 %v1824_v14 }
 0x72c   : > { %v3186_v13 = vpop.eup %3185 }
 0x72d   : > { %v1830_v53 = vpop.xlane.xlu1 %1829 }
 0x72e   : > { %3193 = vrcp.f32 %v1830_v53 }
 0x730   : > { %v3188_v15 = vpop.eup %3187 }
 0x732   : > { %v1826_v59 = vpop.xlane.xlu1 %1825 }
 0x733   : > { %3195 = vrcp.f32 %v1826_v59  ;;  %v3190_v6 = vpop.eup %3189 }
 0x734   : > { %v3192_v30 = vpop.eup %3191 }
 0x736   : > { %v1832_v56 = vpop.xlane.xlu1 %1831 }
 0x737   : > { %3197 = vrcp.f32 %v1832_v56 }
 0x738   : > { %v1838_v61 = vpop.xlane.xlu0 %1837  ;;  %v3194_v31 = vpop.eup %3193 }
 0x739   : > { %3199 = vrcp.f32 %v1838_v61 }
 0x73a   : > { %v1828_v7 = vpop.xlane.xlu1 %1827 }
 0x73d   : > { %v3196_v18 = vpop.eup %3195 }
 0x73e   : > { %v1834_v49 = vpop.xlane.xlu1 %1833 }
 0x741   : > { %v3198_v1 = vpop.eup %3197 }
 0x742   : > { %v1836_v41 = vpop.xlane.xlu1 %1835 }
 0x743   : > { %v3200_v46 = vpop.eup %3199 }
 0x746   : > { %v1840_v16 = vpop.xlane.xlu1 %1839 }
 0x74a   : > { %v4613_v29 = vpop.xlane.xlu1 %1843 }
 0x74e   : > { %v4615_v62 = vpop.xlane.xlu1 %1847 }
 0x752   : > { %v1352_v3 = vpop.xlane.xlu1 %1351 }
 0x753   : > { %3201 = vrcp.f32 %v1352_v3 }
 0x754   : > { %3203 = vrcp.f32 %v1834_v49 }
 0x756   : > { %v1356_v28 = vpop.xlane.xlu1 %1355 }
 0x75a   : > { %v1360_v23 = vpop.xlane.xlu1 %1359 }
 0x75d   : > { %v3202_v34 = vpop.eup %3201 }
 0x75e   : > { %v1364_v4 = vpop.xlane.xlu1 %1363  ;;  %v3204_v60 = vpop.eup %3203  ;;  %v4625_v20 = vmul.f32 %v3202_v34, %v4500_v45 }
 0x762   : > { %v1368_v42 = vpop.xlane.xlu1 %1367 }
 0x766   : > { %v1372_v11 = vpop.xlane.xlu1 %1371 }
 0x771   : > { %v4617_v35 = vpop.xlane.xlu0 %1841 }
 0x775   : > { %v4619_v2 = vpop.xlane.xlu0 %1845 }
 0x779   : > { %v1350_v57 = vpop.xlane.xlu0 %1349 }
 0x77a   : > { %3205 = vrcp.f32 %v1350_v57 }
 0x77b   : > { %3207 = vrcp.f32 %v1836_v41 }
 0x77c   : > { %3209 = vrcp.f32 %v1356_v28 }
 0x77d   : > { %3211 = vrcp.f32 %v1840_v16  ;;  %v1354_v39 = vpop.xlane.xlu0 %1353 }
 0x77e   : > { %3213 = vrcp.f32 %v1354_v39 }
 0x77f   : > { %3215 = vrcp.f32 %v1828_v7  ;;  %v2859_v48 = vpop.f32.mrb[64].mxu0 }
 0x780   : > { %3217 = vrcp.f32 %v1360_v23  ;;  %v1923_v55 = vpop.f32.mrb[65].mxu0  ;;  %v2004_v38 = vmul.f32 %v3188_v15, %v2859_v48  ;;  %v1376_v48 = vpop.xlane.xlu1 %1375 }
 0x781   : > { %v2860_v24 = vpop.f32.mrb[66].mxu0  ;;  %v1358_v50 = vpop.xlane.xlu0 %1357  ;;  %v2002_v51 = vmul.f32 %v3186_v13, %v1923_v55 }
 0x782   : > { %v2005_v36 = vmul.f32 %v3192_v30, %v2860_v24  ;;  %3219 = vrcp.f32 %v1358_v50  ;;  %v1926_v5 = vpop.f32.mrb[67].mxu0 }
 0x783   : > { %v2003_v17 = vmul.f32 %v3190_v6, %v1926_v5  ;;  %3221 = vrcp.f32 %v1364_v4 }
 0x784   : > { %v3206_v52 = vpop.eup %3205  ;;  %v2019_v32 = vpack.c.bf16 %v2005_v36, %v2004_v38 }
 0x785   : > { %v3208_v33 = vpop.eup %3207  ;;  %v2018_v27 = vpack.c.bf16 %v2003_v17, %v2002_v51  ;;  %v2867_v10 = vpop.f32.mrb[32].mxu1  ;;  %v4622_v0 = vmul.f32 %v3206_v52, %v4496_v47 }
 0x786   : > { %v1362_v58 = vpop.xlane.xlu0 %1361  ;;  %v3210_v14 = vpop.eup %3209  ;;  %v2012_v16 = vmul.f32 %v3200_v46, %v2867_v10 }
 0x787   : > { %3223 = vrcp.f32 %v1362_v58  ;;  %v1955_v53 = vpop.f32.mrb[33].mxu1  ;;  %v3212_v59 = vpop.eup %3211  ;;  %2875 = vmatprep.mubr.msk.bf16.mxu1 %vm1107_vm1, %v2018_v27  ;;  %v1518_v49 = vpack.c.bf16 %v4625_v20, %v4622_v0  ;;  %v4632_v28 = vmul.f32 %v3210_v14, %v4498_v8 }
 0x788   : > { %v2863_v56 = vpop.f32.mrb[68].mxu0  ;;  %v2868_v7 = vpop.f32.mrb[34].mxu1  ;;  %3225 = vrcp.f32 %v1368_v42  ;;  %2876 = vmatmul.mubr.msk.bf16.vlgmr.msra.gmra.mrb[40].mxu1 %vm1107_vm1, %v2019_v32  ;;  %v2010_v23 = vmul.f32 %v3204_v60, %v1955_v53 }
 0x789   : > { %v3214_v41 = vpop.eup %3213  ;;  %v2013_v3 = vmul.f32 %v3212_v59, %v2868_v7  ;;  %v1939_v47 = vpop.f32.mrb[69].mxu0  ;;  %2892 = vmatpush3.bf16.msra.mxu1 %v4610_v43  ;;  %v2008_v6 = vmul.f32 %v3194_v31, %v2863_v56 }
 0x78a   : > { %v1958_v44 = vpop.f32.mrb[35].mxu1  ;;  %v3216_v45 = vpop.eup %3215  ;;  %v4635_v61 = vmul.f32 %v3214_v41, %v4494_v21  ;;  %v2006_v55 = vmul.f32 %v3196_v18, %v1939_v47  ;;  %v4800_v47 = vld [vmem:[#allocation24_spill] sm:$0xff] }
 0x78b   : > { %v2011_v4 = vmul.f32 %v3208_v33, %v1958_v44  ;;  %v2864_v57 = vpop.f32.mrb[70].mxu0  ;;  %v1366_v13 = vpop.xlane.xlu0 %1365  ;;  %v2023_v30 = vpack.c.bf16 %v2013_v3, %v2012_v16  ;;  %v4799_v16 = vld [vmem:[#allocation23_spill] sm:$0xff] }
 0x78c   : > { %v3218_v15 = vpop.eup %3217  ;;  %v2009_v39 = vmul.f32 %v3198_v1, %v2864_v57  ;;  %3227 = vrcp.f32 %v1366_v13  ;;  %v1942_v42 = vpop.f32.mrb[71].mxu0  ;;  %v1519_v8 = vpack.c.bf16 %v4632_v28, %v4635_v61 }
 0x78d   : > { %v2022_v46 = vpack.c.bf16 %v2011_v4, %v2010_v23  ;;  %v2007_v21 = vmul.f32 %v3216_v45, %v1942_v42  ;;  %v3220_v24 = vpop.eup %3219  ;;  %3229 = vrcp.f32 %v1372_v11  ;;  %v1507_v31 = vmul.f32 %v3218_v15, %v4508_v40  ;;  %v1380_v18 = vpop.xlane.xlu1 %1379 }
 0x78e   : > { %v2021_v50 = vpack.c.bf16 %v2009_v39, %v2008_v6  ;;  %v4641_v43 = vmul.f32 %v3220_v24, %v4504_v63  ;;  %v3222_v1 = vpop.eup %3221 }
 0x78f   : > { %v2020_v34 = vpack.c.bf16 %v2007_v21, %v2006_v55  ;;  %v1370_v38 = vpop.xlane.xlu0 %1369  ;;  %v1509_v63 = vmul.f32 %v3222_v1, %v4506_v9 }
 0x790   : > { %3231 = vrcp.f32 %v1370_v38  ;;  %v1520_v36 = vpack.c.bf16 %v1507_v31, %v4641_v43 }
 0x791   : > { %2879 = vmatprep.mubr.msk.bf16.mxu1 %vm1107_vm1, %v2020_v34  ;;  %v3224_v5 = vpop.eup %3223  ;;  %3233 = vrcp.f32 %v1376_v48 }
 0x792   : > { %2880 = vmatmul.mubr.msk.bf16.gmra.mrb[44].mxu1 %vm1107_vm1, %v2021_v50  ;;  %v1508_v51 = vmul.f32 %v3224_v5, %v4502_v54  ;;  %v3226_v17 = vpop.eup %3225 }
 0x793   : > { %2883 = vmatprep.mubr.msk.bf16.mxu1 %vm1107_vm1, %v2022_v46  ;;  %v1374_v60 = vpop.xlane.xlu0 %1373  ;;  %v1511_v33 = vmul.f32 %v3226_v17, %v4516_v19 }
 0x794   : > { %3235 = vrcp.f32 %v1374_v60  ;;  %v1521_v40 = vpack.c.bf16 %v1509_v63, %v1508_v51 }
 0x795   : > { %3237 = vrcp.f32 %v1380_v18 }
 0x796   : > { %v3228_v52 = vpop.eup %3227 }
 0x797   : > { %v1378_v11 = vpop.xlane.xlu0 %1377  ;;  %v1510_v32 = vmul.f32 %v3228_v52, %v4512_v12  ;;  %v3230_v27 = vpop.eup %3229 }
 0x798   : > { %3239 = vrcp.f32 %v1378_v11  ;;  %v1513_v9 = vmul.f32 %v3230_v27, %v4514_v26 }
 0x799   : > { %v1522_v10 = vpack.c.bf16 %v1511_v33, %v1510_v32  ;;  %3241 = vrcp.f32 %v4613_v29 }
 0x79a   : > { %v3232_v58 = vpop.eup %3231  ;;  %2884 = vmatmul.mubr.msk.bf16.gmra.mrb[48].mxu1 %vm1107_vm1, %v2023_v30  ;;  %3243 = vrcp.f32 %v4615_v62  ;;  %v2565_v62 = vld [vmem:[#allocation14] ss:$0 sm:$0xff] }
 0x79b   : > { %v1512_v54 = vmul.f32 %v3232_v58, %v4510_v37  ;;  %v3234_v14 = vpop.eup %3233  ;;  %3245 = vrcp.f32 %v4619_v2 }
 0x79c   : > { %v1515_v7 = vmul.f32 %v3234_v14, %v4524_v25  ;;  %3247 = vrcp.f32 %v4617_v35 }
 0x79d   : > { %v1523_v53 = vpack.c.bf16 %v1513_v9, %v1512_v54 }
 0x79e   : > { %v3236_v59 = vpop.eup %3235 }
 0x79f   : > { %v1514_v56 = vmul.f32 %v3236_v59, %v4520_v22  ;;  %v3238_v12 = vpop.eup %3237 }
 0x7a0   : > { %v1517_v44 = vmul.f32 %v3238_v12, %v4800_v47 }
 0x7a1   : > { %v1524_v41 = vpack.c.bf16 %v1515_v7, %v1514_v56 }
 0x7a2   : > { %v3240_v19 = vpop.eup %3239 }
 0x7a3   : > { %v1516_v3 = vmul.f32 %v3240_v19, %v4799_v16  ;;  %v3242_v37 = vpop.eup %3241 }
 0x7a4   : > { %v3244_v22 = vpop.eup %3243 }
 0x7a5   : > { %v1525_v45 = vpack.c.bf16 %v1517_v44, %v1516_v3  ;;  %v3246_v23 = vpop.eup %3245 }
 0x7a6   : > { %v3248_v57 = vpop.eup %3247 }
 0x7bd   : > { %v2871_v26 = vpop.f32.mrb[36].mxu1 }
 0x7be   : > { %v1971_v25 = vpop.f32.mrb[37].mxu1  ;;  %v2016_v13 = vmul.f32 %v3246_v23, %v2871_v26 }
 0x7bf   : > { %v2872_v4 = vpop.f32.mrb[38].mxu1  ;;  %v2014_v30 = vmul.f32 %v3248_v57, %v1971_v25 }
 0x7c0   : > { %v2017_v15 = vmul.f32 %v3244_v22, %v2872_v4  ;;  %v1974_v6 = vpop.f32.mrb[39].mxu1 }
 0x7c1   : > { %v2015_v39 = vmul.f32 %v3242_v37, %v1974_v6 }
 0x7c2   : > { %v2025_v42 = vpack.c.bf16 %v2017_v15, %v2016_v13 }
 0x7c3   : > { %v2024_v29 = vpack.c.bf16 %v2015_v39, %v2014_v30 }
 0x7c5   : > { %2887 = vmatprep.mubr.msk.bf16.mxu1 %vm1107_vm1, %v2024_v29 }
 0x7c6   : > { %2888 = vmatmul.mubr.msk.bf16.gmra.mrb[52].mxu1 %vm1107_vm1, %v2025_v42 }
 0x7c7   : > { %2893 = vmatprep.mubr.msk.bf16.mxu1 %vm1107_vm1, %v1518_v49 }
 0x7ce   : > { %2894 = vmatmul.mubr.msk.bf16.vlgmr.msra.gmra.mrb[40].mxu1 %vm1107_vm1, %v1519_v8 }
 0x7cf   : > { %2897 = vmatprep.mubr.msk.bf16.mxu1 %vm1107_vm1, %v1520_v36 }
 0x7d6   : > { %2898 = vmatmul.mubr.msk.bf16.gmra.mrb[44].mxu1 %vm1107_vm1, %v1521_v40 }
 0x7d7   : > { %2901 = vmatprep.mubr.msk.bf16.mxu1 %vm1107_vm1, %v1522_v10 }
 0x7de   : > { %2902 = vmatmul.mubr.msk.bf16.gmra.mrb[48].mxu1 %vm1107_vm1, %v1523_v53 }
 0x7df   : > { %2905 = vmatprep.mubr.msk.bf16.mxu1 %vm1107_vm1, %v1524_v41 }
 0x7e6   : > { %2906 = vmatmul.mubr.msk.bf16.gmra.mrb[52].mxu1 %vm1107_vm1, %v1525_v45 }
 0x8a1   : > { %v2895_v35 = vpop.f32.mrb[40].mxu1 }
 0x8a2   : > { %v2292_v2 = vadd.f32 %v2895_v35, %v2565_v62  ;;  %v2220_v0 = vpop.f32.mrb[41].mxu1 }
 0x8a3   : > { %v2290_v20 = vadd.f32 %v2565_v62, %v2220_v0  ;;  %v2896_v49 = vpop.f32.mrb[42].mxu1 }
 0x8a4   : > { %2308 = vst.msk [vmem:[%s4681_s1 + $0x10] sm:$0xff] %vm437_vm0, %v2292_v2  ;;  %v2293_v28 = vadd.f32 %v2896_v49, %v2565_v62  ;;  %v2223_v61 = vpop.f32.mrb[43].mxu1 }
 0x8a5   : > { %2306 = vst.msk [vmem:[%s4681_s1] sm:$0xff] %vm437_vm0, %v2290_v20  ;;  %v2291_v48 = vadd.f32 %v2565_v62, %v2223_v61 }
 0x8a6   : > { %2309 = vst.msk [vmem:[%s4681_s1 + $0x18] sm:$0xff] %vm437_vm0, %v2293_v28 }
 0x8a7   : > { %2307 = vst.msk [vmem:[%s4681_s1 + $0x8] sm:$0xff] %vm437_vm0, %v2291_v48 }
 0x8a9   : > { %v2899_v8 = vpop.f32.mrb[44].mxu1 }
 0x8aa   : > { %v2296_v55 = vadd.f32 %v2899_v8, %v2565_v62  ;;  %v2236_v46 = vpop.f32.mrb[45].mxu1 }
 0x8ab   : > { %v2294_v21 = vadd.f32 %v2565_v62, %v2236_v46  ;;  %v2900_v24 = vpop.f32.mrb[46].mxu1 }
 0x8ac   : > { %2312 = vst.msk [vmem:[%s4681_s1 + $0x30] sm:$0xff] %vm437_vm0, %v2296_v55  ;;  %v2297_v50 = vadd.f32 %v2900_v24, %v2565_v62  ;;  %v2239_v34 = vpop.f32.mrb[47].mxu1 }
 0x8ad   : > { %2310 = vst.msk [vmem:[%s4681_s1 + $0x20] sm:$0xff] %vm437_vm0, %v2294_v21  ;;  %v2295_v38 = vadd.f32 %v2565_v62, %v2239_v34 }
 0x8ae   : > { %2313 = vst.msk [vmem:[%s4681_s1 + $0x38] sm:$0xff] %vm437_vm0, %v2297_v50 }
 0x8af   : > { %2311 = vst.msk [vmem:[%s4681_s1 + $0x28] sm:$0xff] %vm437_vm0, %v2295_v38 }
 0x8b1   : > { %v2903_v43 = vpop.f32.mrb[48].mxu1 }
 0x8b2   : > { %v2300_v31 = vadd.f32 %v2903_v43, %v2565_v62  ;;  %v2252_v1 = vpop.f32.mrb[49].mxu1 }
 0x8b3   : > { %v2298_v36 = vadd.f32 %v2565_v62, %v2252_v1  ;;  %v2904_v5 = vpop.f32.mrb[50].mxu1 }
 0x8b4   : > { %2316 = vst.msk [vmem:[%s4681_s1 + $0x50] sm:$0xff] %vm437_vm0, %v2300_v31  ;;  %v2301_v18 = vadd.f32 %v2904_v5, %v2565_v62  ;;  %v2255_v60 = vpop.f32.mrb[51].mxu1 }
 0x8b5   : > { %2314 = vst.msk [vmem:[%s4681_s1 + $0x40] sm:$0xff] %vm437_vm0, %v2298_v36  ;;  %v2299_v51 = vadd.f32 %v2565_v62, %v2255_v60 }
 0x8b6   : > { %2317 = vst.msk [vmem:[%s4681_s1 + $0x58] sm:$0xff] %vm437_vm0, %v2301_v18 }
 0x8b7   : > { %2315 = vst.msk [vmem:[%s4681_s1 + $0x48] sm:$0xff] %vm437_vm0, %v2299_v51 }
 0x8b9   : > { %v2907_v63 = vpop.f32.mrb[52].mxu1 }
 0x8ba   : > { %v2304_v17 = vadd.f32 %v2907_v63, %v2565_v62  ;;  %v2268_v40 = vpop.f32.mrb[53].mxu1 }
 0x8bb   : > { %v2302_v52 = vadd.f32 %v2565_v62, %v2268_v40  ;;  %v2908_v11 = vpop.f32.mrb[54].mxu1 }
 0x8bc   : > { %2320 = vst.msk [vmem:[%s4681_s1 + $0x70] sm:$0xff] %vm437_vm0, %v2304_v17  ;;  %v2305_v32 = vadd.f32 %v2908_v11, %v2565_v62  ;;  %v2271_v33 = vpop.f32.mrb[55].mxu1 }
 0x8bd   : > { %2318 = vst.msk [vmem:[%s4681_s1 + $0x60] sm:$0xff] %vm437_vm0, %v2302_v52  ;;  %v2303_v27 = vadd.f32 %v2565_v62, %v2271_v33 }
 0x8be   : > { %2321 = vst.msk [vmem:[%s4681_s1 + $0x78] sm:$0xff] %vm437_vm0, %v2305_v32 }
 0x8bf   : > { %2319 = vst.msk [vmem:[%s4681_s1 + $0x68] sm:$0xff] %vm437_vm0, %v2303_v27 }
 0x8c0   : > { %3488 = shalt.err (!%p3485_p11)
}
 0x8c1   : > { %s3489_s22 = scalar_lea.hbm %s4714_s13, 2048  ;;  %s3493_s1 = scalar_lea.hbm %s4774_s8, 4096 }
 0x8c2   : > { %p3490_p12 = scmp.ne.s32.totalorder %s4714_s13, %s3489_s22  ;;  %p3494_p9 = scmp.lt.u32.totalorder %s4714_s13, %s4774_s8 }
 0x8c3   : > { %p3495_p7 = scmp.lt.u32.totalorder %s3493_s1, %s3489_s22  ;;  %p3497_p4 = scmp.lt.u32.totalorder %s3489_s22, %s4714_s13 }
 0x8c4   : > { %p3491_p0 = pnand %p3490_p12, %p4801_p13 }
 0x8c5   : > { %p3496_p10 = por %p3495_p7, %p3494_p9 }
 0x8c6   : > { %p3492_p5 = pneg %p3491_p0 }
 0x8c7   : > { %p3498_p1 = por %p3497_p4, %p3496_p10 }
 0x8c9   : > { %p3499_p3 = pnand %p3498_p1, %p3492_p5 }
 0x8cb   : > { %3502 = shalt.err (!%p3499_p3)
}
 0x8cc   : > { %s3573_s23 = smov 128   ;;  %s3574_s25 = smov 8  }
 0x8cd   : > { %2987 = dma.vmem_to_hbm [thread:$0]  (%p4801_p13), %s4716_s9, 2048, %s4714_s13, %s2323_s11, %s3573_s23, %s3573_s23, %s3574_s25  }
 0x8ce PF: > { %s2351_s20 = sand.u32 1, %s3545_s27   ;;  %p4802_p2 = scmp.ne.s32.totalorder %s4786_s24, 0 }
 0x8cf   : > { %p4803_p8 = scmp.ge.s32.totalorder %s3557_s30, 2  ;;  %s2352_s14 = scalar_lea.sflag [#allocation4], %s2351_s20 }
 0x8d1   : > { %p3016_p6 = pnand %p4803_p8, %p4802_p2 }
 0x8d3   : > { %3540 = dma.done.wait (!%p3016_p6), %s2352_s14, 2048  }
 0x8d4   : > { %3542 = vsyncadd (!%p3016_p6), %s2352_s14, 4294965248  ;;  %p25_p11 = scmp.ge.s32.totalorder %s3827_s15, 4   ;;  %s4804_s27 = smov %s3549_s28 }
 0x8d5   : > { %s4805_s28 = smov %s3553_s29  ;;  %s4806_s29 = smov %s3839_s16 }
 0x8d6   : > { %s4807_s30 = smov %s3827_s15  ;;  %27 = sbr.rel (!%p25_p11) target bundleno = 11 (0xb), region = 126 }
 0x8dd   :  { %2357 = vsyncpa [#allocation3], 1 }
 0x8de   :  { %2359 = vsyncpa [#allocation3 + $0x1], 1 }
 0x8df   :  { %2360 = vsyncpa [#allocation6], 1 }
 0x8e0   :  { %2361 = vsyncpa [#allocation9], 1 }
 0x8e1   :  { %2362 = vsyncpa [#allocation12], 1 }
 0x8e2   :  { %2363 = vsyncpa [#allocation15], 1 }
 0x8e3   :  { %2364 = vsyncpa [#allocation4], 1 }
 0x8e4   :  { %2366 = vsyncpa [#allocation4 + $0x1], 1 }

</bundles_post_ra>
